<compile_context>
chip_gen: v7x
topology: tpu7x:2x2x1
jax: 0.10.0
libtpu: 0.0.40
codegen_flags: <defaults>
</compile_context>

<pallas_src>
import math
from functools import lru_cache, partial
from itertools import permutations

import numpy as np
import jax
import jax.numpy as jnp
from jax.experimental import pallas as pl
from jax.experimental.pallas import tpu as pltpu

LOG_HALF = math.log(0.5)


def ssp(v):
    # shifted softplus: log(0.5*exp(v) + 0.5) = softplus(v) + log(0.5)
    return jnp.maximum(v, 0.0) + jnp.log1p(jnp.exp(-jnp.abs(v))) + LOG_HALF


# ---------------------------------------------------------------------------
# Pallas kernel: one grid step per block of BB walkers.
# ---------------------------------------------------------------------------
def schnet_spin_kernel(
    x_ref,                 # (BB*n, Demb)   bf16
    y_ref,                 # (BB, M, K)     f32
    ee_ref,                # (BB*n*n, E)    bf16  electron-electron edges (pairs flat)
    en_ref,                # (BB*n*M, E)    bf16  electron-nucleus edges  (pairs flat)
    wh_ref, bh_ref,        # (Demb, K) bf16, (1, K) f32
    w1e_ref, b1e_ref,      # (E, 2*mid) bf16 = [W1_same | W1_anti], (1, 2*mid) f32
    w2e_ref, b2e_ref,      # (2*mid, 2*K) bf16 block-diag, (1, 2*K) f32
    w1n_ref, b1n_ref,      # (E, mid) bf16, (1, mid) f32
    w2n_ref, b2n_ref,      # (mid, K) bf16, (1, K) f32
    g_ref,                 # (3*K, Demb) bf16 = [G_same; G_anti; G_n]
    mask_ref,              # (n, n, 2*K) f32 spin masks: [same(i!=j) | anti] along lanes
    o_ref,                 # (BB*n, Demb) f32
):
    BB, M, K = y_ref.shape
    n = mask_ref.shape[0]
    K2 = 2 * K
    bf16 = jnp.bfloat16
    dot = lambda a, b: jnp.dot(a, b, preferred_element_type=jnp.float32)

    # h subnet (single Linear with bias), duplicated along [same | anti] lanes.
    h = dot(x_ref[...], wh_ref[...]) + bh_ref[...]                    # (BB*n, K) f32
    h2 = jnp.concatenate([h, h], axis=-1).reshape(BB, 1, n, K2)       # broadcast over i

    # fused same/anti w subnet (Linear -> SSP -> Linear) on flattened pairs.
    hw = ssp(dot(ee_ref[...], w1e_ref[...]) + b1e_ref[...])           # (BB*n*n, 2*mid)
    wsa = dot(hw.astype(bf16), w2e_ref[...]) + b2e_ref[...]           # (BB*n*n, [ws|wa])

    # spin-resolved message aggregation over neighbours j.  The static mask
    # exactly encodes the idx_pair_spin gathers (same-spin with i!=j in lanes
    # [:K], anti-spin in lanes [K:]).
    msg = wsa.reshape(BB, n, n, K2) * mask_ref[...] * h2              # (BB, n, n, 2K)
    z_elec = jnp.sum(msg, axis=2)                                     # (BB, n, 2K)

    # nuclear w subnet + aggregation over nuclei m.
    hn = ssp(dot(en_ref[...], w1n_ref[...]) + b1n_ref[...])           # (BB*n*M, mid)
    wn = dot(hn.astype(bf16), w2n_ref[...]) + b2n_ref[...]            # (BB*n*M, K)
    msg_n = wn.reshape(BB, n, M, K) * y_ref[...].reshape(BB, 1, M, K)
    z_nuc = jnp.sum(msg_n, axis=2)                                    # (BB, n, K)

    # fused g subnets: [z_same | z_anti | z_nuc] @ [G_same; G_anti; G_n].
    z = jnp.concatenate(
        [z_elec.reshape(BB * n, K2), z_nuc.reshape(BB * n, K)], axis=-1)
    o_ref[...] = dot(z.astype(bf16), g_ref[...])                      # (BB*n, Demb) f32


# ---------------------------------------------------------------------------
# Wrapper: reshapes, fused parameter slabs, static spin masks, pallas_call.
# ---------------------------------------------------------------------------
@lru_cache(maxsize=None)
def _spin_mask(n, n_up, K):
    """f32 (n, n, 2K) mask: lanes [:K] same-spin (i!=j), lanes [K:] anti-spin."""
    spin = np.arange(n) >= n_up
    eye = np.eye(n, dtype=bool)
    same = ((spin[:, None] == spin[None, :]) & ~eye).astype(np.float32)
    anti = (spin[:, None] != spin[None, :]).astype(np.float32)
    m = np.concatenate([np.broadcast_to(same[:, :, None], (n, n, K)),
                        np.broadcast_to(anti[:, :, None], (n, n, K))], axis=2)
    return jnp.asarray(m)          # uploaded once, reused across calls


def _pick_block_b(B, n):
    # target a few thousand pair-rows per step; keep >=2 grid steps (v7x: 2 TCs)
    cap = max(1, 4096 // max(n * n, 1))
    if B > 1:
        cap = min(cap, max(1, B // 2))
    cap = min(cap, B)
    for bb in range(cap, 0, -1):
        if B % bb == 0:
            return bb
    return 1


def schnet_spin_layer(x, Y, edges_elec, edges_nuc, params, n_up, block_b=None):
    B, n, Demb = x.shape
    M, K = Y.shape[1], Y.shape[2]
    E = edges_elec.shape[-1]
    mid = params["W1_same"].shape[1]
    mid2, K2, K3 = 2 * mid, 2 * K, 3 * K
    bf16, f32 = jnp.bfloat16, jnp.float32

    BB = block_b or _pick_block_b(B, n)
    assert B % BB == 0, (B, BB)
    grid = (B // BB,)

    # bf16 operands for the MXU (f32 accumulation happens inside the kernel).
    x_flat = x.reshape(B * n, Demb).astype(bf16)
    ee = edges_elec.reshape(B * n * n, E).astype(bf16)
    en = edges_nuc.reshape(B * n * M, E).astype(bf16)
    Yf = Y.astype(f32)

    # fused parameter slabs (fewer refs, >=128-wide matmul lane/contraction dims).
    w1e = jnp.concatenate([params["W1_same"], params["W1_anti"]], axis=1).astype(bf16)
    b1e = jnp.concatenate([params["b1_same"], params["b1_anti"]], axis=1).astype(f32)
    w2e = (jnp.zeros((mid2, K2), f32)
           .at[:mid, :K].set(params["W2_same"])
           .at[mid:, K:].set(params["W2_anti"])).astype(bf16)
    b2e = jnp.concatenate([params["b2_same"], params["b2_anti"]], axis=1).astype(f32)
    g = jnp.concatenate(
        [params["G_same"], params["G_anti"], params["G_n"]], axis=0).astype(bf16)
    wh = params["Wh"].astype(bf16)
    bh = params["bh"].astype(f32)
    w1n, b1n = params["W1_n"].astype(bf16), params["b1_n"].astype(f32)
    w2n, b2n = params["W2_n"].astype(bf16), params["b2_n"].astype(f32)

    mask = _spin_mask(n, n_up, K)

    rows = lambda r, c: pl.BlockSpec((r, c), lambda b: (b, 0))
    full = lambda shape: pl.BlockSpec(shape, lambda b: (0, 0))

    in_specs = [
        rows(BB * n, Demb),                                   # x (flattened)
        pl.BlockSpec((BB, M, K), lambda b: (b, 0, 0)),        # Y
        rows(BB * n * n, E),                                  # edges_elec (pairs flat)
        rows(BB * n * M, E),                                  # edges_nuc  (pairs flat)
        full((Demb, K)), full((1, K)),                        # h subnet
        full((E, mid2)), full((1, mid2)),                     # fused w same|anti L1
        full((mid2, K2)), full((1, K2)),                      # fused w same|anti L2
        full((E, mid)), full((1, mid)),                       # w_n L1
        full((mid, K)), full((1, K)),                         # w_n L2
        full((K3, Demb)),                                     # fused g
        pl.BlockSpec((n, n, K2), lambda b: (0, 0, 0)),        # spin mask
    ]

    flops = 2 * B * (n * Demb * K
                     + n * n * (E * mid2 + mid2 * K2)
                     + n * M * (E * mid + mid * K)
                     + n * K3 * Demb)
    transcendentals = 2 * B * (n * n * mid2 + n * M * mid)
    bytes_accessed = (2 * B * n * (Demb + n * E + M * E)      # bf16 x / ee / en
                      + 4 * B * (M * K + n * Demb))           # f32 Y + output

    out = pl.pallas_call(
        schnet_spin_kernel,
        out_shape=jax.ShapeDtypeStruct((B * n, Demb), f32),
        grid=grid,
        in_specs=in_specs,
        out_specs=rows(BB * n, Demb),
        compiler_params=pltpu.CompilerParams(
            dimension_semantics=("parallel",),
            vmem_limit_bytes=48 * 1024 * 1024,   # headroom for larger BB; < v7x 64 MiB
        ),
        cost_estimate=pl.CostEstimate(flops=flops,
                                      transcendentals=transcendentals,
                                      bytes_accessed=bytes_accessed),
    )(x_flat, Yf, ee, en,
      wh, bh, w1e, b1e, w2e, b2e, w1n, b1n, w2n, b2n, g, mask)
    return out.reshape(B, n, Demb)


# ---------------------------------------------------------------------------
# Deterministic parameter init (PauliNet SubnetFactory defaults:
#   w = 2-layer MLP w/ SSP, h = 1 Linear (bias), g = 1 Linear (no bias)).
# ---------------------------------------------------------------------------
def init_params(key, E, mid, K, Demb):
    keys = iter(jax.random.split(key, 32))
    lin = lambda k, fi, fo: jax.random.normal(k, (fi, fo), jnp.float32) / np.sqrt(fi)
    p = {}
    p["Wh"] = lin(next(keys), Demb, K)
    p["bh"] = 0.1 * jax.random.normal(next(keys), (1, K), jnp.float32)
    for lbl in ("same", "anti", "n"):
        p[f"W1_{lbl}"] = lin(next(keys), E, mid)
        p[f"b1_{lbl}"] = 0.1 * jax.random.normal(next(keys), (1, mid), jnp.float32)
        p[f"W2_{lbl}"] = lin(next(keys), mid, K)
        p[f"b2_{lbl}"] = 0.1 * jax.random.normal(next(keys), (1, K), jnp.float32)
        p[f"G_{lbl}"] = lin(next(keys), K, Demb)
    return p


# ---------------------------------------------------------------------------
# Pure-JAX reference mirroring the PyTorch forward (explicit idx_pair_spin
# gathers) with the SAME bf16-operand / f32-accumulation matmul semantics.
# ---------------------------------------------------------------------------
def idx_pair_spin_np(n_up, n_down):
    n = n_up + n_down
    ij = np.array(list(permutations(range(n), 2)), dtype=np.int32).T
    mask = ij < n_up
    return [
        ("same", ij[:, mask[0] & mask[1]].reshape(2, n_up, max(n_up - 1, 0))),
        ("anti", ij[:, mask[0] & ~mask[1]].reshape(2, n_up, n_down)),
        ("anti", ij[:, ~mask[0] & mask[1]].reshape(2, n_down, n_up)),
        ("same", ij[:, ~mask[0] & ~mask[1]].reshape(2, n_down, max(n_down - 1, 0))),
    ]


def reference_forward(x, Y, edges_elec, edges_nuc, params, n_up):
    n = x.shape[-2]
    n_down = n - n_up
    bdot = lambda a, b: jnp.dot(a.astype(jnp.bfloat16), b.astype(jnp.bfloat16),
                                preferred_element_type=jnp.float32)

    def w_mlp(e, lbl):
        h1 = ssp(bdot(e, params[f"W1_{lbl}"]) + params[f"b1_{lbl}"])
        return bdot(h1, params[f"W2_{lbl}"]) + params[f"b2_{lbl}"]

    h = bdot(x, params["Wh"]) + params["bh"]
    zs = []
    for lbl, ij in idx_pair_spin_np(n_up, n_down):
        i, j = ij
        e_ij = edges_elec[:, i, j, :]
        zs.append((w_mlp(e_ij, lbl) * h[:, j, :]).sum(axis=-2))
    z_same = jnp.concatenate([zs[0], zs[3]], axis=-2)
    z_anti = jnp.concatenate([zs[1], zs[2]], axis=-2)
    z_nuc = (w_mlp(edges_nuc, "n") * Y[:, None, :, :]).sum(axis=-2)
    return (bdot(z_same, params["G_same"]) + bdot(z_anti, params["G_anti"])
            + bdot(z_nuc, params["G_n"]))


if __name__ == "__main__":
    # n_elec and n_nuc chosen as multiples of 8 so in-kernel reshapes are
    # tile-preserving; Demb=128 keeps the output stores lane-dense.
    B, n_up, n_down, M = 8, 4, 4, 8
    n = n_up + n_down
    E, mid, K, Demb = 32, 64, 64, 128   # dist_feat, w-hidden, kernel_dim, embedding_dim

    key = jax.random.PRNGKey(0)
    k1, k2, k3, k4, kp = jax.random.split(key, 5)
    x = jax.random.normal(k1, (B, n, Demb), jnp.float32)
    Y = jax.random.normal(k2, (B, M, K), jnp.float32)
    edges_elec = jax.random.normal(k3, (B, n, n, E), jnp.float32)
    edges_nuc = jax.random.normal(k4, (B, n, M, E), jnp.float32)
    params = init_params(kp, E, mid, K, Demb)

    fwd = jax.jit(partial(schnet_spin_layer, n_up=n_up))
    out = jax.block_until_ready(fwd(x, Y, edges_elec, edges_nuc, params))

    ref = reference_forward(x, Y, edges_elec, edges_nuc, params, n_up)
    assert out.shape == (B, n, Demb)
    np.testing.assert_allclose(np.asarray(out), np.asarray(ref), rtol=1e-2, atol=1e-2)
    print("KERNEL_OK")
</pallas_src>

<mosaic_0001>
module attributes {stable_mosaic.version = 11 : i64} {
  func.func @schnet_spin_kernel(%arg0: i32, %arg1: memref<32x128xbf16, #tpu.memory_space<vmem>>, %arg2: memref<4x8x64xf32, #tpu.memory_space<vmem>>, %arg3: memref<256x32xbf16, #tpu.memory_space<vmem>>, %arg4: memref<256x32xbf16, #tpu.memory_space<vmem>>, %arg5: memref<128x64xbf16, #tpu.memory_space<vmem>>, %arg6: memref<1x64xf32, #tpu.memory_space<vmem>>, %arg7: memref<32x128xbf16, #tpu.memory_space<vmem>>, %arg8: memref<1x128xf32, #tpu.memory_space<vmem>>, %arg9: memref<128x128xbf16, #tpu.memory_space<vmem>>, %arg10: memref<1x128xf32, #tpu.memory_space<vmem>>, %arg11: memref<32x64xbf16, #tpu.memory_space<vmem>>, %arg12: memref<1x64xf32, #tpu.memory_space<vmem>>, %arg13: memref<64x64xbf16, #tpu.memory_space<vmem>>, %arg14: memref<1x64xf32, #tpu.memory_space<vmem>>, %arg15: memref<192x128xbf16, #tpu.memory_space<vmem>>, %arg16: memref<8x8x128xf32, #tpu.memory_space<vmem>>, %arg17: memref<32x128xf32, #tpu.memory_space<vmem>>) attributes {dimension_semantics = [#tpu.dimension_semantics<parallel>], iteration_bounds = array<i64: 2>, scalar_prefetch = 0 : i64, scratch_operands = 0 : i64, tpu.core_type = #tpu.core_type<tc>, window_params = [{transform_indices = @transform_0, window_bounds = array<i64: 32, 128>}, {transform_indices = @transform_1, window_bounds = array<i64: 4, 8, 64>}, {transform_indices = @transform_2, window_bounds = array<i64: 256, 32>}, {transform_indices = @transform_3, window_bounds = array<i64: 256, 32>}, {pipeline_mode = #tpu.pipeline_mode<synchronous>, transform_indices = @transform_4, window_bounds = array<i64: 128, 64>}, {pipeline_mode = #tpu.pipeline_mode<synchronous>, transform_indices = @transform_5, window_bounds = array<i64: 1, 64>}, {pipeline_mode = #tpu.pipeline_mode<synchronous>, transform_indices = @transform_6, window_bounds = array<i64: 32, 128>}, {pipeline_mode = #tpu.pipeline_mode<synchronous>, transform_indices = @transform_7, window_bounds = array<i64: 1, 128>}, {pipeline_mode = #tpu.pipeline_mode<synchronous>, transform_indices = @transform_8, window_bounds = array<i64: 128, 128>}, {pipeline_mode = #tpu.pipeline_mode<synchronous>, transform_indices = @transform_9, window_bounds = array<i64: 1, 128>}, {pipeline_mode = #tpu.pipeline_mode<synchronous>, transform_indices = @transform_10, window_bounds = array<i64: 32, 64>}, {pipeline_mode = #tpu.pipeline_mode<synchronous>, transform_indices = @transform_11, window_bounds = array<i64: 1, 64>}, {pipeline_mode = #tpu.pipeline_mode<synchronous>, transform_indices = @transform_12, window_bounds = array<i64: 64, 64>}, {pipeline_mode = #tpu.pipeline_mode<synchronous>, transform_indices = @transform_13, window_bounds = array<i64: 1, 64>}, {pipeline_mode = #tpu.pipeline_mode<synchronous>, transform_indices = @transform_14, window_bounds = array<i64: 192, 128>}, {pipeline_mode = #tpu.pipeline_mode<synchronous>, transform_indices = @transform_15, window_bounds = array<i64: 8, 8, 128>}, {transform_indices = @transform_16, window_bounds = array<i64: 32, 128>}]} {
    %c0 = arith.constant 0 : index
    %c0_0 = arith.constant 0 : index
    %0 = vector.load %arg1[%c0, %c0_0] : memref<32x128xbf16, #tpu.memory_space<vmem>>, vector<32x128xbf16>
    %c0_1 = arith.constant 0 : index
    %c0_2 = arith.constant 0 : index
    %1 = vector.load %arg5[%c0_1, %c0_2] : memref<128x64xbf16, #tpu.memory_space<vmem>>, vector<128x64xbf16>
    %cst = arith.constant dense<0.000000e+00> : vector<32x64xf32>
    %2 = tpu.matmul %0, %1, %cst {dimension_numbers = #tpu.dot_dimension_numbers<[1], [0], [0], [1], [0, 0, 1, 1], [], []>} : vector<32x128xbf16>, vector<128x64xbf16>, vector<32x64xf32> -> vector<32x64xf32>
    %c0_3 = arith.constant 0 : index
    %c0_4 = arith.constant 0 : index
    %3 = vector.load %arg6[%c0_3, %c0_4] : memref<1x64xf32, #tpu.memory_space<vmem>>, vector<1x64xf32>
    %4 = vector.broadcast %3 : vector<1x64xf32> to vector<32x64xf32>
    %5 = arith.addf %2, %4 : vector<32x64xf32>
    %6 = tpu.concatenate %5, %5 in 1 : vector<32x64xf32>, vector<32x64xf32> -> vector<32x128xf32>
    %7 = vector.shape_cast %6 : vector<32x128xf32> to vector<4x1x8x128xf32>
    %c0_5 = arith.constant 0 : index
    %c0_6 = arith.constant 0 : index
    %8 = vector.load %arg3[%c0_5, %c0_6] : memref<256x32xbf16, #tpu.memory_space<vmem>>, vector<256x32xbf16>
    %c0_7 = arith.constant 0 : index
    %c0_8 = arith.constant 0 : index
    %9 = vector.load %arg7[%c0_7, %c0_8] : memref<32x128xbf16, #tpu.memory_space<vmem>>, vector<32x128xbf16>
    %cst_9 = arith.constant dense<0.000000e+00> : vector<256x128xf32>
    %10 = tpu.matmul %8, %9, %cst_9 {dimension_numbers = #tpu.dot_dimension_numbers<[1], [0], [0], [1], [0, 0, 1, 1], [], []>} : vector<256x32xbf16>, vector<32x128xbf16>, vector<256x128xf32> -> vector<256x128xf32>
    %c0_10 = arith.constant 0 : index
    %c0_11 = arith.constant 0 : index
    %11 = vector.load %arg8[%c0_10, %c0_11] : memref<1x128xf32, #tpu.memory_space<vmem>>, vector<1x128xf32>
    %12 = vector.broadcast %11 : vector<1x128xf32> to vector<256x128xf32>
    %13 = arith.addf %10, %12 : vector<256x128xf32>
    %cst_12 = arith.constant 0.000000e+00 : f32
    %14 = vector.broadcast %cst_12 : f32 to vector<256x128xf32>
    %15 = arith.maximumf %13, %14 : vector<256x128xf32>
    %16 = math.absf %13 : vector<256x128xf32>
    %cst_13 = arith.constant 0.000000e+00 : f32
    %17 = vector.broadcast %cst_13 : f32 to vector<256x128xf32>
    %18 = arith.subf %17, %16 : vector<256x128xf32>
    %19 = math.exp %18 : vector<256x128xf32>
    %20 = math.log1p %19 : vector<256x128xf32>
    %21 = arith.addf %15, %20 : vector<256x128xf32>
    %cst_14 = arith.constant -0.693147182 : f32
    %22 = vector.broadcast %cst_14 : f32 to vector<256x128xf32>
    %23 = arith.addf %21, %22 : vector<256x128xf32>
    %24 = arith.truncf %23 : vector<256x128xf32> to vector<256x128xbf16>
    %c0_15 = arith.constant 0 : index
    %c0_16 = arith.constant 0 : index
    %25 = vector.load %arg9[%c0_15, %c0_16] : memref<128x128xbf16, #tpu.memory_space<vmem>>, vector<128x128xbf16>
    %cst_17 = arith.constant dense<0.000000e+00> : vector<256x128xf32>
    %26 = tpu.matmul %24, %25, %cst_17 {dimension_numbers = #tpu.dot_dimension_numbers<[1], [0], [0], [1], [0, 0, 1, 1], [], []>} : vector<256x128xbf16>, vector<128x128xbf16>, vector<256x128xf32> -> vector<256x128xf32>
    %c0_18 = arith.constant 0 : index
    %c0_19 = arith.constant 0 : index
    %27 = vector.load %arg10[%c0_18, %c0_19] : memref<1x128xf32, #tpu.memory_space<vmem>>, vector<1x128xf32>
    %28 = vector.broadcast %27 : vector<1x128xf32> to vector<256x128xf32>
    %29 = arith.addf %26, %28 : vector<256x128xf32>
    %30 = vector.shape_cast %29 : vector<256x128xf32> to vector<4x8x8x128xf32>
    %c0_20 = arith.constant 0 : index
    %c0_21 = arith.constant 0 : index
    %c0_22 = arith.constant 0 : index
    %31 = vector.load %arg16[%c0_20, %c0_21, %c0_22] : memref<8x8x128xf32, #tpu.memory_space<vmem>>, vector<8x8x128xf32>
    %32 = vector.shape_cast %31 : vector<8x8x128xf32> to vector<1x8x8x128xf32>
    %33 = vector.broadcast %32 : vector<1x8x8x128xf32> to vector<4x8x8x128xf32>
    %34 = arith.mulf %30, %33 : vector<4x8x8x128xf32>
    %35 = vector.broadcast %7 : vector<4x1x8x128xf32> to vector<4x8x8x128xf32>
    %36 = arith.mulf %34, %35 : vector<4x8x8x128xf32>
    %cst_23 = arith.constant dense<0.000000e+00> : vector<4x8x128xf32>
    %37 = vector.multi_reduction <add>, %36, %cst_23 [2] : vector<4x8x8x128xf32> to vector<4x8x128xf32>
    %c0_24 = arith.constant 0 : index
    %c0_25 = arith.constant 0 : index
    %38 = vector.load %arg4[%c0_24, %c0_25] : memref<256x32xbf16, #tpu.memory_space<vmem>>, vector<256x32xbf16>
    %c0_26 = arith.constant 0 : index
    %c0_27 = arith.constant 0 : index
    %39 = vector.load %arg11[%c0_26, %c0_27] : memref<32x64xbf16, #tpu.memory_space<vmem>>, vector<32x64xbf16>
    %cst_28 = arith.constant dense<0.000000e+00> : vector<256x64xf32>
    %40 = tpu.matmul %38, %39, %cst_28 {dimension_numbers = #tpu.dot_dimension_numbers<[1], [0], [0], [1], [0, 0, 1, 1], [], []>} : vector<256x32xbf16>, vector<32x64xbf16>, vector<256x64xf32> -> vector<256x64xf32>
    %c0_29 = arith.constant 0 : index
    %c0_30 = arith.constant 0 : index
    %41 = vector.load %arg12[%c0_29, %c0_30] : memref<1x64xf32, #tpu.memory_space<vmem>>, vector<1x64xf32>
    %42 = vector.broadcast %41 : vector<1x64xf32> to vector<256x64xf32>
    %43 = arith.addf %40, %42 : vector<256x64xf32>
    %cst_31 = arith.constant 0.000000e+00 : f32
    %44 = vector.broadcast %cst_31 : f32 to vector<256x64xf32>
    %45 = arith.maximumf %43, %44 : vector<256x64xf32>
    %46 = math.absf %43 : vector<256x64xf32>
    %cst_32 = arith.constant 0.000000e+00 : f32
    %47 = vector.broadcast %cst_32 : f32 to vector<256x64xf32>
    %48 = arith.subf %47, %46 : vector<256x64xf32>
    %49 = math.exp %48 : vector<256x64xf32>
    %50 = math.log1p %49 : vector<256x64xf32>
    %51 = arith.addf %45, %50 : vector<256x64xf32>
    %cst_33 = arith.constant -0.693147182 : f32
    %52 = vector.broadcast %cst_33 : f32 to vector<256x64xf32>
    %53 = arith.addf %51, %52 : vector<256x64xf32>
    %54 = arith.truncf %53 : vector<256x64xf32> to vector<256x64xbf16>
    %c0_34 = arith.constant 0 : index
    %c0_35 = arith.constant 0 : index
    %55 = vector.load %arg13[%c0_34, %c0_35] : memref<64x64xbf16, #tpu.memory_space<vmem>>, vector<64x64xbf16>
    %cst_36 = arith.constant dense<0.000000e+00> : vector<256x64xf32>
    %56 = tpu.matmul %54, %55, %cst_36 {dimension_numbers = #tpu.dot_dimension_numbers<[1], [0], [0], [1], [0, 0, 1, 1], [], []>} : vector<256x64xbf16>, vector<64x64xbf16>, vector<256x64xf32> -> vector<256x64xf32>
    %c0_37 = arith.constant 0 : index
    %c0_38 = arith.constant 0 : index
    %57 = vector.load %arg14[%c0_37, %c0_38] : memref<1x64xf32, #tpu.memory_space<vmem>>, vector<1x64xf32>
    %58 = vector.broadcast %57 : vector<1x64xf32> to vector<256x64xf32>
    %59 = arith.addf %56, %58 : vector<256x64xf32>
    %60 = vector.shape_cast %59 : vector<256x64xf32> to vector<4x8x8x64xf32>
    %c0_39 = arith.constant 0 : index
    %c0_40 = arith.constant 0 : index
    %c0_41 = arith.constant 0 : index
    %61 = vector.load %arg2[%c0_39, %c0_40, %c0_41] : memref<4x8x64xf32, #tpu.memory_space<vmem>>, vector<4x8x64xf32>
    %62 = vector.shape_cast %61 : vector<4x8x64xf32> to vector<4x1x8x64xf32>
    %63 = vector.broadcast %62 : vector<4x1x8x64xf32> to vector<4x8x8x64xf32>
    %64 = arith.mulf %60, %63 : vector<4x8x8x64xf32>
    %cst_42 = arith.constant dense<0.000000e+00> : vector<4x8x64xf32>
    %65 = vector.multi_reduction <add>, %64, %cst_42 [2] : vector<4x8x8x64xf32> to vector<4x8x64xf32>
    %66 = vector.shape_cast %37 : vector<4x8x128xf32> to vector<32x128xf32>
    %67 = vector.shape_cast %65 : vector<4x8x64xf32> to vector<32x64xf32>
    %68 = tpu.concatenate %66, %67 in 1 : vector<32x128xf32>, vector<32x64xf32> -> vector<32x192xf32>
    %69 = arith.truncf %68 : vector<32x192xf32> to vector<32x192xbf16>
    %c0_43 = arith.constant 0 : index
    %c0_44 = arith.constant 0 : index
    %70 = vector.load %arg15[%c0_43, %c0_44] : memref<192x128xbf16, #tpu.memory_space<vmem>>, vector<192x128xbf16>
    %cst_45 = arith.constant dense<0.000000e+00> : vector<32x128xf32>
    %71 = tpu.matmul %69, %70, %cst_45 {dimension_numbers = #tpu.dot_dimension_numbers<[1], [0], [0], [1], [0, 0, 1, 1], [], []>} : vector<32x192xbf16>, vector<192x128xbf16>, vector<32x128xf32> -> vector<32x128xf32>
    %c0_46 = arith.constant 0 : index
    %c0_47 = arith.constant 0 : index
    %72 = vector.load %arg17[%c0_46, %c0_47] : memref<32x128xf32, #tpu.memory_space<vmem>>, vector<32x128xf32>
    tpu.vector_store %arg17[%c0_46, %c0_47], %71 {strides = array<i32>} : memref<32x128xf32, #tpu.memory_space<vmem>>, vector<32x128xf32>,
    return
  }
  func.func @transform_0(%arg0: i32) -> (i32, i32) {
    %c0_i32 = arith.constant 0 : i32
    %c0_i32_0 = arith.constant 0 : i32
    return %arg0, %c0_i32 : i32, i32
  }
  func.func @transform_1(%arg0: i32) -> (i32, i32, i32) {
    %c0_i32 = arith.constant 0 : i32
    %c0_i32_0 = arith.constant 0 : i32
    %c0_i32_1 = arith.constant 0 : i32
    return %arg0, %c0_i32, %c0_i32_0 : i32, i32, i32
  }
  func.func @transform_2(%arg0: i32) -> (i32, i32) {
    %c0_i32 = arith.constant 0 : i32
    %c0_i32_0 = arith.constant 0 : i32
    return %arg0, %c0_i32 : i32, i32
  }
  func.func @transform_3(%arg0: i32) -> (i32, i32) {
    %c0_i32 = arith.constant 0 : i32
    %c0_i32_0 = arith.constant 0 : i32
    return %arg0, %c0_i32 : i32, i32
  }
  func.func @transform_4(%arg0: i32) -> (i32, i32) {
    %c0_i32 = arith.constant 0 : i32
    %c0_i32_0 = arith.constant 0 : i32
    %c0_i32_1 = arith.constant 0 : i32
    return %c0_i32, %c0_i32_0 : i32, i32
  }
  func.func @transform_5(%arg0: i32) -> (i32, i32) {
    %c0_i32 = arith.constant 0 : i32
    %c0_i32_0 = arith.constant 0 : i32
    %c0_i32_1 = arith.constant 0 : i32
    return %c0_i32, %c0_i32_0 : i32, i32
  }
  func.func @transform_6(%arg0: i32) -> (i32, i32) {
    %c0_i32 = arith.constant 0 : i32
    %c0_i32_0 = arith.constant 0 : i32
    %c0_i32_1 = arith.constant 0 : i32
    return %c0_i32, %c0_i32_0 : i32, i32
  }
  func.func @transform_7(%arg0: i32) -> (i32, i32) {
    %c0_i32 = arith.constant 0 : i32
    %c0_i32_0 = arith.constant 0 : i32
    %c0_i32_1 = arith.constant 0 : i32
    return %c0_i32, %c0_i32_0 : i32, i32
  }
  func.func @transform_8(%arg0: i32) -> (i32, i32) {
    %c0_i32 = arith.constant 0 : i32
    %c0_i32_0 = arith.constant 0 : i32
    %c0_i32_1 = arith.constant 0 : i32
    return %c0_i32, %c0_i32_0 : i32, i32
  }
  func.func @transform_9(%arg0: i32) -> (i32, i32) {
    %c0_i32 = arith.constant 0 : i32
    %c0_i32_0 = arith.constant 0 : i32
    %c0_i32_1 = arith.constant 0 : i32
    return %c0_i32, %c0_i32_0 : i32, i32
  }
  func.func @transform_10(%arg0: i32) -> (i32, i32) {
    %c0_i32 = arith.constant 0 : i32
    %c0_i32_0 = arith.constant 0 : i32
    %c0_i32_1 = arith.constant 0 : i32
    return %c0_i32, %c0_i32_0 : i32, i32
  }
  func.func @transform_11(%arg0: i32) -> (i32, i32) {
    %c0_i32 = arith.constant 0 : i32
    %c0_i32_0 = arith.constant 0 : i32
    %c0_i32_1 = arith.constant 0 : i32
    return %c0_i32, %c0_i32_0 : i32, i32
  }
  func.func @transform_12(%arg0: i32) -> (i32, i32) {
    %c0_i32 = arith.constant 0 : i32
    %c0_i32_0 = arith.constant 0 : i32
    %c0_i32_1 = arith.constant 0 : i32
    return %c0_i32, %c0_i32_0 : i32, i32
  }
  func.func @transform_13(%arg0: i32) -> (i32, i32) {
    %c0_i32 = arith.constant 0 : i32
    %c0_i32_0 = arith.constant 0 : i32
    %c0_i32_1 = arith.constant 0 : i32
    return %c0_i32, %c0_i32_0 : i32, i32
  }
  func.func @transform_14(%arg0: i32) -> (i32, i32) {
    %c0_i32 = arith.constant 0 : i32
    %c0_i32_0 = arith.constant 0 : i32
    %c0_i32_1 = arith.constant 0 : i32
    return %c0_i32, %c0_i32_0 : i32, i32
  }
  func.func @transform_15(%arg0: i32) -> (i32, i32, i32) {
    %c0_i32 = arith.constant 0 : i32
    %c0_i32_0 = arith.constant 0 : i32
    %c0_i32_1 = arith.constant 0 : i32
    %c0_i32_2 = arith.constant 0 : i32
    return %c0_i32, %c0_i32_0, %c0_i32_1 : i32, i32, i32
  }
  func.func @transform_16(%arg0: i32) -> (i32, i32) {
    %c0_i32 = arith.constant 0 : i32
    %c0_i32_0 = arith.constant 0 : i32
    return %arg0, %c0_i32 : i32, i32
  }
}

</mosaic_0001>

<bundles_post_ra>
// kernel: schnet_spin_layer.1
= control target key start
LH: loop header
LB: loop body
LE: loop exit
PB: predicated region body
PF: predicated region fallthrough
CT: control target
= control target key end

     0   :  { %s6849_s0 = inlined_call_operand.vmem [shape: bf16[64,128], index: 0, kind: input, shape index: {}]   ;;  %s6850_s1 = inlined_call_operand.vmem [shape: f32[8,8,64], index: 1, kind: input, shape index: {}]   ;;  %s6851_s2 = inlined_call_operand.vmem [shape: bf16[512,32], index: 2, kind: input, shape index: {}]   ;;  %s6852_s3 = inlined_call_operand.vmem [shape: bf16[512,32], index: 3, kind: input, shape index: {}]   ;;  %s6853_s4 = inlined_call_operand.vmem [shape: bf16[128,64], index: 4, kind: input, shape index: {}]   ;;  %s6854_s5 = inlined_call_operand.vmem [shape: f32[1,64], index: 5, kind: input, shape index: {}]   ;;  %s6855_s6 = inlined_call_operand.vmem [shape: bf16[32,128], index: 6, kind: input, shape index: {}]   ;;  %s6856_s7 = inlined_call_operand.vmem [shape: f32[1,128], index: 7, kind: input, shape index: {}]   ;;  %s6857_s8 = inlined_call_operand.vmem [shape: bf16[128,128], index: 8, kind: input, shape index: {}]   ;;  %s6858_s9 = inlined_call_operand.vmem [shape: f32[1,128], index: 9, kind: input, shape index: {}]   ;;  %s6859_s10 = inlined_call_operand.vmem [shape: bf16[32,64], index: 10, kind: input, shape index: {}]   ;;  %s6860_s11 = inlined_call_operand.vmem [shape: f32[1,64], index: 11, kind: input, shape index: {}]   ;;  %s6861_s12 = inlined_call_operand.vmem [shape: bf16[64,64], index: 12, kind: input, shape index: {}]   ;;  %s6862_s13 = inlined_call_operand.vmem [shape: f32[1,64], index: 13, kind: input, shape index: {}]   ;;  %s6863_s14 = inlined_call_operand.vmem [shape: bf16[192,128], index: 14, kind: input, shape index: {}]   ;;  %s6864_s15 = inlined_call_operand.vmem [shape: f32[8,8,128], index: 15, kind: input, shape index: {}]   ;;  %s6865_s16 = inlined_call_operand.hbm [shape: f32[64,128], index: 16, kind: output, shape index: {}]  }
   0x1   :  { %6883 = sst [smem:[#allocation21_spill]] %s6849_s0 }
   0x2   :  { %6884 = sst [smem:[#allocation22_spill]] %s6851_s2 }
   0x3   :  { %6885 = sst [smem:[#allocation23_spill]] %s6855_s6 }
   0x4   :  { %21 = vsyncpa [#allocation3], 0 }
   0x5   :  { %23 = vsyncpa [#allocation3 + $0x1], 0  ;;  %s4857_s21 = smov 0   ;;  %s4859_s22 = smov 0  }
   0x6   :  { %s4861_s23 = smov 0   ;;  %s4863_s24 = smov 0  }
   0x7 LB: > { %6886 = sst [smem:[#allocation5_spill]] %s4761_s23  ;;  %s4878_s25 = sadd.s32 4294967295, %s4765_s24   ;;  %s4765_s24 = sphi %s4863_s24, %s7060_s24   ;;  %s4761_s23 = sphi %s4861_s23, %s7062_s23   ;;  %s4757_s22 = sphi %s4859_s22, %s7064_s22   ;;  %s4753_s21 = sphi %s4857_s21, %s7063_s21  }
   0x8   : > { %s3902_s26 = sadd.s32 4294967294, %s4765_s24   ;;  %s4882_s27 = sadd.s32 1, %s4765_s24  }
   0x9   : > { %6887 = sst [smem:[#allocation6_spill]] %s4882_s27  ;;  %s392_s28 = sadd.s32 1, %s4761_s23 }
   0xa   : > { %s389_s29 = ssub.s32 %s4765_s24, %s4882_s27  ;;  %p402_p0 = scmp.ne.s32.totalorder %s4761_s23, %s4757_s22 }
   0xb   : > { %p390_p1 = scmp.eq.s32.totalorder %s389_s29, 0  ;;  %p403_p2 = scmp.eq.s32.totalorder %s4878_s25, 1 }
   0xc   : > { %p408_p3 = scmp.ne.s32.totalorder %s4757_s22, %s4753_s21  ;;  %p409_p4 = scmp.eq.s32.totalorder %s3902_s26, 1 }
   0xd   : > { %s4893_s30 = scalar_select %p390_p1, %s4761_s23, %s392_s28  }
   0xe   : > { %p4895_p5 = por %p403_p2, %p402_p0  ;;  %p4899_p6 = por %p409_p4, %p408_p3 }
   0xf   : > { %6888 = sst [smem:[#allocation7_spill]] %s4893_s30  ;;  %p3905_p7 = scmp.ge.s32.totalorder %s4765_s24, 1 }
  0x10   : > { %s6890_s17 = scalar_select %p4899_p6, 1, 0 }
  0x11   : > { %p499_p8 = scmp.lt.s32.totalorder %s4765_s24, 3 }
  0x12   : > { %6891 = sst [smem:[#allocation8_spill]] %s6890_s17 }
  0x13   : > { %p500_p9 = pnand %p3905_p7, %p499_p8 }
  0x15   : > { %503 = sbr.rel (%p500_p9) target bundleno = 1277 (0x4fd), region = 84 }
  0x1c   : > { %s6892_s6 = sld [smem:[#allocation23_spill]]  ;;  %s3911_s20 = sshll.u32 %s4878_s25, 5  ;;  %v4393_v2 = vld [vmem:[%s6853_s4] sm:$0xff]   ;;  %v4394_v3 = vld [vmem:[%s6853_s4 + $0x8] sm:$0xff]   ;;  %vm882_vm0 = vcmask 261120   ;;  %v4395_v4 = vld [vmem:[%s6853_s4 + $0x10] sm:$0xff]  }
  0x1d   : > { %p577_p10 = scmp.lt.s32.totalorder %s3911_s20, 63  ;;  %4136 = vmatprep.subr.bf16.mxu0 %v4393_v2  ;;  %s6893_s2 = sld [smem:[#allocation22_spill]]  ;;  %v4396_v8 = vld [vmem:[%s6853_s4 + $0x18] sm:$0xff]   ;;  %v4397_v9 = vld [vmem:[%s6853_s4 + $0x20] sm:$0xff]   ;;  %v4398_v14 = vld [vmem:[%s6853_s4 + $0x28] sm:$0xff]  }
  0x1e   : > { %4137 = vmatpush3.bf16.msra.mxu0 %v4393_v2  ;;  %s3907_s28 = sshll.u32 %s4878_s25, 2  ;;  %v4399_v15 = vld [vmem:[%s6853_s4 + $0x30] sm:$0xff]   ;;  %v4400_v17 = vld [vmem:[%s6853_s4 + $0x38] sm:$0xff]   ;;  %v4403_v28 = vld [vmem:[%s6857_s8] sm:$0xff]   ;;  %s4767_s29 = smov 64  }
  0x1f   : > { %s7066_s20 = smov (!%p577_p10, %s3911_s20), 63  ;;  %4138 = vmatprep.subr.bf16.mxu0 %v4394_v3  ;;  %p565_p11 = scmp.lt.s32.totalorder %s3907_s28, 7  ;;  %v4404_v29 = vld [vmem:[%s6857_s8 + $0x8] sm:$0xff]   ;;  %v4405_v30 = vld [vmem:[%s6857_s8 + $0x10] sm:$0xff]   ;;  %v4406_v31 = vld [vmem:[%s6857_s8 + $0x18] sm:$0xff]  }
  0x20   : > { %s6869_s18 = sshll.u32 %s7066_s20, 2  ;;  %v4407_v32 = vld [vmem:[%s6857_s8 + $0x20] sm:$0xff]   ;;  %v4408_v33 = vld [vmem:[%s6857_s8 + $0x28] sm:$0xff]   ;;  %v4409_v34 = vld [vmem:[%s6857_s8 + $0x30] sm:$0xff]  }
  0x21   : > { %s7068_s28 = smov (!%p565_p11, %s3907_s28), 7  ;;  %v4410_v35 = vld [vmem:[%s6857_s8 + $0x38] sm:$0xff]   ;;  %v5019_v36 = vld [vmem:[%s6856_s7] ss:$0 sm:$0xff] }
  0x22   : > { %v4375_v0 = vld [vmem:[%s6892_s6] sm:$0xff]   ;;  %v4376_v1 = vld [vmem:[%s6892_s6 + $0x8] sm:$0xff]   ;;  %4139 = vmatpush3.bf16.msra.mxu0 %v4394_v3  ;;  %s3908_s27 = sshll.u32 %s7068_s28, 2  ;;  %s6895_s6 = sshll.u32 %s7066_s20, 2 }
  0x23   : > { %4156 = vmatprep.subr.bf16.mxu1 %v4375_v0  ;;  %s4926_s30 = scalar_lea.vmem %s6893_s2, %s6869_s18  ;;  %4140 = vmatprep.subr.bf16.mxu0 %v4395_v4  ;;  %s6894_s18 = sld [smem:[#allocation21_spill]] }
  0x24   : > { %4157 = vmatpush3.bf16.msra.mxu1 %v4375_v0  ;;  %v4377_v5 = vld [vmem:[%s4926_s30] sm:$0xff]   ;;  %v4378_v6 = vld [vmem:[%s4926_s30 + $0x8] sm:$0xff]   ;;  %v4379_v7 = vld [vmem:[%s4926_s30 + $0x10] sm:$0xff]   ;;  %s3910_s19 = sshll.u32 %s7068_s28, 3  ;;  %s561_s28 = sand.u32 1, %s4757_s22  }
  0x25   : > { %4158 = vmatprep.subr.bf16.mxu1 %v4376_v1  ;;  %4160 = vmatprep.mubr.msk.bf16.mxu1 %vm882_vm0, %v4377_v5  ;;  %v4380_v10 = vld [vmem:[%s4926_s30 + $0x18] sm:$0xff]   ;;  %v4381_v11 = vld [vmem:[%s4926_s30 + $0x20] sm:$0xff]   ;;  %v4382_v12 = vld [vmem:[%s4926_s30 + $0x28] sm:$0xff]   ;;  %s3906_s26 = sshll.u32 %s561_s28, 5  ;;  %s6808_s17 = scalar_lea.sflag [#allocation3], %s561_s28 }
  0x26   : > { %4141 = vmatpush3.bf16.msra.mxu0 %v4395_v4  ;;  %v4383_v13 = vld [vmem:[%s4926_s30 + $0x30] sm:$0xff]   ;;  %v4384_v18 = vld [vmem:[%s4926_s30 + $0x38] sm:$0xff]   ;;  %v4385_v19 = vld [vmem:[%s4926_s30 + $0x40] sm:$0xff]  }
  0x27   : > { %4142 = vmatprep.subr.bf16.mxu0 %v4396_v8  ;;  %v4386_v21 = vld [vmem:[%s4926_s30 + $0x48] sm:$0xff]   ;;  %v4387_v22 = vld [vmem:[%s4926_s30 + $0x50] sm:$0xff]   ;;  %v4388_v23 = vld [vmem:[%s4926_s30 + $0x58] sm:$0xff]  }
  0x28   : > { %4159 = vmatpush3.bf16.msra.mxu1 %v4376_v1  ;;  %v4389_v24 = vld [vmem:[%s4926_s30 + $0x60] sm:$0xff]   ;;  %v4390_v25 = vld [vmem:[%s4926_s30 + $0x68] sm:$0xff]   ;;  %v4391_v26 = vld [vmem:[%s4926_s30 + $0x70] sm:$0xff]  }
  0x29   : > { %s568_s2 = scalar_lea.vmem %s6894_s18, %s3908_s27  ;;  %s4975_s27 = scalar_lea.vmem %s6852_s3, %s6895_s6  ;;  %v4392_v27 = vld [vmem:[%s4926_s30 + $0x78] sm:$0xff]   ;;  %4316 = vmatprep.subr.bf16.mxu1 %v4403_v28 }
  0x2a   : > { %4143 = vmatpush3.bf16.msra.mxu0 %v4396_v8  ;;  %v4401_v16 = vld [vmem:[%s568_s2] sm:$0xff]   ;;  %v4402_v20 = vld [vmem:[%s568_s2 + $0x8] sm:$0xff]   ;;  %s6662_s18 = scalar_lea.vmem %s6850_s1, %s3910_s19 }
  0x2b   : > { %4161 = vmatmul.mubr.msk.bf16.vlgmr.msra.gmra.mrb[0].mxu1 %vm882_vm0, %v4378_v6  ;;  %4144 = vmatprep.subr.bf16.mxu0 %v4397_v9 }
  0x2c   : > { %4164 = vmatprep.mubr.msk.bf16.mxu1 %vm882_vm0, %v4379_v7  ;;  %4152 = vmatprep.mubr.bf16.mxu0 %v4401_v16 }
  0x2d   : > { %4324 = vmatpush3.bf16.msra.mxu1 %v4403_v28 }
  0x2e   : > { %4145 = vmatpush3.bf16.msra.mxu0 %v4397_v9  ;;  %4317 = vmatprep.subr.bf16.mxu1 %v4404_v29 }
  0x2f   : > { %4146 = vmatprep.subr.bf16.mxu0 %v4398_v14 }
  0x31   : > { %4325 = vmatpush3.bf16.msra.mxu1 %v4404_v29 }
  0x32   : > { %4147 = vmatpush3.bf16.msra.mxu0 %v4398_v14  ;;  %4318 = vmatprep.subr.bf16.mxu1 %v4405_v30 }
  0x33   : > { %4165 = vmatmul.mubr.msk.bf16.gmra.mrb[4].mxu1 %vm882_vm0, %v4380_v10  ;;  %4148 = vmatprep.subr.bf16.mxu0 %v4399_v15 }
  0x34   : > { %4168 = vmatprep.mubr.msk.bf16.mxu1 %vm882_vm0, %v4381_v11 }
  0x35   : > { %4326 = vmatpush3.bf16.msra.mxu1 %v4405_v30 }
  0x36   : > { %4149 = vmatpush3.bf16.msra.mxu0 %v4399_v15  ;;  %4319 = vmatprep.subr.bf16.mxu1 %v4406_v31 }
  0x37   : > { %4150 = vmatprep.subr.bf16.mxu0 %v4400_v17 }
  0x39   : > { %4327 = vmatpush3.bf16.msra.mxu1 %v4406_v31 }
  0x3a   : > { %4151 = vmatpush3.bf16.msra.mxu0 %v4400_v17  ;;  %4320 = vmatprep.subr.bf16.mxu1 %v4407_v32 }
  0x3b   : > { %4169 = vmatmul.mubr.msk.bf16.gmra.mrb[8].mxu1 %vm882_vm0, %v4382_v12  ;;  %4192 = vmatprep.subr.bf16.mxu0 %v4403_v28 }
  0x3c   : > { %4172 = vmatprep.mubr.msk.bf16.mxu1 %vm882_vm0, %v4383_v13 }
  0x3d   : > { %4153 = vmatmul.mubr.bf16.vlgmr.msra.gmra.mrb[0].mxu0 %v4402_v20  ;;  %4328 = vmatpush3.bf16.msra.mxu1 %v4407_v32 }
  0x3e   : > { %4193 = vmatpush3.bf16.msra.mxu0 %v4403_v28  ;;  %4321 = vmatprep.subr.bf16.mxu1 %v4408_v33 }
  0x3f   : > { %4194 = vmatprep.subr.bf16.mxu0 %v4404_v29 }
  0x41   : > { %4329 = vmatpush3.bf16.msra.mxu1 %v4408_v33 }
  0x42   : > { %4195 = vmatpush3.bf16.msra.mxu0 %v4404_v29  ;;  %4322 = vmatprep.subr.bf16.mxu1 %v4409_v34 }
  0x43   : > { %4173 = vmatmul.mubr.msk.bf16.gmra.mrb[12].mxu1 %vm882_vm0, %v4384_v18  ;;  %4196 = vmatprep.subr.bf16.mxu0 %v4405_v30 }
  0x44   : > { %4176 = vmatprep.mubr.msk.bf16.mxu1 %vm882_vm0, %v4385_v19 }
  0x45   : > { %4330 = vmatpush3.bf16.msra.mxu1 %v4409_v34 }
  0x46   : > { %4197 = vmatpush3.bf16.msra.mxu0 %v4405_v30  ;;  %4323 = vmatprep.subr.bf16.mxu1 %v4410_v35 }
  0x47   : > { %4198 = vmatprep.subr.bf16.mxu0 %v4406_v31 }
  0x49   : > { %4331 = vmatpush3.bf16.msra.mxu1 %v4410_v35 }
  0x4a   : > { %4199 = vmatpush3.bf16.msra.mxu0 %v4406_v31 }
  0x4b   : > { %4177 = vmatmul.mubr.msk.bf16.gmra.mrb[16].mxu1 %vm882_vm0, %v4386_v21  ;;  %4200 = vmatprep.subr.bf16.mxu0 %v4407_v32 }
  0x4c   : > { %4180 = vmatprep.mubr.msk.bf16.mxu1 %vm882_vm0, %v4387_v22 }
  0x4e   : > { %4201 = vmatpush3.bf16.msra.mxu0 %v4407_v32 }
  0x4f   : > { %4202 = vmatprep.subr.bf16.mxu0 %v4408_v33 }
  0x52   : > { %4203 = vmatpush3.bf16.msra.mxu0 %v4408_v33 }
  0x53   : > { %4181 = vmatmul.mubr.msk.bf16.gmra.mrb[20].mxu1 %vm882_vm0, %v4388_v23  ;;  %4204 = vmatprep.subr.bf16.mxu0 %v4409_v34 }
  0x54   : > { %4184 = vmatprep.mubr.msk.bf16.mxu1 %vm882_vm0, %v4389_v24 }
  0x56   : > { %4205 = vmatpush3.bf16.msra.mxu0 %v4409_v34 }
  0x57   : > { %4206 = vmatprep.subr.bf16.mxu0 %v4410_v35 }
  0x5a   : > { %4207 = vmatpush3.bf16.msra.mxu0 %v4410_v35 }
  0x5b   : > { %4185 = vmatmul.mubr.msk.bf16.gmra.mrb[24].mxu1 %vm882_vm0, %v4390_v25 }
  0x5c   : > { %4188 = vmatprep.mubr.msk.bf16.mxu1 %vm882_vm0, %v4391_v26 }
  0x63   : > { %4189 = vmatmul.mubr.msk.bf16.gmra.mrb[28].mxu1 %vm882_vm0, %v4392_v27 }
  0xfe   : > { %v4162_v37 = vpop.f32.mrb[0].mxu1 }
  0xff   : > { %v5022_v38 = vadd.f32 %v4162_v37, %v5019_v36  ;;  %v965_v39 = vpop.f32.mrb[1].mxu1 }
 0x100   : > { %v5025_v40 = vadd.f32 %v5019_v36, %v965_v39  ;;  %v4163_v41 = vpop.f32.mrb[2].mxu1 }
 0x101   : > { %v1126_v42 = vand.u32 2147483647, %v5022_v38  ;;  %v5029_v43 = vadd.f32 %v4163_v41, %v5019_v36  ;;  %v968_v44 = vpop.f32.mrb[3].mxu1  ;;  %v1094_v27 = vmax.f32 %v5022_v38, 0.0 }
 0x102   : > { %v1124_v45 = vand.u32 2147483647, %v5025_v40  ;;  %v5033_v46 = vadd.f32 %v5019_v36, %v968_v44  ;;  %v1092_v29 = vmax.f32 %v5025_v40, 0.0 }
 0x103   : > { %v1158_v47 = vsub.f32 0.0, %v1126_v42  ;;  %v1127_v48 = vand.u32 2147483647, %v5029_v43  ;;  %v1095_v31 = vmax.f32 %v5029_v43, 0.0 }
 0x104   : > { %v1156_v49 = vsub.f32 0.0, %v1124_v45  ;;  %v1125_v50 = vand.u32 2147483647, %v5033_v46  ;;  %v1093_v34 = vmax.f32 %v5033_v46, 0.0 }
 0x105   : > { %v1192_v51 = vmul.f32 1.442695, %v1158_v47  ;;  %v1159_v52 = vsub.f32 0.0, %v1127_v48 }
 0x106   : > { %v1188_v53 = vmul.f32 1.442695, %v1156_v49  ;;  %v1157_v54 = vsub.f32 0.0, %v1125_v50  ;;  %v4166_v55 = vpop.f32.mrb[4].mxu1 }
 0x107   : > { %4445 = vpow2.f32 %v1192_v51  ;;  %v1194_v56 = vmul.f32 1.442695, %v1159_v52  ;;  %v5038_v57 = vadd.f32 %v4166_v55, %v5019_v36  ;;  %v981_v58 = vpop.f32.mrb[5].mxu1 }
 0x108   : > { %4447 = vpow2.f32 %v1188_v53  ;;  %v1190_v59 = vmul.f32 1.442695, %v1157_v54  ;;  %v5041_v60 = vadd.f32 %v5019_v36, %v981_v58  ;;  %v4167_v61 = vpop.f32.mrb[6].mxu1 }
 0x109   : > { %4449 = vpow2.f32 %v1194_v56  ;;  %v1130_v62 = vand.u32 2147483647, %v5038_v57  ;;  %v5045_v63 = vadd.f32 %v4167_v61, %v5019_v36  ;;  %v984_v0 = vpop.f32.mrb[7].mxu1  ;;  %v1098_v35 = vmax.f32 %v5038_v57, 0.0 }
 0x10a   : > { %4451 = vpow2.f32 %v1190_v59  ;;  %v1128_v1 = vand.u32 2147483647, %v5041_v60  ;;  %v5049_v2 = vadd.f32 %v5019_v36, %v984_v0  ;;  %v1096_v37 = vmax.f32 %v5041_v60, 0.0 }
 0x10b   : > { %v1162_v3 = vsub.f32 0.0, %v1130_v62  ;;  %v1131_v4 = vand.u32 2147483647, %v5045_v63  ;;  %v1099_v39 = vmax.f32 %v5045_v63, 0.0 }
 0x10c   : > { %v1160_v5 = vsub.f32 0.0, %v1128_v1  ;;  %v1129_v6 = vand.u32 2147483647, %v5049_v2  ;;  %v1097_v62 = vmax.f32 %v5049_v2, 0.0 }
 0x10d   : > { %v1200_v7 = vmul.f32 1.442695, %v1162_v3  ;;  %v1163_v8 = vsub.f32 0.0, %v1131_v4 }
 0x10e   : > { %v1196_v9 = vmul.f32 1.442695, %v1160_v5  ;;  %v1161_v10 = vsub.f32 0.0, %v1129_v6  ;;  %v4170_v11 = vpop.f32.mrb[8].mxu1 }
 0x10f   : > { %4453 = vpow2.f32 %v1200_v7  ;;  %v1202_v12 = vmul.f32 1.442695, %v1163_v8  ;;  %v5054_v13 = vadd.f32 %v4170_v11, %v5019_v36  ;;  %v997_v14 = vpop.f32.mrb[9].mxu1 }
 0x110   : > { %4455 = vpow2.f32 %v1196_v9  ;;  %v1198_v15 = vmul.f32 1.442695, %v1161_v10  ;;  %v4171_v16 = vpop.f32.mrb[10].mxu1  ;;  %v5083_v52 = vadd.f32 %v5019_v36, %v997_v14 }
 0x111   : > { %v4446_v17 = vpop.eup %4445  ;;  %4457 = vpow2.f32 %v1202_v12  ;;  %v1134_v18 = vand.u32 2147483647, %v5054_v13  ;;  %v5057_v19 = vpop.f32.mrb[11].mxu1  ;;  %v1102_v0 = vmax.f32 %v5054_v13, 0.0  ;;  %v5097_v1 = vadd.f32 %v4171_v16, %v5019_v36 }
 0x112   : > { %v4448_v20 = vpop.eup %4447  ;;  %v1270_v21 = vadd.f32 1.0, %v4446_v17  ;;  %4459 = vpow2.f32 %v1198_v15  ;;  %v1273_v28 = vmul.f32 -0.5, %v4446_v17  ;;  %v1276_v42 = vand.u32 2147483647, %v4446_v17 }
 0x113   : > { %v5059_v22 = vpop.eup %4449  ;;  %v1252_v23 = vadd.f32 1.0, %v4448_v20  ;;  %v1166_v26 = vsub.f32 0.0, %v1134_v18  ;;  %v1255_v30 = vmul.f32 -0.5, %v4448_v20  ;;  %v1258_v50 = vand.u32 2147483647, %v4448_v20 }
 0x114   : > { %v5061_v24 = vpop.eup %4451  ;;  %4461 = vlog2.f32 %v1270_v21  ;;  %v1279_v25 = vadd.f32 1.0, %v5059_v22  ;;  %v1282_v44 = vmul.f32 -0.5, %v5059_v22  ;;  %v1274_v49 = vadd.f32 1.0, %v1273_v28 }
 0x115   : > { %4463 = vlog2.f32 %v1252_v23  ;;  %v1261_v32 = vadd.f32 1.0, %v5061_v24  ;;  %v1208_v45 = vmul.f32 1.442695, %v1166_v26  ;;  %v1285_v51 = vand.u32 2147483647, %v5059_v22 }
 0x116   : > { %4465 = vlog2.f32 %v1279_v25  ;;  %v5068_v33 = vpop.f32.mrb[12].mxu1  ;;  %v1256_v55 = vadd.f32 1.0, %v1255_v30  ;;  %v1264_v56 = vmul.f32 -0.5, %v5061_v24  ;;  %v1283_v3 = vadd.f32 1.0, %v1282_v44 }
 0x117   : > { %v5074_v41 = vpop.f32.mrb[13].mxu1  ;;  %4467 = vlog2.f32 %v1261_v32  ;;  %v1267_v4 = vand.u32 2147483647, %v5061_v24  ;;  %v1275_v7 = vmul.f32 %v4446_v17, %v1274_v49  ;;  %vm5103_vm1 = vcmp.lt.f32.partialorder %v1276_v42, 0.0004427343 }
 0x118   : > { %v5077_v47 = vpop.f32.mrb[14].mxu1  ;;  %4469 = vpow2.f32 %v1208_v45  ;;  %vm5107_vm2 = vcmp.lt.f32.partialorder %v1258_v50, 0.0004427343  ;;  %vm5111_vm3 = vcmp.lt.f32.partialorder %v1285_v51, 0.0004427343  ;;  %v1257_v12 = vmul.f32 %v4448_v20, %v1256_v55 }
 0x119   : > { %v5079_v48 = vpop.eup %4453  ;;  %v5085_v53 = vpop.f32.mrb[15].mxu1  ;;  %v1265_v14 = vadd.f32 1.0, %v1264_v56  ;;  %v1100_v15 = vmax.f32 %v5083_v52, 0.0  ;;  %v1132_v16 = vand.u32 2147483647, %v5083_v52  ;;  %v1284_v30 = vmul.f32 %v5059_v22, %v1283_v3  ;;  %v5143_v3 = vld [vmem:[%s6859_s10] sm:$0xff]  }
 0x11a   : > { %v5087_v54 = vpop.eup %4455  ;;  %v1306_v58 = vadd.f32 1.0, %v5079_v48  ;;  %v1309_v23 = vmul.f32 -0.5, %v5079_v48  ;;  %v1312_v25 = vand.u32 2147483647, %v5079_v48  ;;  %vm5124_vm4 = vcmp.lt.f32.partialorder %v1267_v4, 0.0004427343  ;;  %4240 = vmatprep.subr.bf16.mxu1 %v5143_v3 }
 0x11b   : > { %v5091_v59 = vpop.eup %4457  ;;  %v1288_v61 = vadd.f32 1.0, %v5087_v54  ;;  %v1291_v45 = vmul.f32 -0.5, %v5087_v54  ;;  %v1266_v56 = vmul.f32 %v5061_v24, %v1265_v14  ;;  %6904 = vst [vmem:[#allocation9_spill] sm:$0xff] %v5143_v3  ;;  %v1294_v38 = vand.u32 2147483647, %v5087_v54 }
 0x11c   : > { %4471 = vlog2.f32 %v1306_v58  ;;  %v1315_v5 = vadd.f32 1.0, %v5091_v59  ;;  %v5101_v6 = vpop.eup %4459  ;;  %v1318_v49 = vmul.f32 -0.5, %v5091_v59  ;;  %v1164_v58 = vsub.f32 0.0, %v1132_v16 }
 0x11d   : > { %4473 = vlog2.f32 %v1288_v61  ;;  %v1297_v32 = vadd.f32 1.0, %v5101_v6  ;;  %vm5147_vm5 = vcmp.lt.f32.partialorder %v1312_v25, 0.0004427343  ;;  %v1292_v14 = vadd.f32 1.0, %v1291_v45 }
 0x11e   : > { %v4462_v11 = vpop.eup %4461  ;;  %v5117_v17 = vpop.f32.mrb[16].mxu1  ;;  %4475 = vlog2.f32 %v1315_v5  ;;  %v1310_v5 = vadd.f32 1.0, %v1309_v23  ;;  %v1319_v10 = vadd.f32 1.0, %v1318_v49  ;;  %v1321_v16 = vand.u32 2147483647, %v5091_v59 }
 0x11f   : > { %v4464_v18 = vpop.eup %4463  ;;  %v1272_v21 = vmul.f32 0.6931472, %v4462_v11  ;;  %v5121_v26 = vpop.f32.mrb[17].mxu1  ;;  %4477 = vlog2.f32 %v1297_v32  ;;  %v1204_v11 = vmul.f32 1.442695, %v1164_v58  ;;  %v5197_v40 = vadd.f32 %v5068_v33, %v5019_v36 }
 0x120   : > { %v4466_v28 = vpop.eup %4465  ;;  %v5133_v50 = vpop.f32.mrb[18].mxu1  ;;  %v1254_v55 = vmul.f32 0.6931472, %v4464_v18  ;;  %v1300_v18 = vmul.f32 -0.5, %v5101_v6  ;;  %vm5168_vm6 = vcmp.lt.f32.partialorder %v1294_v38, 0.0004427343  ;;  %v1320_v20 = vmul.f32 %v5091_v59, %v1319_v10 }
 0x121   : > { %v1278_v42 = vsel %vm5103_vm1, %v1275_v7, %v1272_v21  ;;  %v1281_v44 = vmul.f32 0.6931472, %v4466_v28  ;;  %v4468_v51 = vpop.eup %4467  ;;  %v5138_v61 = vpop.f32.mrb[19].mxu1  ;;  %4479 = vpow2.f32 %v1204_v11  ;;  %v1303_v49 = vand.u32 2147483647, %v5101_v6 }
 0x122   : > { %v1542_v22 = vadd.f32 %v1278_v42, %v1094_v27  ;;  %v5152_v27 = vpop.eup %4469  ;;  %v1263_v8 = vmul.f32 0.6931472, %v4468_v51  ;;  %v1260_v25 = vsel %vm5107_vm2, %v1257_v12, %v1254_v55  ;;  %v1135_v42 = vand.u32 2147483647, %v5097_v1 }
 0x123   : > { %v1287_v4 = vsel %vm5111_vm3, %v1284_v30, %v1281_v44  ;;  %v1342_v32 = vadd.f32 1.0, %v5152_v27  ;;  %v1540_v51 = vadd.f32 %v1260_v25, %v1092_v29  ;;  %vm5184_vm7 = vcmp.lt.f32.partialorder %v1321_v16, 0.0004427343 }
 0x124   : > { %v1543_v24 = vadd.f32 %v1287_v4, %v1095_v31  ;;  %v5159_v23 = vadd.f32 -0.6931472, %v1542_v22  ;;  %v1311_v31 = vmul.f32 %v5079_v48, %v1310_v5  ;;  %v1269_v12 = vsel %vm5124_vm4, %v1266_v56, %v1263_v8 }
 0x125   : > { %v1293_v22 = vmul.f32 %v5087_v54, %v1292_v14  ;;  %v1167_v58 = vsub.f32 0.0, %v1135_v42  ;;  %v1301_v56 = vadd.f32 1.0, %v1300_v18  ;;  %v5193_v38 = vadd.f32 %v5019_v36, %v5057_v19 }
 0x126   : > { %v4472_v21 = vpop.eup %4471  ;;  %v5163_v28 = vadd.f32 -0.6931472, %v1543_v24  ;;  %v5165_v43 = vpop.f32.mrb[20].mxu1  ;;  %v1541_v54 = vadd.f32 %v1269_v12, %v1093_v34  ;;  %4481 = vlog2.f32 %v1342_v32  ;;  %v1345_v24 = vmul.f32 -0.5, %v5152_v27 }
 0x127   : > { %v5174_v44 = vpop.f32.mrb[21].mxu1  ;;  %v1308_v45 = vmul.f32 0.6931472, %v4472_v21  ;;  %v4474_v48 = vpop.eup %4473  ;;  %v1210_v8 = vmul.f32 1.442695, %v1167_v58  ;;  %v1302_v16 = vmul.f32 %v5101_v6, %v1301_v56  ;;  %v5225_v12 = vadd.f32 %v5019_v36, %v5074_v41 }
 0x128   : > { %v5188_v4 = vpop.f32.mrb[22].mxu1  ;;  %v4476_v5 = vpop.eup %4475  ;;  %v1290_v11 = vmul.f32 0.6931472, %v4474_v48  ;;  %vm5206_vm8 = vcmp.lt.f32.partialorder %v1303_v49, 0.0004427343  ;;  %v1346_v42 = vadd.f32 1.0, %v1345_v24  ;;  %v5235_v58 = vadd.f32 %v5077_v47, %v5019_v36 }
 0x129   : > { %v5199_v29 = vpop.f32.mrb[23].mxu1  ;;  %v1314_v59 = vsel %vm5147_vm5, %v1311_v31, %v1308_v45  ;;  %v1133_v33 = vand.u32 2147483647, %v5193_v38  ;;  %v5211_v14 = vadd.f32 -0.6931472, %v1540_v51  ;;  %4483 = vpow2.f32 %v1210_v8  ;;  %v4478_v34 = vpop.eup %4477 }
 0x12a   : > { %v1317_v10 = vmul.f32 0.6931472, %v4476_v5  ;;  %v1348_v18 = vand.u32 2147483647, %v5152_v27  ;;  %v1138_v21 = vand.u32 2147483647, %v5197_v40  ;;  %v1546_v32 = vadd.f32 %v1314_v59, %v1098_v35 }
 0x12b   : > { %v1165_v7 = vsub.f32 0.0, %v1133_v33  ;;  %v5219_v31 = vadd.f32 -0.6931472, %v1541_v54  ;;  %v5229_v6 = vpop.eup %4479  ;;  %v1296_v49 = vsel %vm5168_vm6, %v1293_v22, %v1290_v11  ;;  %v1299_v41 = vmul.f32 0.6931472, %v4478_v34 }
 0x12c   : > { %v1170_v51 = vsub.f32 0.0, %v1138_v21  ;;  %v1323_v35 = vsel %vm5184_vm7, %v1320_v20, %v1317_v10  ;;  %v1324_v5 = vadd.f32 1.0, %v5229_v6  ;;  %v5244_v56 = vadd.f32 %v5019_v36, %v5085_v53 }
 0x12d   : > { %v1206_v48 = vmul.f32 1.442695, %v1165_v7  ;;  %v1136_v54 = vand.u32 2147483647, %v5225_v12  ;;  %v5251_v47 = vadd.f32 %v5117_v17, %v5019_v36  ;;  %v1544_v55 = vadd.f32 %v1296_v49, %v1096_v37 }
 0x12e   : > { %v5217_v25 = vpop.f32.mrb[24].mxu1  ;;  %v1216_v22 = vmul.f32 1.442695, %v1170_v51  ;;  %vm5255_vm9 = vcmp.lt.f32.partialorder %v1348_v18, 0.0004427343  ;;  %v5261_v53 = vadd.f32 %v5019_v36, %v5121_v26  ;;  %v1347_v24 = vmul.f32 %v5152_v27, %v1346_v42 }
 0x12f   : > { %v5227_v45 = vpop.f32.mrb[25].mxu1  ;;  %4485 = vpow2.f32 %v1206_v48  ;;  %v1168_v8 = vsub.f32 0.0, %v1136_v54  ;;  %v1139_v59 = vand.u32 2147483647, %v5235_v58  ;;  %v5265_v11 = vadd.f32 -0.6931472, %v1546_v32 }
 0x130   : > { %v5237_v57 = vpop.f32.mrb[26].mxu1  ;;  %4487 = vlog2.f32 %v1324_v5  ;;  %v4482_v17 = vpop.eup %4481  ;;  %v1547_v60 = vadd.f32 %v1323_v35, %v1099_v39  ;;  %v1305_v37 = vsel %vm5206_vm8, %v1302_v16, %v1299_v41  ;;  %v1137_v33 = vand.u32 2147483647, %v5244_v56 }
 0x131   : > { %v5246_v30 = vpop.f32.mrb[27].mxu1  ;;  %4489 = vpow2.f32 %v1216_v22  ;;  %v1212_v10 = vmul.f32 1.442695, %v1168_v8  ;;  %v1171_v34 = vsub.f32 0.0, %v1139_v59  ;;  %v1142_v27 = vand.u32 2147483647, %v5251_v47 }
 0x132   : > { %v5276_v7 = vadd.f32 -0.6931472, %v1544_v55  ;;  %v1327_v21 = vmul.f32 -0.5, %v5229_v6  ;;  %v1169_v32 = vsub.f32 0.0, %v1137_v33  ;;  %v1140_v63 = vand.u32 2147483647, %v5261_v53 }
 0x133   : > { %v5274_v18 = vpop.eup %4483  ;;  %v1545_v39 = vadd.f32 %v1305_v37, %v1097_v62  ;;  %v1344_v19 = vmul.f32 0.6931472, %v4482_v17  ;;  %4491 = vpow2.f32 %v1212_v10  ;;  %v1218_v49 = vmul.f32 1.442695, %v1171_v34 }
 0x134   : > { %v1351_v16 = vadd.f32 1.0, %v5274_v18  ;;  %v1214_v48 = vmul.f32 1.442695, %v1169_v32  ;;  %v1174_v51 = vsub.f32 0.0, %v1142_v27  ;;  %v1172_v35 = vsub.f32 0.0, %v1140_v63 }
 0x135   : > { %v1330_v41 = vand.u32 2147483647, %v5229_v6  ;;  %v5289_v22 = vadd.f32 %v5133_v50, %v5019_v36  ;;  %v1328_v62 = vadd.f32 1.0, %v1327_v21  ;;  %v5297_v17 = vadd.f32 -0.6931472, %v1547_v60 }
 0x136   : > { %v5283_v42 = vpop.f32.mrb[28].mxu1  ;;  %4493 = vlog2.f32 %v1351_v16  ;;  %v1224_v54 = vmul.f32 1.442695, %v1174_v51  ;;  %v1220_v55 = vmul.f32 1.442695, %v1172_v35  ;;  %v1350_v37 = vsel %vm5255_vm9, %v1347_v24, %v1344_v19 }
 0x137   : > { %v5291_v2 = vpop.f32.mrb[29].mxu1  ;;  %4495 = vpow2.f32 %v1218_v49  ;;  %v1143_v33 = vand.u32 2147483647, %v5289_v22  ;;  %v5304_v34 = vadd.f32 -0.6931472, %v1545_v39  ;;  %v1354_v27 = vmul.f32 -0.5, %v5274_v18 }
 0x138   : > { %v5293_v8 = vpop.f32.mrb[30].mxu1  ;;  %4497 = vpow2.f32 %v1214_v48  ;;  %vm5310_vm10 = vcmp.lt.f32.partialorder %v1330_v41, 0.0004427343  ;;  %v1550_v24 = vadd.f32 %v1350_v37, %v1102_v0  ;;  %v1329_v39 = vmul.f32 %v5229_v6, %v1328_v62  ;;  %v5363_v48 = vpop.f32.mrb[0].mxu0 }
 0x139   : > { %v5295_v59 = vpop.eup %4485  ;;  %v5302_v50 = vpop.f32.mrb[31].mxu1  ;;  %4499 = vpow2.f32 %v1224_v54  ;;  %v1175_v20 = vsub.f32 0.0, %v1143_v33  ;;  %v1357_v16 = vand.u32 2147483647, %v5274_v18  ;;  %v1355_v41 = vadd.f32 1.0, %v1354_v27  ;;  %6922 = vst [vmem:[#allocation11_spill] sm:$0xff] %v5363_v48 }
 0x13a   : > { %v4488_v10 = vpop.eup %4487  ;;  %v1333_v21 = vadd.f32 1.0, %v5295_v59  ;;  %4501 = vpow2.f32 %v1220_v55  ;;  %v5325_v13 = vadd.f32 %v5019_v36, %v5138_v61  ;;  %v1336_v6 = vmul.f32 -0.5, %v5295_v59 }
 0x13b   : > { %v5308_v32 = vpop.eup %4489  ;;  %v1326_v60 = vmul.f32 0.6931472, %v4488_v10  ;;  %v1226_v51 = vmul.f32 1.442695, %v1175_v20  ;;  %v5330_v55 = vadd.f32 -0.6931472, %v1550_v24 }
 0x13c   : > { %4503 = vlog2.f32 %v1333_v21  ;;  %v1378_v19 = vadd.f32 1.0, %v5308_v32  ;;  %v1381_v37 = vmul.f32 -0.5, %v5308_v32  ;;  %vm5336_vm11 = vcmp.lt.f32.partialorder %v1357_v16, 0.0004427343 }
 0x13d   : > { %v1332_v35 = vsel %vm5310_vm10, %v1329_v39, %v1326_v60  ;;  %v4492_v0 = vpop.eup %4491  ;;  %6917 = vst [vmem:[#allocation10_spill] sm:$0xff] %v5330_v55  ;;  %v1339_v60 = vand.u32 2147483647, %v5295_v59  ;;  %v1356_v39 = vmul.f32 %v5274_v18, %v1355_v41  ;;  %v1337_v52 = vadd.f32 1.0, %v1336_v6 }
 0x13e   : > { %4505 = vlog2.f32 %v1378_v19  ;;  %v1360_v33 = vadd.f32 1.0, %v4492_v0  ;;  %v1548_v61 = vadd.f32 %v1332_v35, %v1100_v15  ;;  %v1384_v19 = vand.u32 2147483647, %v5308_v32 }
 0x13f   : > { %4507 = vpow2.f32 %v1226_v51  ;;  %v1141_v51 = vand.u32 2147483647, %v5325_v13  ;;  %v1363_v15 = vmul.f32 -0.5, %v4492_v0  ;;  %v1382_v54 = vadd.f32 1.0, %v1381_v37 }
 0x140   : > { %v4494_v27 = vpop.eup %4493  ;;  %4509 = vlog2.f32 %v1360_v33  ;;  %v5353_v18 = vadd.f32 %v5165_v43, %v5019_v36  ;;  %vm5359_vm12 = vcmp.lt.f32.partialorder %v1339_v60, 0.0004427343  ;;  %vm5367_vm13 = vcmp.lt.f32.partialorder %v1384_v19, 0.0004427343 }
 0x141   : > { %v4496_v20 = vpop.eup %4495  ;;  %v1353_v24 = vmul.f32 0.6931472, %v4494_v27  ;;  %v5357_v27 = vadd.f32 -0.6931472, %v1548_v61  ;;  %v1173_v61 = vsub.f32 0.0, %v1141_v51  ;;  %v1338_v49 = vmul.f32 %v5295_v59, %v1337_v52 }
 0x142   : > { %v5345_v10 = vpop.eup %4497  ;;  %v1387_v16 = vadd.f32 1.0, %v4496_v20  ;;  %v1390_v33 = vmul.f32 -0.5, %v4496_v20  ;;  %v1364_v5 = vadd.f32 1.0, %v1363_v15  ;;  %v1383_v46 = vmul.f32 %v5308_v32, %v1382_v54 }
 0x143   : > { %v5347_v35 = vpop.eup %4499  ;;  %v1369_v62 = vadd.f32 1.0, %v5345_v10  ;;  %v1359_v63 = vsel %vm5336_vm11, %v1356_v39, %v1353_v24  ;;  %v1393_v3 = vand.u32 2147483647, %v4496_v20  ;;  %v1372_v21 = vmul.f32 -0.5, %v5345_v10 }
 0x144   : > { %v5355_v41 = vpop.eup %4501  ;;  %4511 = vlog2.f32 %v1387_v16  ;;  %v1414_v43 = vadd.f32 1.0, %v5347_v35  ;;  %v1366_v16 = vand.u32 2147483647, %v4492_v0  ;;  %v1391_v48 = vadd.f32 1.0, %v1390_v33 }
 0x145   : > { %4513 = vlog2.f32 %v1369_v62  ;;  %v6925_v62 = vmax.f32 %v5097_v1, 0.0  ;;  %v1375_v51 = vand.u32 2147483647, %v5345_v10  ;;  %v1396_v59 = vadd.f32 1.0, %v5355_v41 }
 0x146   : > { %v4504_v37 = vpop.eup %4503  ;;  %4515 = vlog2.f32 %v1414_v43  ;;  %v1417_v52 = vmul.f32 -0.5, %v5347_v35  ;;  %v1222_v15 = vmul.f32 1.442695, %v1173_v61  ;;  %v1146_v32 = vand.u32 2147483647, %v5353_v18  ;;  %v5395_v43 = vpop.f32.mrb[1].mxu0 }
 0x147   : > { %v1335_v60 = vmul.f32 0.6931472, %v4504_v37  ;;  %v1551_v19 = vadd.f32 %v1359_v63, %v6925_v62  ;;  %v1365_v24 = vmul.f32 %v4492_v0, %v1364_v5  ;;  %vm5386_vm14 = vcmp.lt.f32.partialorder %v1366_v16, 0.0004427343  ;;  %v5446_v55 = vpop.f32.mrb[2].mxu0 }
 0x148   : > { %v4506_v26 = vpop.eup %4505  ;;  %vm5390_vm15 = vcmp.lt.f32.partialorder %v1393_v3, 0.0004427343  ;;  %v1373_v63 = vadd.f32 1.0, %v1372_v21  ;;  %4517 = vlog2.f32 %v1396_v59  ;;  %vm5399_vm1 = vcmp.lt.f32.partialorder %v1375_v51, 0.0004427343 }
 0x149   : > { %v5376_v39 = vpop.eup %4507  ;;  %v1341_v54 = vsel %vm5359_vm12, %v1338_v49, %v1335_v60  ;;  %v1380_v37 = vmul.f32 0.6931472, %v4506_v26  ;;  %v5397_v62 = vadd.f32 -0.6931472, %v1551_v19  ;;  %v1392_v49 = vmul.f32 %v4496_v20, %v1391_v48 }
 0x14a   : > { %v1423_v33 = vadd.f32 1.0, %v5376_v39  ;;  %v4510_v61 = vpop.eup %4509  ;;  %v1420_v5 = vand.u32 2147483647, %v5347_v35  ;;  %v6932_v3 = vmax.f32 %v5193_v38, 0.0  ;;  %v1418_v6 = vadd.f32 1.0, %v1417_v52 }
 0x14b   : > { %4519 = vpow2.f32 %v1222_v15  ;;  %v1178_v60 = vsub.f32 0.0, %v1146_v32  ;;  %v1386_v21 = vsel %vm5367_vm13, %v1383_v46, %v1380_v37  ;;  %v1399_v19 = vmul.f32 -0.5, %v5355_v41 }
 0x14c   : > { %v1549_v0 = vadd.f32 %v1341_v54, %v6932_v3  ;;  %v1402_v48 = vand.u32 2147483647, %v5355_v41  ;;  %v5412_v20 = vadd.f32 %v5019_v36, %v5174_v44  ;;  %v1362_v59 = vmul.f32 0.6931472, %v4510_v61 }
 0x14d   : > { %4521 = vlog2.f32 %v1423_v33  ;;  %v1232_v38 = vmul.f32 1.442695, %v1178_v60  ;;  %v5416_v52 = vadd.f32 %v5188_v4, %v5019_v36  ;;  %v1374_v9 = vmul.f32 %v5345_v10, %v1373_v63 }
 0x14e   : > { %v4512_v16 = vpop.eup %4511  ;;  %v1426_v46 = vmul.f32 -0.5, %v5376_v39  ;;  %v1144_v32 = vand.u32 2147483647, %v5412_v20  ;;  %v6933_v54 = vmax.f32 %v5197_v40, 0.0  ;;  %v1419_v3 = vmul.f32 %v5347_v35, %v1418_v6 }
 0x14f   : > { %v4514_v51 = vpop.eup %4513  ;;  %v1389_v15 = vmul.f32 0.6931472, %v4512_v16  ;;  %vm5424_vm2 = vcmp.lt.f32.partialorder %v1420_v5, 0.0004427343  ;;  %4523 = vpow2.f32 %v1232_v38  ;;  %v5428_v4 = vadd.f32 -0.6931472, %v1549_v0 }
 0x150   : > { %v1554_v37 = vadd.f32 %v1386_v21, %v6933_v54  ;;  %v1371_v44 = vmul.f32 0.6931472, %v4514_v51  ;;  %v1400_v61 = vadd.f32 1.0, %v1399_v19  ;;  %v1429_v10 = vand.u32 2147483647, %v5376_v39  ;;  %v4516_v60 = vpop.eup %4515 }
 0x151   : > { %v1176_v63 = vsub.f32 0.0, %v1144_v32  ;;  %v1368_v16 = vsel %vm5386_vm14, %v1365_v24, %v1362_v59  ;;  %v1147_v40 = vand.u32 2147483647, %v5416_v52  ;;  %v5436_v35 = vadd.f32 %v5019_v36, %v5199_v29 }
 0x152   : > { %v1604_v5 = vpack.c.bf16 %v5219_v31, %v5211_v14  ;;  %v1395_v0 = vsel %vm5390_vm15, %v1392_v49, %v1389_v15  ;;  %vm5442_vm3 = vcmp.lt.f32.partialorder %v1402_v48, 0.0004427343  ;;  %v1427_v21 = vadd.f32 1.0, %v1426_v46  ;;  %v4518_v24 = vpop.eup %4517 }
 0x153   : > { %v1228_v19 = vmul.f32 1.442695, %v1176_v63  ;;  %v5448_v51 = vadd.f32 -0.6931472, %v1554_v37  ;;  %v1377_v29 = vsel %vm5399_vm1, %v1374_v9, %v1371_v44  ;;  %v1179_v59 = vsub.f32 0.0, %v1147_v40 }
 0x154   : > { %4208 = vmatprep.mubr.bf16.mxu0 %v1604_v5  ;;  %v5454_v14 = vadd.f32 %v5217_v25, %v5019_v36  ;;  %v6938_v31 = vmax.f32 %v5225_v12, 0.0  ;;  %v1416_v49 = vmul.f32 0.6931472, %v4516_v60  ;;  %v1145_v48 = vand.u32 2147483647, %v5436_v35 }
 0x155   : > { %4525 = vpow2.f32 %v1228_v19  ;;  %v6939_v38 = vpack.c.bf16 %v5163_v28, %v5159_v23  ;;  %v5462_v15 = vpop.eup %4519  ;;  %v6940_v26 = vmax.f32 %v5235_v58, 0.0  ;;  %v1401_v46 = vmul.f32 %v5355_v41, %v1400_v61 }
 0x156   : > { %v1552_v1 = vadd.f32 %v1368_v16, %v6938_v31  ;;  %vm5467_vm4 = vcmp.lt.f32.partialorder %v1429_v10, 0.0004427343  ;;  %v1234_v12 = vmul.f32 1.442695, %v1179_v59  ;;  %v6943_v32 = vmax.f32 %v5244_v56, 0.0 }
 0x157   : > { %4209 = vmatmul.mubr.bf16.vlgmr.msra.gmra.mrb[4].mxu0 %v6939_v38  ;;  %v1555_v9 = vadd.f32 %v1395_v0, %v6940_v26  ;;  %v1398_v37 = vmul.f32 0.6931472, %v4518_v24  ;;  %v1428_v44 = vmul.f32 %v5376_v39, %v1427_v21  ;;  %v1405_v23 = vadd.f32 1.0, %v5462_v15  ;;  %v4522_v28 = vpop.eup %4521  ;;  %v5490_v0 = vpop.f32.mrb[3].mxu0 }
 0x158   : > { %v1553_v54 = vadd.f32 %v1377_v29, %v6943_v32  ;;  %v1112_v63 = vmax.f32 %v5412_v20, 0.0  ;;  %4527 = vpow2.f32 %v1234_v12  ;;  %v1177_v58 = vsub.f32 0.0, %v1145_v48 }
 0x159   : > { %v1150_v41 = vand.u32 2147483647, %v5454_v14  ;;  %v5477_v61 = vadd.f32 -0.6931472, %v1552_v1  ;;  %v1422_v10 = vsel %vm5424_vm2, %v1419_v3, %v1416_v49  ;;  %4529 = vlog2.f32 %v1405_v23  ;;  %v5482_v60 = vpop.eup %4523 }
 0x15a   : > { %v1115_v56 = vmax.f32 %v5416_v52, 0.0  ;;  %v5484_v39 = vadd.f32 -0.6931472, %v1555_v9  ;;  %v1230_v16 = vmul.f32 1.442695, %v1177_v58  ;;  %v5488_v5 = vadd.f32 %v5019_v36, %v5227_v45 }
 0x15b   : > { %v1182_v40 = vsub.f32 0.0, %v1150_v41  ;;  %v5492_v21 = vadd.f32 -0.6931472, %v1553_v54  ;;  %v1404_v3 = vsel %vm5442_vm3, %v1401_v46, %v1398_v37  ;;  %v1425_v33 = vmul.f32 0.6931472, %v4522_v28 }
 0x15c   : > { %v1450_v19 = vadd.f32 1.0, %v5482_v60  ;;  %v6944_v24 = vmax.f32 %v5251_v47, 0.0  ;;  %v1408_v59 = vmul.f32 -0.5, %v5462_v15  ;;  %4531 = vpow2.f32 %v1230_v16 }
 0x15d   : > { %v1240_v31 = vmul.f32 1.442695, %v1182_v40  ;;  %v1113_v45 = vmax.f32 %v5436_v35, 0.0  ;;  %v1148_v1 = vand.u32 2147483647, %v5488_v5  ;;  %v5504_v49 = vadd.f32 %v5237_v57, %v5019_v36 }
 0x15e   : > { %v1558_v29 = vadd.f32 %v1422_v10, %v6944_v24  ;;  %4533 = vlog2.f32 %v1450_v19  ;;  %v6945_v6 = vmax.f32 %v5261_v53, 0.0  ;;  %v5510_v47 = vadd.f32 %v5019_v36, %v5246_v30 }
 0x15f   : > { %4535 = vpow2.f32 %v1240_v31  ;;  %v1606_v38 = vpack.c.bf16 %v5304_v34, %v5276_v7  ;;  %v5514_v26 = vpop.eup %4525  ;;  %v1431_v9 = vsel %vm5467_vm4, %v1428_v44, %v1425_v33  ;;  %v1411_v46 = vand.u32 2147483647, %v5462_v15 }
 0x160   : > { %v1556_v48 = vadd.f32 %v1404_v3, %v6945_v6  ;;  %v1180_v57 = vsub.f32 0.0, %v1148_v1  ;;  %v1151_v12 = vand.u32 2147483647, %v5504_v49  ;;  %v5520_v53 = vadd.f32 -0.6931472, %v1558_v29 }
 0x161   : > { %v1409_v32 = vadd.f32 1.0, %v1408_v59  ;;  %v1453_v54 = vmul.f32 -0.5, %v5482_v60  ;;  %v1432_v30 = vadd.f32 1.0, %v5514_v26  ;;  %4212 = vmatprep.mubr.bf16.mxu0 %v1606_v38  ;;  %v1149_v34 = vand.u32 2147483647, %v5510_v47 }
 0x162   : > { %v1236_v37 = vmul.f32 1.442695, %v1180_v57  ;;  %v1183_v7 = vsub.f32 0.0, %v1151_v12  ;;  %v1607_v25 = vpack.c.bf16 %v5297_v17, %v5265_v11  ;;  %v4528_v44 = vpop.eup %4527  ;;  %v5527_v23 = vadd.f32 -0.6931472, %v1556_v48 }
 0x163   : > { %v6946_v28 = vmax.f32 %v5289_v22, 0.0  ;;  %4537 = vlog2.f32 %v1432_v30  ;;  %v5533_v41 = vadd.f32 %v5283_v42, %v5019_v36  ;;  %v4530_v10 = vpop.eup %4529  ;;  %vm5535_vm5 = vcmp.lt.f32.partialorder %v1411_v46, 0.0004427343 }
 0x164   : > { %v1456_v40 = vand.u32 2147483647, %v5482_v60  ;;  %v1459_v3 = vadd.f32 1.0, %v4528_v44  ;;  %4539 = vpow2.f32 %v1236_v37  ;;  %4213 = vmatmul.mubr.bf16.gmra.mrb[8].mxu0 %v1607_v25  ;;  %v1407_v11 = vmul.f32 0.6931472, %v4530_v10 }
 0x165   : > { %v1559_v58 = vadd.f32 %v1431_v9, %v6946_v28  ;;  %v1118_v17 = vmax.f32 %v5454_v14, 0.0  ;;  %v1242_v22 = vmul.f32 1.442695, %v1183_v7  ;;  %v1181_v33 = vsub.f32 0.0, %v1149_v34 }
 0x166   : > { %v1410_v19 = vmul.f32 %v5462_v15, %v1409_v32  ;;  %v1454_v24 = vadd.f32 1.0, %v1453_v54  ;;  %v1435_v42 = vmul.f32 -0.5, %v5514_v26  ;;  %4541 = vlog2.f32 %v1459_v3  ;;  %v4532_v29 = vpop.eup %4531 }
 0x167   : > { %v1462_v59 = vmul.f32 -0.5, %v4528_v44  ;;  %4543 = vpow2.f32 %v1242_v22  ;;  %v1238_v31 = vmul.f32 1.442695, %v1181_v33  ;;  %v1154_v1 = vand.u32 2147483647, %v5533_v41 }
 0x168   : > { %v4534_v6 = vpop.eup %4533  ;;  %v5544_v48 = vadd.f32 -0.6931472, %v1559_v58  ;;  %v1413_v38 = vsel %vm5535_vm5, %v1410_v19, %v1407_v11  ;;  %vm5548_vm6 = vcmp.lt.f32.partialorder %v1456_v40, 0.0004427343  ;;  %v1441_v15 = vadd.f32 1.0, %v4532_v29 }
 0x169   : > { %v4536_v46 = vpop.eup %4535  ;;  %v1438_v57 = vand.u32 2147483647, %v5514_v26  ;;  %v1465_v12 = vand.u32 2147483647, %v4528_v44  ;;  %4545 = vpow2.f32 %v1238_v31  ;;  %v1186_v32 = vsub.f32 0.0, %v1154_v1 }
 0x16a   : > { %v1452_v54 = vmul.f32 0.6931472, %v4534_v6  ;;  %4547 = vlog2.f32 %v1441_v15  ;;  %v1444_v30 = vmul.f32 -0.5, %v4532_v29  ;;  %v1486_v37 = vadd.f32 1.0, %v4536_v46 }
 0x16b   : > { %v6951_v7 = vmax.f32 %v5325_v13, 0.0  ;;  %v1455_v25 = vmul.f32 %v5482_v60, %v1454_v24  ;;  %v1436_v28 = vadd.f32 1.0, %v1435_v42  ;;  %v1463_v58 = vadd.f32 1.0, %v1462_v59 }
 0x16c   : > { %v1447_v10 = vand.u32 2147483647, %v4532_v29  ;;  %4549 = vlog2.f32 %v1486_v37  ;;  %v1489_v16 = vmul.f32 -0.5, %v4536_v46  ;;  %v1248_v40 = vmul.f32 1.442695, %v1186_v32 }
 0x16d   : > { %v1557_v34 = vadd.f32 %v1413_v38, %v6951_v7  ;;  %v4538_v3 = vpop.eup %4537  ;;  %vm5556_vm7 = vcmp.lt.f32.partialorder %v1438_v57, 0.0004427343  ;;  %vm5560_vm8 = vcmp.lt.f32.partialorder %v1465_v12, 0.0004427343  ;;  %v1119_v13 = vmax.f32 %v5504_v49, 0.0 }
 0x16e   : > { %v5567_v60 = vadd.f32 %v5019_v36, %v5291_v2  ;;  %v4540_v33 = vpop.eup %4539  ;;  %v1458_v19 = vsel %vm5548_vm6, %v1455_v25, %v1452_v54  ;;  %v1434_v24 = vmul.f32 0.6931472, %v4538_v3  ;;  %v1445_v42 = vadd.f32 1.0, %v1444_v30 }
 0x16f   : > { %4551 = vpow2.f32 %v1248_v40  ;;  %v5571_v59 = vadd.f32 -0.6931472, %v1557_v34  ;;  %v1437_v31 = vmul.f32 %v5514_v26, %v1436_v28  ;;  %v1492_v1 = vand.u32 2147483647, %v4536_v46 }
 0x170   : > { %v1468_v6 = vadd.f32 1.0, %v4540_v33  ;;  %v4542_v38 = vpop.eup %4541  ;;  %v1464_v15 = vmul.f32 %v4528_v44, %v1463_v58  ;;  %vm5574_vm9 = vcmp.lt.f32.partialorder %v1447_v10, 0.0004427343  ;;  %v1490_v36 = vadd.f32 1.0, %v1489_v16  ;;  %v4701_v44 = vld [vmem:[%s6856_s7] ss:$0 sm:$0xff] }
 0x171   : > { %v1152_v2 = vand.u32 2147483647, %v5567_v60  ;;  %v4544_v9 = vpop.eup %4543  ;;  %v6958_v12 = vmax.f32 %v5353_v18, 0.0  ;;  %v1461_v54 = vmul.f32 0.6931472, %v4542_v38  ;;  %v1471_v30 = vmul.f32 -0.5, %v4540_v33 }
 0x172   : > { %4553 = vlog2.f32 %v1468_v6  ;;  %v1440_v26 = vsel %vm5556_vm7, %v1437_v31, %v1434_v24  ;;  %v1446_v37 = vmul.f32 %v4532_v29, %v1445_v42  ;;  %v1495_v7 = vadd.f32 1.0, %v4544_v9 }
 0x173   : > { %v1562_v32 = vadd.f32 %v1458_v19, %v6958_v12  ;;  %v5587_v34 = vadd.f32 %v4701_v44, %v5293_v8  ;;  %v5589_v25 = vpop.eup %4545  ;;  %v1467_v18 = vsel %vm5560_vm8, %v1464_v15, %v1461_v54  ;;  %vm5593_vm10 = vcmp.lt.f32.partialorder %v1492_v1, 0.0004427343 }
 0x174   : > { %v1498_v58 = vmul.f32 -0.5, %v4544_v9  ;;  %v1184_v10 = vsub.f32 0.0, %v1152_v2  ;;  %v4548_v29 = vpop.eup %4547  ;;  %v1491_v16 = vmul.f32 %v4536_v46, %v1490_v36  ;;  %v1474_v40 = vand.u32 2147483647, %v4540_v33 }
 0x175   : > { %4555 = vlog2.f32 %v1495_v7  ;;  %v5598_v3 = vadd.f32 %v4701_v44, %v5302_v50  ;;  %v1560_v8 = vadd.f32 %v1440_v26, %v1112_v63  ;;  %v1443_v11 = vmul.f32 0.6931472, %v4548_v29  ;;  %v6965_v29 = vld [vmem:[#allocation10_spill] sm:$0xff] }
 0x176   : > { %v1472_v19 = vadd.f32 1.0, %v1471_v30  ;;  %v1477_v22 = vadd.f32 1.0, %v5589_v25  ;;  %v4550_v24 = vpop.eup %4549  ;;  %v1563_v42 = vadd.f32 %v1467_v18, %v1115_v56  ;;  %v1501_v31 = vand.u32 2147483647, %v4544_v9 }
 0x177   : > { %v1244_v1 = vmul.f32 1.442695, %v1184_v10  ;;  %v1155_v46 = vand.u32 2147483647, %v5587_v34  ;;  %v1449_v6 = vsel %vm5574_vm9, %v1446_v37, %v1443_v11  ;;  %v1488_v50 = vmul.f32 0.6931472, %v4550_v24 }
 0x178   : > { %v1499_v38 = vadd.f32 1.0, %v1498_v58  ;;  %4557 = vlog2.f32 %v1477_v22  ;;  %v1561_v63 = vadd.f32 %v1449_v6, %v1113_v45  ;;  %v1480_v15 = vmul.f32 -0.5, %v5589_v25 }
 0x179   : > { %v5608_v20 = vpop.eup %4551  ;;  %4559 = vpow2.f32 %v1244_v1  ;;  %v1187_v52 = vsub.f32 0.0, %v1155_v46  ;;  %v5613_v56 = vadd.f32 -0.6931472, %v1562_v32  ;;  %v5615_v36 = vadd.f32 -0.6931472, %v1560_v8 }
 0x17a   : > { %v1473_v2 = vmul.f32 %v4540_v33, %v1472_v19  ;;  %vm5617_vm11 = vcmp.lt.f32.partialorder %v1474_v40, 0.0004427343  ;;  %v1494_v12 = vsel %vm5593_vm10, %v1491_v16, %v1488_v50  ;;  %vm5623_vm12 = vcmp.lt.f32.partialorder %v1501_v31, 0.0004427343 }
 0x17b   : > { %v1522_v35 = vadd.f32 1.0, %v5608_v20  ;;  %v1250_v45 = vmul.f32 1.442695, %v1187_v52  ;;  %v5628_v32 = vadd.f32 -0.6931472, %v1563_v42  ;;  %v1500_v26 = vmul.f32 %v4544_v9, %v1499_v38 }
 0x17c   : > { %v4554_v30 = vpop.eup %4553  ;;  %v1483_v33 = vand.u32 2147483647, %v5589_v25  ;;  %v1153_v37 = vand.u32 2147483647, %v5598_v3  ;;  %v5632_v7 = vadd.f32 -0.6931472, %v1561_v63  ;;  %v1566_v28 = vadd.f32 %v1494_v12, %v1118_v17 }
 0x17d   : > { %v1470_v44 = vmul.f32 0.6931472, %v4554_v30  ;;  %v1481_v18 = vadd.f32 1.0, %v1480_v15  ;;  %4561 = vpow2.f32 %v1250_v45  ;;  %v1608_v10 = vpack.c.bf16 %v5428_v4, %v5357_v27  ;;  %v3915_v9 = vld [vmem:[%s6854_s5] ss:$0 sm:$0xff] }
 0x17e   : > { %v1185_v58 = vsub.f32 0.0, %v1153_v37  ;;  %v1609_v16 = vpack.c.bf16 %v5397_v62, %v6965_v29  ;;  %4563 = vlog2.f32 %v1522_v35  ;;  %v1610_v8 = vpack.c.bf16 %v5492_v21, %v5477_v61  ;;  %v6967_v30 = vld [vmem:[#allocation9_spill] sm:$0xff] }
 0x17f   : > { %v4556_v40 = vpop.eup %4555  ;;  %v1611_v14 = vpack.c.bf16 %v5484_v39, %v5448_v51  ;;  %v1612_v17 = vpack.c.bf16 %v5571_v59, %v5527_v23  ;;  %v1476_v27 = vsel %vm5617_vm11, %v1473_v2, %v1470_v44  ;;  %4216 = vmatprep.mubr.bf16.mxu0 %v1608_v10  ;;  %v1613_v11 = vpack.c.bf16 %v5544_v48, %v5520_v53  ;;  %v6966_v51 = vld [vmem:[#allocation11_spill] sm:$0xff] }
 0x180   : > { %v1497_v4 = vmul.f32 0.6931472, %v4556_v40  ;;  %v1246_v62 = vmul.f32 1.442695, %v1185_v58  ;;  %4217 = vmatmul.mubr.bf16.gmra.mrb[12].mxu0 %v1609_v16  ;;  %v1614_v19 = vpack.c.bf16 %v5632_v7, %v5615_v36  ;;  %v1615_v61 = vpack.c.bf16 %v5628_v32, %v5613_v56  ;;  %v4412_v36 = vld [vmem:[%s6859_s10 + $0x8] sm:$0xff]  }
 0x181   : > { %v5658_v39 = vadd.f32 %v6966_v51, %v3915_v9  ;;  %v5661_v21 = vadd.f32 %v3915_v9, %v5395_v43  ;;  %v1116_v59 = vmax.f32 %v5488_v5, 0.0  ;;  %v1482_v53 = vmul.f32 %v5589_v25, %v1481_v18  ;;  %4220 = vmatprep.mubr.bf16.mxu0 %v1610_v8 }
 0x182   : > { %v4558_v23 = vpop.eup %4557  ;;  %v1503_v22 = vsel %vm5623_vm12, %v1500_v26, %v1497_v4  ;;  %4565 = vpow2.f32 %v1246_v62  ;;  %v5673_v43 = vadd.f32 %v5446_v55, %v3915_v9  ;;  %v5676_v5 = vadd.f32 %v3915_v9, %v5490_v0 }
 0x183   : > { %v5667_v48 = vpop.eup %4559  ;;  %v1567_v24 = vadd.f32 %v1503_v22, %v1119_v13  ;;  %v1479_v42 = vmul.f32 0.6931472, %v4558_v23  ;;  %730 = vrot.lane.b32.xlu0 %v5661_v21, %s4767_s29  ;;  %734 = vrot.lane.b32.xlu1 %v5658_v39, %s4767_s29  ;;  %v1564_v25 = vadd.f32 %v1476_v27, %v1116_v59  ;;  %v1117_v31 = vmax.f32 %v5510_v47, 0.0 }
 0x184   : > { %vm1484_vm13 = vcmp.lt.f32.partialorder %v1483_v33, 0.0004427343  ;;  %v1504_v1 = vadd.f32 1.0, %v5667_v48  ;;  %v1598_v49 = vadd.f32 -0.6931472, %v1566_v28  ;;  %v1525_v47 = vmul.f32 -0.5, %v5608_v20 }
 0x185   : > { %v1599_v13 = vadd.f32 -0.6931472, %v1567_v24  ;;  %v1485_v46 = vsel %vm1484_vm13, %v1482_v53, %v1479_v42  ;;  %v1596_v55 = vadd.f32 -0.6931472, %v1564_v25  ;;  %v1528_v35 = vand.u32 2147483647, %v5608_v20 }
 0x186   : > { %v1565_v6 = vadd.f32 %v1485_v46, %v1117_v31  ;;  %4567 = vlog2.f32 %v1504_v1  ;;  %v1526_v57 = vadd.f32 1.0, %v1525_v47  ;;  %v1507_v45 = vmul.f32 -0.5, %v5667_v48  ;;  %v4414_v31 = vld [vmem:[%s4975_s27 + $0x8] sm:$0xff]   ;;  %v4416_v1 = vld [vmem:[%s4975_s27 + $0x18] sm:$0xff]   ;;  %v4419_v46 = vld [vmem:[%s4975_s27 + $0x30] sm:$0xff]  }
 0x187   : > { %v4562_v50 = vpop.eup %4561  ;;  %v1617_v38 = vpack.c.bf16 %v1599_v13, %v1598_v49  ;;  %732 = vrot.lane.b32.xlu0 %v5676_v5, %s4767_s29  ;;  %736 = vrot.lane.b32.xlu1 %v5673_v43, %s4767_s29  ;;  %vm1529_vm14 = vcmp.lt.f32.partialorder %v1528_v35, 0.0004427343  ;;  %v1510_v10 = vand.u32 2147483647, %v5667_v48  ;;  %v1122_v16 = vmax.f32 %v5533_v41, 0.0  ;;  %v4417_v49 = vld [vmem:[%s4975_s27 + $0x20] sm:$0xff]  }
 0x188   : > { %v1597_v0 = vadd.f32 -0.6931472, %v1565_v6  ;;  %v1531_v63 = vadd.f32 1.0, %v4562_v50  ;;  %v4564_v15 = vpop.eup %4563  ;;  %4221 = vmatmul.mubr.bf16.gmra.mrb[16].mxu0 %v1611_v14  ;;  %v1534_v12 = vmul.f32 -0.5, %v4562_v50  ;;  %v1527_v37 = vmul.f32 %v5608_v20, %v1526_v57  ;;  %v4418_v13 = vld [vmem:[%s4975_s27 + $0x28] sm:$0xff]   ;;  %v4420_v6 = vld [vmem:[%s4975_s27 + $0x38] sm:$0xff]  }
 0x189   : > { %4224 = vmatprep.mubr.bf16.mxu0 %v1612_v17  ;;  %v1524_v26 = vmul.f32 0.6931472, %v4564_v15  ;;  %v1508_v44 = vadd.f32 1.0, %v1507_v45  ;;  %v1537_v18 = vand.u32 2147483647, %v4562_v50  ;;  %v1123_v40 = vmax.f32 %v5587_v34, 0.0 }
 0x18a   : > { %4569 = vlog2.f32 %v1531_v63  ;;  %v1616_v52 = vpack.c.bf16 %v1597_v0, %v1596_v55  ;;  %v1535_v7 = vadd.f32 1.0, %v1534_v12  ;;  %vm1511_vm1 = vcmp.lt.f32.partialorder %v1510_v10, 0.0004427343  ;;  %v4423_v55 = vld [vmem:[%s4975_s27 + $0x50] sm:$0xff]   ;;  %v4424_v0 = vld [vmem:[%s4975_s27 + $0x58] sm:$0xff]   ;;  %v4425_v63 = vld [vmem:[%s4975_s27 + $0x60] sm:$0xff]  }
 0x18b   : > { %v1530_v58 = vsel %vm1529_vm14, %v1527_v37, %v1524_v26  ;;  %v1509_v17 = vmul.f32 %v5667_v48, %v1508_v44  ;;  %vm1538_vm15 = vcmp.lt.f32.partialorder %v1537_v18, 0.0004427343  ;;  %v1120_v23 = vmax.f32 %v5567_v60, 0.0  ;;  %v4426_v15 = vld [vmem:[%s4975_s27 + $0x68] sm:$0xff]   ;;  %v4427_v47 = vld [vmem:[%s4975_s27 + $0x70] sm:$0xff]   ;;  %s4045_s29 = sshll.u32 %s4878_s25, 9 }
 0x18c   : > { %v4566_v2 = vpop.eup %4565  ;;  %4232 = vmatprep.mubr.bf16.mxu1 %v1616_v52  ;;  %v1536_v14 = vmul.f32 %v4562_v50, %v1535_v7  ;;  %v1570_v20 = vadd.f32 %v1530_v58, %v1122_v16  ;;  %v1121_v48 = vmax.f32 %v5598_v3, 0.0  ;;  %v4415_v3 = vld [vmem:[%s4975_s27 + $0x10] sm:$0xff]   ;;  %v4421_v50 = vld [vmem:[%s4975_s27 + $0x40] sm:$0xff]   ;;  %v4428_v52 = vld [vmem:[%s4975_s27 + $0x78] sm:$0xff]   ;;  %vm742_vm3 = vcmask 523264   ;;  %s6806_s6 = scalar_lea.hbm %s6865_s16, %s4045_s29  ;;  %s4769_s25 = smov [#allocation2]  }
 0x18d   : > { %v1513_v54 = vadd.f32 1.0, %v4566_v2  ;;  %4233 = vmatmul.mubr.bf16.vlgmr.msra.gmra.mrb[32].mxu1 %v1617_v38  ;;  %v1516_v28 = vmul.f32 -0.5, %v4566_v2  ;;  %v1519_v62 = vand.u32 2147483647, %v4566_v2  ;;  %v4422_v38 = vld [vmem:[%s4975_s27 + $0x48] sm:$0xff]   ;;  %v5758_v7 = vld [vmem:[%s6864_s15 + $0x18] sm:$0xff] }
 0x18e   : > { %4241 = vmatpush3.bf16.msra.mxu1 %v6967_v30  ;;  %v1602_v41 = vadd.f32 -0.6931472, %v1570_v20  ;;  %v5749_v30 = vld [vmem:[%s6864_s15] sm:$0xff]  ;;  %v4430_v26 = vld [vmem:[%s6861_s12 + $0x8] sm:$0xff]   ;;  %vm3530_vm4 = vcmask 1042434   ;;  %vm3532_vm5 = vcmask 1043459  }
 0x18f   : > { %4571 = vlog2.f32 %v1513_v54  ;;  %4242 = vmatprep.subr.bf16.mxu1 %v4412_v36  ;;  %v1517_v27 = vadd.f32 1.0, %v1516_v28  ;;  %vm1520_vm2 = vcmp.lt.f32.partialorder %v1519_v62, 0.0004427343  ;;  %v5743_v54 = vld [vmem:[%s6864_s15 + $0x10] sm:$0xff]  ;;  %v5769_v10 = vld [vmem:[%s6864_s15 + $0x8] sm:$0xff]  ;;  %vm3534_vm6 = vcmask 1044484  }
 0x190   : > { %v4568_v33 = vpop.eup %4567  ;;  %4225 = vmatmul.mubr.bf16.gmra.mrb[20].mxu0 %v1613_v11  ;;  %vm3536_vm7 = vcmask 1045509   ;;  %vm3538_vm8 = vcmask 1046534   ;;  %vm3540_vm9 = vcmask 1047559   ;;  %s4707_s2 = sshll.u32 %s4769_s25, 4  ;;  %s4708_s2 = int_to_ptr.vmem [resolvable:$false] %s4707_s2 }
 0x191   : > { %4228 = vmatprep.mubr.bf16.mxu0 %v1614_v19  ;;  %v1506_v9 = vmul.f32 0.6931472, %v4568_v33  ;;  %v1518_v22 = vmul.f32 %v4566_v2, %v1517_v27  ;;  %v5738_v2 = vld [vmem:[%s6858_s9] ss:$0 sm:$0xff]  ;;  %s4709_s20 = scalar_lea.vmem %s4708_s2, 1024 }
 0x192   : > { %4243 = vmatpush3.bf16.msra.mxu1 %v4412_v36  ;;  %v4429_v36 = vld [vmem:[%s6861_s12] sm:$0xff]  }
 0x193   : > { %v1512_v11 = vsel %vm1511_vm1, %v1509_v17, %v1506_v9  ;;  %4276 = vmatprep.subr.bf16.mxu0 %v4429_v36 }
 0x194   : > { %v4570_v29 = vpop.eup %4569  ;;  %v1568_v53 = vadd.f32 %v1512_v11, %v1120_v23  ;;  %4277 = vmatpush3.bf16.msra.mxu0 %v4429_v36 }
 0x195   : > { %v1533_v8 = vmul.f32 0.6931472, %v4570_v29  ;;  %4278 = vmatprep.subr.bf16.mxu0 %v4430_v26 }
 0x196   : > { %v1600_v60 = vadd.f32 -0.6931472, %v1568_v53 }
 0x197   : > { %v1539_v4 = vsel %vm1538_vm15, %v1536_v14, %v1533_v8 }
 0x198   : > { %v1571_v19 = vadd.f32 %v1539_v4, %v1123_v40  ;;  %4229 = vmatmul.mubr.bf16.gmra.mrb[24].mxu0 %v1615_v61  ;;  %v4413_v61 = vld [vmem:[%s4975_s27] sm:$0xff]   ;;  %s563_s27 = scalar_lea.vmem [#allocation2], %s3906_s26 }
 0x199   : > { %v4572_v51 = vpop.eup %4571  ;;  %4279 = vmatpush3.bf16.msra.mxu0 %v4430_v26  ;;  %s3804_s23 = sshll.u32 %s563_s27, 4  ;;  %s6801_s23 = int_to_ptr.vmem [resolvable:$true] %s3804_s23 }
 0x19a   : > { %v1603_v34 = vadd.f32 -0.6931472, %v1571_v19  ;;  %v1515_v59 = vmul.f32 0.6931472, %v4572_v51  ;;  %p4710_p1 = scmp.lt.s32.totalorder %s6801_s23, %s4708_s2 }
 0x19c   : > { %v1521_v24 = vsel %vm1520_vm2, %v1518_v22, %v1515_v59  ;;  %v1619_v42 = vpack.c.bf16 %v1603_v34, %v1602_v41 }
 0x19d   : > { %v1569_v25 = vadd.f32 %v1521_v24, %v1121_v48 }
 0x19f   : > { %v1601_v56 = vadd.f32 -0.6931472, %v1569_v25 }
 0x1a1   : > { %v1618_v32 = vpack.c.bf16 %v1601_v56, %v1600_v60 }
 0x1a3   : > { %4236 = vmatprep.mubr.bf16.mxu1 %v1618_v32  ;;  %v5788_v32 = vld [vmem:[%s6864_s15 + $0x20] sm:$0xff] }
 0x1a4   : > { %4237 = vmatmul.mubr.bf16.gmra.mrb[36].mxu1 %v1619_v42  ;;  %v5782_v42 = vld [vmem:[%s6864_s15 + $0x30] sm:$0xff] }
 0x1a5   : > { %4244 = vmatprep.mubr.msk.bf16.mxu1 %vm882_vm0, %v4413_v61 }
 0x1ac   : > { %4245 = vmatmul.mubr.msk.bf16.vlgmr.msra.gmra.mrb[40].mxu1 %vm882_vm0, %v4414_v31 }
 0x1ad   : > { %4248 = vmatprep.mubr.msk.bf16.mxu1 %vm882_vm0, %v4415_v3 }
 0x1b4   : > { %4249 = vmatmul.mubr.msk.bf16.gmra.mrb[44].mxu1 %vm882_vm0, %v4416_v1 }
 0x1b5   : > { %4252 = vmatprep.mubr.msk.bf16.mxu1 %vm882_vm0, %v4417_v49  ;;  %v5794_v49 = vld [vmem:[%s6864_s15 + $0x38] sm:$0xff] }
 0x1bc   : > { %4253 = vmatmul.mubr.msk.bf16.gmra.mrb[48].mxu1 %vm882_vm0, %v4418_v13 }
 0x1bd   : > { %4256 = vmatprep.mubr.msk.bf16.mxu1 %vm882_vm0, %v4419_v46 }
 0x1c4   : > { %4257 = vmatmul.mubr.msk.bf16.gmra.mrb[52].mxu1 %vm882_vm0, %v4420_v6 }
 0x1c5   : > { %4260 = vmatprep.mubr.msk.bf16.mxu1 %vm882_vm0, %v4421_v50 }
 0x1cc   : > { %4261 = vmatmul.mubr.msk.bf16.gmra.mrb[56].mxu1 %vm882_vm0, %v4422_v38  ;;  %v5801_v38 = vld [vmem:[%s6864_s15 + $0x28] sm:$0xff] }
 0x1cd   : > { %4264 = vmatprep.mubr.msk.bf16.mxu1 %vm882_vm0, %v4423_v55 }
 0x1d4   : > { %4265 = vmatmul.mubr.msk.bf16.gmra.mrb[60].mxu1 %vm882_vm0, %v4424_v0 }
 0x1d5   : > { %4268 = vmatprep.mubr.msk.bf16.mxu1 %vm882_vm0, %v4425_v63 }
 0x1dc   : > { %4269 = vmatmul.mubr.msk.bf16.gmra.mrb[64].mxu1 %vm882_vm0, %v4426_v15 }
 0x1dd   : > { %4272 = vmatprep.mubr.msk.bf16.mxu1 %vm882_vm0, %v4427_v47 }
 0x1e4   : > { %4273 = vmatmul.mubr.msk.bf16.gmra.mrb[68].mxu1 %vm882_vm0, %v4428_v52  ;;  %vm3528_vm0 = vcmask 1041409  }
 0x1f5   : > { %v731_v57 = vpop.permute.xlu0 %730 }
 0x1f6   : > { %v5762_v44 = vsel %vm742_vm3, %v5661_v21, %v731_v57 }
 0x22a   : > { %v4210_v12 = vpop.f32.mrb[4].mxu0 }
 0x22b   : > { %v1734_v35 = vadd.f32 %v4210_v12, %v5738_v2  ;;  %v1725_v45 = vpop.f32.mrb[5].mxu0 }
 0x22c   : > { %v1726_v33 = vadd.f32 %v5738_v2, %v1725_v45  ;;  %v4211_v37 = vpop.f32.mrb[6].mxu0 }
 0x22d   : > { %v1862_v18 = vmul.f32 %v5743_v54, %v1734_v35  ;;  %v1737_v28 = vadd.f32 %v4211_v37, %v5738_v2  ;;  %v1728_v58 = vpop.f32.mrb[7].mxu0 }
 0x22e   : > { %v1860_v29 = vmul.f32 %v5749_v30, %v1726_v33  ;;  %v1729_v16 = vadd.f32 %v5738_v2, %v1728_v58 }
 0x22f   : > { %v1863_v9 = vmul.f32 %v5758_v7, %v1737_v28  ;;  %v1894_v21 = vmul.f32 %v1862_v18, %v5762_v44 }
 0x230   : > { %v1861_v40 = vmul.f32 %v5769_v10, %v1729_v16  ;;  %v1892_v8 = vmul.f32 %v1860_v29, %v5762_v44 }
 0x231   : > { %v1895_v14 = vmul.f32 %v1863_v9, %v5762_v44  ;;  %v1936_v20 = vrot.slane %v1894_v21, 4 }
 0x232   : > { %v1893_v17 = vmul.f32 %v1861_v40, %v5762_v44  ;;  %v1924_v27 = vrot.slane %v1892_v8, 4 }
 0x233   : > { %v1937_v4 = vadd.f32 %v1936_v20, %v1894_v21  ;;  %v1942_v62 = vrot.slane %v1895_v14, 4  ;;  %v4431_v21 = vld [vmem:[%s6861_s12 + $0x10] sm:$0xff]  }
 0x234   : > { %v1925_v11 = vadd.f32 %v1924_v27, %v1892_v8  ;;  %v1930_v19 = vrot.slane %v1893_v17, 4  ;;  %4280 = vmatprep.subr.bf16.mxu0 %v4431_v21 }
 0x235   : > { %v1938_v51 = vrot.slane %v1937_v4, 2  ;;  %v1943_v23 = vadd.f32 %v1942_v62, %v1895_v14  ;;  %4281 = vmatpush3.bf16.msra.mxu0 %v4431_v21 }
 0x236   : > { %v1926_v41 = vrot.slane %v1925_v11, 2  ;;  %v1931_v34 = vadd.f32 %v1930_v19, %v1893_v17 }
 0x237   : > { %v1939_v59 = vadd.f32 %v1938_v51, %v1937_v4  ;;  %v1944_v22 = vrot.slane %v1943_v23, 2  ;;  %v4214_v24 = vpop.f32.mrb[8].mxu0 }
 0x238   : > { %v1927_v53 = vadd.f32 %v1926_v41, %v1925_v11  ;;  %v1932_v48 = vrot.slane %v1931_v34, 2  ;;  %v1750_v60 = vadd.f32 %v4214_v24, %v5738_v2  ;;  %v1741_v56 = vpop.f32.mrb[9].mxu0 }
 0x239   : > { %v1945_v25 = vadd.f32 %v1944_v22, %v1943_v23  ;;  %v1742_v3 = vadd.f32 %v5738_v2, %v1741_v56  ;;  %v4215_v1 = vpop.f32.mrb[10].mxu0  ;;  %v1940_v13 = vrot.slane %v1939_v59, 1 }
 0x23a   : > { %v1928_v61 = vrot.slane %v1927_v53, 1  ;;  %v1933_v31 = vadd.f32 %v1932_v48, %v1931_v34  ;;  %v1866_v46 = vmul.f32 %v5782_v42, %v1750_v60  ;;  %v1753_v6 = vadd.f32 %v4215_v1, %v5738_v2  ;;  %v1744_v50 = vpop.f32.mrb[11].mxu0  ;;  %v733_v1 = vpop.permute.xlu0 %732 }
 0x23b   : > { %v1864_v0 = vmul.f32 %v5788_v32, %v1742_v3  ;;  %v1946_v63 = vrot.slane %v1945_v25, 1  ;;  %v1745_v15 = vadd.f32 %v5738_v2, %v1744_v50  ;;  %v1941_v45 = vadd.f32 %v1940_v13, %v1939_v59 }
 0x23c   : > { %v1934_v55 = vrot.slane %v1933_v31, 1  ;;  %v1898_v47 = vmul.f32 %v1866_v46, %v5762_v44  ;;  %v1867_v52 = vmul.f32 %v5794_v49, %v1753_v6  ;;  %v1929_v36 = vadd.f32 %v1928_v61, %v1927_v53 }
 0x23d   : > { %v1896_v12 = vmul.f32 %v1864_v0, %v5762_v44  ;;  %v1865_v35 = vmul.f32 %v5801_v38, %v1745_v15  ;;  %v1947_v37 = vadd.f32 %v1946_v63, %v1945_v25  ;;  %v4432_v25 = vld [vmem:[%s6861_s12 + $0x18] sm:$0xff]   ;;  %v5830_v0 = vsel %vm742_vm3, %v5676_v5, %v733_v1 }
 0x23e   : > { %v1935_v57 = vadd.f32 %v1934_v55, %v1933_v31  ;;  %v1960_v26 = vrot.slane %v1898_v47, 4  ;;  %v1899_v33 = vmul.f32 %v1867_v52, %v5762_v44  ;;  %4282 = vmatprep.subr.bf16.mxu0 %v4432_v25 }
 0x23f   : > { %v1948_v18 = vrot.slane %v1896_v12, 4  ;;  %v1897_v58 = vmul.f32 %v1865_v35, %v5762_v44  ;;  %4283 = vmatpush3.bf16.msra.mxu0 %v4432_v25 }
 0x240   : > { %v3529_v28 = vsel %vm3528_vm0, %v1935_v57, %v1929_v36  ;;  %v1961_v29 = vadd.f32 %v1960_v26, %v1898_v47  ;;  %v1966_v9 = vrot.slane %v1899_v33, 4 }
 0x241   : > { %v3531_v16 = vsel %vm3530_vm4, %v1941_v45, %v3529_v28  ;;  %v1949_v40 = vadd.f32 %v1948_v18, %v1896_v12  ;;  %v1954_v14 = vrot.slane %v1897_v58, 4 }
 0x242   : > { %v3533_v8 = vsel %vm3532_vm5, %v1947_v37, %v3531_v16  ;;  %v1962_v20 = vrot.slane %v1961_v29, 2  ;;  %v1967_v17 = vadd.f32 %v1966_v9, %v1899_v33 }
 0x243   : > { %v1950_v27 = vrot.slane %v1949_v40, 2  ;;  %v1955_v4 = vadd.f32 %v1954_v14, %v1897_v58 }
 0x244   : > { %v1963_v62 = vadd.f32 %v1962_v20, %v1961_v29  ;;  %v1968_v44 = vrot.slane %v1967_v17, 2 }
 0x245   : > { %v1951_v11 = vadd.f32 %v1950_v27, %v1949_v40  ;;  %v1956_v19 = vrot.slane %v1955_v4, 2 }
 0x246   : > { %v1969_v51 = vadd.f32 %v1968_v44, %v1967_v17  ;;  %v1964_v34 = vrot.slane %v1963_v62, 1 }
 0x247   : > { %v1952_v23 = vrot.slane %v1951_v11, 1  ;;  %v1957_v41 = vadd.f32 %v1956_v19, %v1955_v4 }
 0x248   : > { %v1970_v22 = vrot.slane %v1969_v51, 1  ;;  %v1965_v60 = vadd.f32 %v1964_v34, %v1963_v62 }
 0x249   : > { %v1953_v59 = vadd.f32 %v1952_v23, %v1951_v11  ;;  %v1958_v53 = vrot.slane %v1957_v41, 1 }
 0x24a   : > { %v1971_v56 = vadd.f32 %v1970_v22, %v1969_v51 }
 0x24b   : > { %v3535_v48 = vsel %vm3534_vm6, %v1953_v59, %v3533_v8  ;;  %v1959_v24 = vadd.f32 %v1958_v53, %v1957_v41 }
 0x24d   : > { %v3537_v61 = vsel %vm3536_vm7, %v1959_v24, %v3535_v48 }
 0x24e   : > { %v3539_v31 = vsel %vm3538_vm8, %v1965_v60, %v3537_v61 }
 0x24f   : > { %v5824_v3 = vsel %vm3540_vm9, %v1971_v56, %v3539_v31 }
 0x253   : > { %v4218_v13 = vpop.f32.mrb[12].mxu0 }
 0x254   : > { %v1766_v46 = vadd.f32 %v4218_v13, %v5738_v2  ;;  %v1757_v6 = vpop.f32.mrb[13].mxu0 }
 0x255   : > { %v1758_v50 = vadd.f32 %v5738_v2, %v1757_v6  ;;  %v4219_v55 = vpop.f32.mrb[14].mxu0 }
 0x256   : > { %v1870_v63 = vmul.f32 %v5743_v54, %v1766_v46  ;;  %v1769_v15 = vadd.f32 %v4219_v55, %v5738_v2  ;;  %v1760_v47 = vpop.f32.mrb[15].mxu0 }
 0x257   : > { %v1868_v52 = vmul.f32 %v5749_v30, %v1758_v50  ;;  %v1761_v36 = vadd.f32 %v5738_v2, %v1760_v47 }
 0x258   : > { %v1871_v57 = vmul.f32 %v5758_v7, %v1769_v15  ;;  %v1902_v12 = vmul.f32 %v1870_v63, %v5830_v0 }
 0x259   : > { %v1869_v35 = vmul.f32 %v5769_v10, %v1761_v36  ;;  %v1900_v45 = vmul.f32 %v1868_v52, %v5830_v0  ;;  %v735_v52 = vpop.permute.xlu1 %734 }
 0x25a   : > { %v1903_v5 = vmul.f32 %v1871_v57, %v5830_v0  ;;  %v1984_v26 = vrot.slane %v1902_v12, 4 }
 0x25b   : > { %v1901_v33 = vmul.f32 %v1869_v35, %v5830_v0  ;;  %v1972_v37 = vrot.slane %v1900_v45, 4  ;;  %v4222_v18 = vpop.f32.mrb[16].mxu0 }
 0x25c   : > { %v1985_v28 = vadd.f32 %v1984_v26, %v1902_v12  ;;  %v1990_v58 = vrot.slane %v1903_v5, 4  ;;  %v1773_v29 = vpop.f32.mrb[17].mxu0  ;;  %v1782_v20 = vadd.f32 %v4222_v18, %v5738_v2 }
 0x25d   : > { %v1973_v16 = vadd.f32 %v1972_v37, %v1900_v45  ;;  %v1978_v9 = vrot.slane %v1901_v33, 4  ;;  %v1774_v21 = vadd.f32 %v5738_v2, %v1773_v29  ;;  %v4223_v40 = vpop.f32.mrb[18].mxu0 }
 0x25e   : > { %v1986_v8 = vrot.slane %v1985_v28, 2  ;;  %v1991_v14 = vadd.f32 %v1990_v58, %v1903_v5  ;;  %v1776_v17 = vpop.f32.mrb[19].mxu0  ;;  %v1874_v24 = vmul.f32 %v5782_v42, %v1782_v20  ;;  %v1785_v25 = vadd.f32 %v4223_v40, %v5738_v2 }
 0x25f   : > { %v1974_v27 = vrot.slane %v1973_v16, 2  ;;  %v1979_v4 = vadd.f32 %v1978_v9, %v1901_v33  ;;  %v1872_v62 = vmul.f32 %v5788_v32, %v1774_v21  ;;  %v1777_v44 = vadd.f32 %v5738_v2, %v1776_v17 }
 0x260   : > { %v5846_v11 = vpop.f32.mrb[32].mxu1  ;;  %v1987_v19 = vadd.f32 %v1986_v8, %v1985_v28  ;;  %v1992_v51 = vrot.slane %v1991_v14, 2  ;;  %v1906_v57 = vmul.f32 %v1874_v24, %v5830_v0  ;;  %v1875_v12 = vmul.f32 %v5794_v49, %v1785_v25 }
 0x261   : > { %v5848_v23 = vpop.f32.mrb[33].mxu1  ;;  %v1975_v41 = vadd.f32 %v1974_v27, %v1973_v16  ;;  %v1980_v34 = vrot.slane %v1979_v4, 2  ;;  %v1904_v59 = vmul.f32 %v1872_v62, %v5830_v0  ;;  %v1873_v22 = vmul.f32 %v5801_v38, %v1777_v44 }
 0x262   : > { %v5852_v53 = vpop.f32.mrb[34].mxu1  ;;  %v1993_v48 = vadd.f32 %v1992_v51, %v1991_v14  ;;  %v1988_v46 = vrot.slane %v1987_v19, 1  ;;  %v745_v28 = vsel %vm742_vm3, %v5658_v39, %v735_v52  ;;  %v2008_v21 = vrot.slane %v1906_v57, 4 }
 0x263   : > { %v5856_v60 = vpop.f32.mrb[35].mxu1  ;;  %v1976_v56 = vrot.slane %v1975_v41, 1  ;;  %v1981_v61 = vadd.f32 %v1980_v34, %v1979_v4  ;;  %v1996_v31 = vrot.slane %v1904_v59, 4  ;;  %v1905_v1 = vmul.f32 %v1873_v22, %v5830_v0  ;;  %v4226_v13 = vpop.f32.mrb[20].mxu0 }
 0x264   : > { %v1994_v6 = vrot.slane %v1993_v48, 1  ;;  %v1789_v50 = vpop.f32.mrb[21].mxu0  ;;  %v1989_v37 = vadd.f32 %v1988_v46, %v1987_v19  ;;  %v1907_v8 = vmul.f32 %v1875_v12, %v5830_v0  ;;  %v1798_v62 = vadd.f32 %v4226_v13, %v5738_v2 }
 0x265   : > { %v1982_v55 = vrot.slane %v1981_v61, 1  ;;  %v1997_v63 = vadd.f32 %v1996_v31, %v1904_v59  ;;  %v2002_v15 = vrot.slane %v1905_v1, 4  ;;  %v4227_v47 = vpop.f32.mrb[22].mxu0  ;;  %v1977_v36 = vadd.f32 %v1976_v56, %v1975_v41 }
 0x266   : > { %v1792_v35 = vpop.f32.mrb[23].mxu0  ;;  %v1790_v33 = vadd.f32 %v5738_v2, %v1789_v50  ;;  %v1995_v18 = vadd.f32 %v1994_v6, %v1993_v48  ;;  %v2009_v59 = vadd.f32 %v2008_v21, %v1906_v57  ;;  %v2014_v22 = vrot.slane %v1907_v8, 4 }
 0x267   : > { %v1983_v45 = vadd.f32 %v1982_v55, %v1981_v61  ;;  %v1998_v5 = vrot.slane %v1997_v63, 2  ;;  %v2003_v26 = vadd.f32 %v2002_v15, %v1905_v1  ;;  %v1793_v41 = vadd.f32 %v5738_v2, %v1792_v35 }
 0x268   : > { %v1876_v9 = vmul.f32 %v5749_v30, %v1790_v33  ;;  %v1878_v31 = vmul.f32 %v5743_v54, %v1798_v62  ;;  %v1801_v1 = vadd.f32 %v4227_v47, %v5738_v2  ;;  %v2010_v15 = vrot.slane %v2009_v59, 2 }
 0x269   : > { %v1999_v58 = vadd.f32 %v1998_v5, %v1997_v63  ;;  %v3542_v29 = vsel %vm3528_vm0, %v1983_v45, %v1977_v36  ;;  %v2004_v16 = vrot.slane %v2003_v26, 2  ;;  %v1877_v61 = vmul.f32 %v5769_v10, %v1793_v41 }
 0x26a   : > { %v3543_v40 = vsel %vm3530_vm4, %v1989_v37, %v3542_v29  ;;  %v1908_v27 = vmul.f32 %v1876_v9, %v745_v28  ;;  %v2015_v52 = vadd.f32 %v2014_v22, %v1907_v8  ;;  %v1879_v45 = vmul.f32 %v5758_v7, %v1801_v1 }
 0x26b   : > { %v2000_v14 = vrot.slane %v1999_v58, 1  ;;  %v3544_v20 = vsel %vm3532_vm5, %v1995_v18, %v3543_v40  ;;  %v2005_v17 = vadd.f32 %v2004_v16, %v2003_v26  ;;  %v4230_v4 = vpop.f32.mrb[24].mxu0  ;;  %v1909_v55 = vmul.f32 %v1877_v61, %v745_v28 }
 0x26c   : > { %v1805_v39 = vpop.f32.mrb[25].mxu0  ;;  %v2020_v51 = vrot.slane %v1908_v27, 4  ;;  %v1814_v48 = vadd.f32 %v4230_v4, %v5738_v2  ;;  %v1910_v5 = vmul.f32 %v1878_v31, %v745_v28  ;;  %v2011_v16 = vadd.f32 %v2010_v15, %v2009_v59  ;;  %v737_v4 = vpop.permute.xlu1 %736 }
 0x26d   : > { %v2001_v44 = vadd.f32 %v2000_v14, %v1999_v58  ;;  %v2006_v19 = vrot.slane %v2005_v17, 1  ;;  %v4231_v34 = vpop.f32.mrb[26].mxu0  ;;  %v1806_v46 = vadd.f32 %v5738_v2, %v1805_v39  ;;  %v2026_v12 = vrot.slane %v1909_v55, 4 }
 0x26e   : > { %v1808_v0 = vpop.f32.mrb[27].mxu0  ;;  %v2021_v56 = vadd.f32 %v2020_v51, %v1908_v27  ;;  %v1882_v13 = vmul.f32 %v5782_v42, %v1814_v48  ;;  %v1817_v63 = vadd.f32 %v4231_v34, %v5738_v2  ;;  %v2016_v9 = vrot.slane %v2015_v52, 2 }
 0x26f   : > { %v3545_v24 = vsel %vm3534_vm6, %v2001_v44, %v3544_v20  ;;  %v2007_v25 = vadd.f32 %v2006_v19, %v2005_v17  ;;  %v1880_v57 = vmul.f32 %v5788_v32, %v1806_v46  ;;  %v1809_v47 = vadd.f32 %v5738_v2, %v1808_v0 }
 0x270   : > { %v2022_v50 = vrot.slane %v2021_v56, 2  ;;  %v1914_v36 = vmul.f32 %v1882_v13, %v745_v28  ;;  %v1883_v35 = vmul.f32 %v5794_v49, %v1817_v63  ;;  %v2027_v18 = vadd.f32 %v2026_v12, %v1909_v55 }
 0x271   : > { %v5879_v6 = vsel %vm3536_vm7, %v2007_v25, %v3545_v24  ;;  %v1912_v33 = vmul.f32 %v1880_v57, %v745_v28  ;;  %v1881_v29 = vmul.f32 %v5801_v38, %v1809_v47  ;;  %v1830_v17 = vadd.f32 %v5846_v11, %v5738_v2 }
 0x272   : > { %v2056_v26 = vrot.slane %v1914_v36, 4  ;;  %v2023_v37 = vadd.f32 %v2022_v50, %v2021_v56  ;;  %v1915_v58 = vmul.f32 %v1883_v35, %v745_v28  ;;  %v2028_v14 = vrot.slane %v2027_v18, 2 }
 0x273   : > { %v2044_v40 = vrot.slane %v1912_v33, 4  ;;  %v1913_v20 = vmul.f32 %v1881_v29, %v745_v28  ;;  %v1822_v27 = vadd.f32 %v5738_v2, %v5848_v23  ;;  %v1911_v39 = vmul.f32 %v1879_v45, %v745_v28 }
 0x274   : > { %v2057_v21 = vadd.f32 %v2056_v26, %v1914_v36  ;;  %v2062_v19 = vrot.slane %v1915_v58, 4  ;;  %v2032_v41 = vrot.slane %v1910_v5, 4  ;;  %v2024_v34 = vrot.slane %v2023_v37, 1 }
 0x275   : > { %v2045_v44 = vadd.f32 %v2044_v40, %v1912_v33  ;;  %v2029_v59 = vadd.f32 %v2028_v14, %v2027_v18  ;;  %v1825_v22 = vadd.f32 %v5738_v2, %v5856_v60  ;;  %v2017_v0 = vadd.f32 %v2016_v9, %v2015_v52 }
 0x276   : > { %v2058_v24 = vrot.slane %v2057_v21, 2  ;;  %v2050_v25 = vrot.slane %v1913_v20, 4  ;;  %v5895_v11 = vsel %vm742_vm3, %v5673_v43, %v737_v4  ;;  %v2012_v23 = vrot.slane %v2011_v16, 1 }
 0x277   : > { %v4238_v8 = vpop.f32.mrb[36].mxu1  ;;  %v2030_v56 = vrot.slane %v2029_v59, 1  ;;  %v1886_v28 = vmul.f32 %v5743_v54, %v1830_v17  ;;  %v1884_v61 = vmul.f32 %v5749_v30, %v1822_v27  ;;  %v2038_v31 = vrot.slane %v1911_v39, 4  ;;  %v5923_v17 = vld [vmem:[%s6860_s11] ss:$0 sm:$0xff] }
 0x278   : > { %v1837_v62 = vpop.f32.mrb[37].mxu1  ;;  %v2046_v1 = vrot.slane %v2045_v44, 2  ;;  %v2063_v13 = vadd.f32 %v2062_v19, %v1915_v58  ;;  %v1833_v60 = vadd.f32 %v5852_v53, %v5738_v2  ;;  %v2033_v46 = vadd.f32 %v2032_v41, %v1910_v5 }
 0x279   : > { %v4239_v51 = vpop.f32.mrb[38].mxu1  ;;  %v2025_v50 = vadd.f32 %v2024_v34, %v2023_v37  ;;  %v2031_v55 = vadd.f32 %v2030_v56, %v2029_v59  ;;  %v1885_v63 = vmul.f32 %v5769_v10, %v1825_v22  ;;  %v2018_v15 = vrot.slane %v2017_v0, 1 }
 0x27a   : > { %v1840_v48 = vpop.f32.mrb[39].mxu1  ;;  %v2059_v43 = vadd.f32 %v2058_v24, %v2057_v21  ;;  %v2051_v52 = vadd.f32 %v2050_v25, %v1913_v20  ;;  %v5902_v57 = vadd.f32 %v2012_v23, %v2011_v16  ;;  %v1916_v30 = vmul.f32 %v1884_v61, %v5895_v11 }
 0x27b   : > { %v5905_v54 = vsel %vm3528_vm0, %v2031_v55, %v2025_v50  ;;  %v1918_v12 = vmul.f32 %v1886_v28, %v5895_v11  ;;  %v5909_v53 = vadd.f32 %v2038_v31, %v1911_v39  ;;  %v2047_v47 = vadd.f32 %v2046_v1, %v2045_v44 }
 0x27c   : > { %6968 = vst [vmem:[#allocation10_spill] sm:$0xff] %v5905_v54  ;;  %v2064_v45 = vrot.slane %v2063_v13, 2  ;;  %v1887_v10 = vmul.f32 %v5758_v7, %v1833_v60  ;;  %v2034_v26 = vrot.slane %v2033_v46, 2  ;;  %v1917_v33 = vmul.f32 %v1885_v63, %v5895_v11 }
 0x27d   : > { %v1846_v37 = vadd.f32 %v4238_v8, %v5738_v2  ;;  %v1838_v18 = vadd.f32 %v5738_v2, %v1837_v62  ;;  %v5915_v29 = vadd.f32 %v2018_v15, %v2017_v0  ;;  %v2060_v16 = vrot.slane %v2059_v43, 1 }
 0x27e   : > { %v2052_v9 = vrot.slane %v2051_v52, 2  ;;  %v1849_v21 = vadd.f32 %v4239_v51, %v5738_v2  ;;  %v2068_v40 = vrot.slane %v1916_v30, 4  ;;  %v2080_v14 = vrot.slane %v1918_v12, 4 }
 0x27f   : > { %v4246_v36 = vpop.f32.mrb[40].mxu1  ;;  %v1890_v20 = vmul.f32 %v5782_v42, %v1846_v37  ;;  %v1888_v7 = vmul.f32 %v5788_v32, %v1838_v18  ;;  %v2048_v27 = vrot.slane %v2047_v47, 1  ;;  %v5926_v4 = vadd.f32 %v2064_v45, %v2063_v13 }
 0x280   : > { %v2333_v35 = vpop.f32.mrb[41].mxu1  ;;  %v1919_v62 = vmul.f32 %v1887_v10, %v5895_v11  ;;  %v5929_v39 = vadd.f32 %v2034_v26, %v2033_v46  ;;  %v2074_v44 = vrot.slane %v1917_v33, 4  ;;  %v1891_v42 = vmul.f32 %v5794_v49, %v1849_v21 }
 0x281   : > { %v4247_v5 = vpop.f32.mrb[42].mxu1  ;;  %6969 = vst [vmem:[#allocation11_spill] sm:$0xff] %v5926_v4  ;;  %v1922_v19 = vmul.f32 %v1890_v20, %v5895_v11  ;;  %v2053_v32 = vadd.f32 %v2052_v9, %v2051_v52  ;;  %v1920_v51 = vmul.f32 %v1888_v7, %v5895_v11  ;;  %v5935_v41 = vadd.f32 %v4246_v36, %v5923_v17 }
 0x282   : > { %v2336_v58 = vpop.f32.mrb[43].mxu1  ;;  %v5938_v34 = vadd.f32 %v5923_v17, %v2333_v35  ;;  %v5940_v22 = vadd.f32 %v2060_v16, %v2059_v43  ;;  %v2069_v0 = vadd.f32 %v2068_v40, %v1916_v30  ;;  %v2081_v24 = vadd.f32 %v2080_v14, %v1918_v12 }
 0x283   : > { %v1841_v25 = vadd.f32 %v5738_v2, %v1840_v48  ;;  %v5943_v56 = vadd.f32 %v2048_v27, %v2047_v47  ;;  %v2086_v28 = vrot.slane %v1919_v62, 4  ;;  %v2494_v61 = vand.u32 2147483647, %v5935_v41 }
 0x284   : > { %6970 = vst [vmem:[#allocation9_spill] sm:$0xff] %v5940_v22  ;;  %v2075_v1 = vadd.f32 %v2074_v44, %v1917_v33  ;;  %v2104_v13 = vrot.slane %v1922_v19, 4  ;;  %v1923_v60 = vmul.f32 %v1891_v42, %v5895_v11  ;;  %v2492_v46 = vand.u32 2147483647, %v5938_v34 }
 0x285   : > { %6971 = vst [vmem:[#allocation12_spill] sm:$0xff] %v5943_v56  ;;  %v2054_v55 = vrot.slane %v2053_v32, 1  ;;  %v2092_v63 = vrot.slane %v1920_v51, 4  ;;  %v2526_v15 = vsub.f32 0.0, %v2494_v61  ;;  %v5950_v2 = vadd.f32 %v4247_v5, %v5923_v17 }
 0x286   : > { %v2070_v48 = vrot.slane %v2069_v0, 2  ;;  %v2082_v43 = vrot.slane %v2081_v24, 2  ;;  %v1889_v52 = vmul.f32 %v5801_v38, %v1841_v25  ;;  %v2524_v36 = vsub.f32 0.0, %v2492_v46 }
 0x287   : > { %v4250_v59 = vpop.f32.mrb[44].mxu1  ;;  %v5953_v30 = vadd.f32 %v2086_v28, %v1919_v62  ;;  %v2560_v12 = vmul.f32 1.442695, %v2526_v15  ;;  %v2495_v35 = vand.u32 2147483647, %v5950_v2  ;;  %v5957_v47 = vadd.f32 %v5923_v17, %v2336_v58 }
 0x288   : > { %v2349_v23 = vpop.f32.mrb[45].mxu1  ;;  %v2076_v45 = vrot.slane %v2075_v1, 2  ;;  %v2105_v10 = vadd.f32 %v2104_v13, %v1922_v19  ;;  %v2110_v26 = vrot.slane %v1923_v60, 4  ;;  %v2556_v33 = vmul.f32 1.442695, %v2524_v36 }
 0x289   : > { %v4251_v31 = vpop.f32.mrb[46].mxu1  ;;  %6972 = vst [vmem:[#allocation13_spill] sm:$0xff] %v5953_v30  ;;  %v5959_v37 = vadd.f32 %v2054_v55, %v2053_v32  ;;  %v2093_v5 = vadd.f32 %v2092_v63, %v1920_v51  ;;  %4573 = vpow2.f32 %v2560_v12  ;;  %v2527_v18 = vsub.f32 0.0, %v2495_v35 }
 0x28a   : > { %v2352_v50 = vpop.f32.mrb[47].mxu1  ;;  %v5961_v38 = vadd.f32 %v2070_v48, %v2069_v0  ;;  %v5963_v9 = vadd.f32 %v2082_v43, %v2081_v24  ;;  %v1921_v21 = vmul.f32 %v1889_v52, %v5895_v11  ;;  %4575 = vpow2.f32 %v2556_v33 }
 0x28b   : > { %6973 = vst [vmem:[#allocation14_spill] sm:$0xff] %v5959_v37  ;;  %v2562_v14 = vmul.f32 1.442695, %v2527_v18  ;;  %v2493_v20 = vand.u32 2147483647, %v5957_v47  ;;  %v5969_v7 = vadd.f32 %v4250_v59, %v5923_v17  ;;  %v5973_v62 = vadd.f32 %v2076_v45, %v2075_v1 }
 0x28c   : > { %6974 = vst [vmem:[#allocation15_spill] sm:$0xff] %v5961_v38  ;;  %6975 = vst [vmem:[#allocation16_spill] sm:$0xff] %v5963_v9  ;;  %v2106_v44 = vrot.slane %v2105_v10, 2  ;;  %v2111_v19 = vadd.f32 %v2110_v26, %v1923_v60  ;;  %v5976_v42 = vadd.f32 %v5923_v17, %v2349_v23  ;;  %v2094_v32 = vrot.slane %v2093_v5, 2 }
 0x28d   : > { %6976 = vst [vmem:[#allocation17_spill] sm:$0xff] %v5973_v62  ;;  %4577 = vpow2.f32 %v2562_v14  ;;  %v2525_v51 = vsub.f32 0.0, %v2493_v20  ;;  %v2498_v0 = vand.u32 2147483647, %v5969_v7  ;;  %v2098_v59 = vrot.slane %v1921_v21, 4 }
 0x28e   : > { %v2496_v25 = vand.u32 2147483647, %v5976_v42  ;;  %v5984_v28 = vadd.f32 %v4251_v31, %v5923_v17  ;;  %v5987_v23 = vadd.f32 %v5923_v17, %v2352_v50  ;;  %v2107_v60 = vadd.f32 %v2106_v44, %v2105_v10 }
 0x28f   : > { %v4254_v16 = vpop.f32.mrb[48].mxu1  ;;  %v2558_v61 = vmul.f32 1.442695, %v2525_v51  ;;  %v2530_v1 = vsub.f32 0.0, %v2498_v0  ;;  %v2112_v46 = vrot.slane %v2111_v19, 2  ;;  %v2095_v15 = vadd.f32 %v2094_v32, %v2093_v5 }
 0x290   : > { %v2365_v40 = vpop.f32.mrb[49].mxu1  ;;  %v5990_v13 = vadd.f32 %v4254_v16, %v5923_v17  ;;  %v2528_v55 = vsub.f32 0.0, %v2496_v25  ;;  %v2499_v63 = vand.u32 2147483647, %v5984_v28  ;;  %v2497_v43 = vand.u32 2147483647, %v5987_v23 }
 0x291   : > { %v5971_v27 = vpop.f32.mrb[50].mxu1  ;;  %4579 = vpow2.f32 %v2558_v61  ;;  %v2568_v48 = vmul.f32 1.442695, %v2530_v1  ;;  %v5998_v45 = vadd.f32 %v2098_v59, %v1921_v21  ;;  %v2108_v18 = vrot.slane %v2107_v60, 1 }
 0x292   : > { %v5978_v11 = vpop.f32.mrb[51].mxu1  ;;  %v2564_v36 = vmul.f32 1.442695, %v2528_v55  ;;  %v2531_v12 = vsub.f32 0.0, %v2499_v63  ;;  %v2529_v10 = vsub.f32 0.0, %v2497_v43  ;;  %v6005_v16 = vadd.f32 %v2112_v46, %v2111_v19 }
 0x293   : > { %v4574_v35 = vpop.eup %4573  ;;  %4581 = vpow2.f32 %v2568_v48  ;;  %v2502_v26 = vand.u32 2147483647, %v5990_v13  ;;  %v2096_v44 = vrot.slane %v2095_v15, 1  ;;  %v6014_v25 = vadd.f32 %v5923_v17, %v2365_v40 }
 0x294   : > { %v6003_v5 = vpop.eup %4575  ;;  %6977 = vst [vmem:[#allocation18_spill] sm:$0xff] %v6005_v16  ;;  %v2638_v14 = vadd.f32 1.0, %v4574_v35  ;;  %4583 = vpow2.f32 %v2564_v36  ;;  %v2570_v51 = vmul.f32 1.442695, %v2531_v12  ;;  %v2641_v1 = vmul.f32 -0.5, %v4574_v35 }
 0x295   : > { %v2620_v21 = vadd.f32 1.0, %v6003_v5  ;;  %v2566_v46 = vmul.f32 1.442695, %v2529_v10  ;;  %v2534_v55 = vsub.f32 0.0, %v2502_v26  ;;  %v6020_v63 = vadd.f32 %v2108_v18, %v2107_v60 }
 0x296   : > { %4585 = vlog2.f32 %v2638_v14  ;;  %v6025_v12 = vadd.f32 %v2096_v44, %v2095_v15  ;;  %v2644_v24 = vand.u32 2147483647, %v4574_v35  ;;  %v2500_v60 = vand.u32 2147483647, %v6014_v25 }
 0x297   : > { %v5994_v31 = vpop.f32.mrb[52].mxu1  ;;  %v6018_v61 = vpop.eup %4577  ;;  %4587 = vlog2.f32 %v2620_v21  ;;  %6978 = vst [vmem:[#allocation19_spill] sm:$0xff] %v6020_v63  ;;  %v2576_v14 = vmul.f32 1.442695, %v2534_v55  ;;  %v2642_v21 = vadd.f32 1.0, %v2641_v1  ;;  %v2623_v48 = vmul.f32 -0.5, %v6003_v5 }
 0x298   : > { %v6001_v33 = vpop.f32.mrb[53].mxu1  ;;  %v2647_v36 = vadd.f32 1.0, %v6018_v61  ;;  %6979 = vst [vmem:[#allocation20_spill] sm:$0xff] %v6025_v12  ;;  %4589 = vpow2.f32 %v2570_v51  ;;  %v2626_v15 = vand.u32 2147483647, %v6003_v5  ;;  %v2650_v51 = vmul.f32 -0.5, %v6018_v61 }
 0x299   : > { %v6007_v20 = vpop.f32.mrb[54].mxu1  ;;  %v6042_v58 = vadd.f32 %v5971_v27, %v5923_v17  ;;  %vm6051_vm10 = vcmp.lt.f32.partialorder %v2644_v24, 0.0004427343  ;;  %v2643_v59 = vmul.f32 %v4574_v35, %v2642_v21  ;;  %v2624_v32 = vadd.f32 1.0, %v2623_v48 }
 0x29a   : > { %v6016_v19 = vpop.f32.mrb[55].mxu1  ;;  %4591 = vlog2.f32 %v2647_v36  ;;  %v2653_v36 = vand.u32 2147483647, %v6018_v61  ;;  %vm6057_vm11 = vcmp.lt.f32.partialorder %v2626_v15, 0.0004427343  ;;  %v2651_v43 = vadd.f32 1.0, %v2650_v51 }
 0x29b   : > { %v4580_v18 = vpop.eup %4579  ;;  %4593 = vpow2.f32 %v2566_v46  ;;  %v2532_v46 = vsub.f32 0.0, %v2500_v60  ;;  %v2503_v50 = vand.u32 2147483647, %v6042_v58  ;;  %v6085_v4 = vadd.f32 %v5923_v17, %v5978_v11 }
 0x29c   : > { %v2629_v55 = vadd.f32 1.0, %v4580_v18  ;;  %v2632_v1 = vmul.f32 -0.5, %v4580_v18  ;;  %4595 = vpow2.f32 %v2576_v14  ;;  %vm6065_vm12 = vcmp.lt.f32.partialorder %v2653_v36, 0.0004427343 }
 0x29d   : > { %v6046_v8 = vpop.eup %4581  ;;  %v2572_v24 = vmul.f32 1.442695, %v2532_v46  ;;  %v2652_v37 = vmul.f32 %v6018_v61, %v2651_v43  ;;  %v6988_v61 = vmax.f32 %v5935_v41, 0.0 }
 0x29e   : > { %v6049_v10 = vpop.eup %4583  ;;  %4597 = vlog2.f32 %v2629_v55  ;;  %v2674_v27 = vadd.f32 1.0, %v6046_v8  ;;  %v2633_v12 = vadd.f32 1.0, %v2632_v1  ;;  %v2635_v55 = vand.u32 2147483647, %v4580_v18 }
 0x29f   : > { %v6028_v49 = vpop.f32.mrb[56].mxu1  ;;  %v2656_v14 = vadd.f32 1.0, %v6049_v10  ;;  %v2677_v48 = vmul.f32 -0.5, %v6046_v8  ;;  %v2680_v21 = vand.u32 2147483647, %v6046_v8 }
 0x2a0   : > { %v6032_v26 = vpop.f32.mrb[57].mxu1  ;;  %v4586_v60 = vpop.eup %4585  ;;  %4599 = vlog2.f32 %v2674_v27  ;;  %v2625_v27 = vmul.f32 %v6003_v5, %v2624_v32  ;;  %v2662_v36 = vand.u32 2147483647, %v6049_v10  ;;  %v2634_v5 = vmul.f32 %v4580_v18, %v2633_v12 }
 0x2a1   : > { %v6036_v44 = vpop.f32.mrb[58].mxu1  ;;  %v4588_v63 = vpop.eup %4587  ;;  %v2640_v16 = vmul.f32 0.6931472, %v4586_v60  ;;  %4601 = vlog2.f32 %v2656_v14  ;;  %vm6091_vm13 = vcmp.lt.f32.partialorder %v2635_v55, 0.0004427343  ;;  %v6998_v18 = vmax.f32 %v5969_v7, 0.0 }
 0x2a2   : > { %v6044_v52 = vpop.f32.mrb[59].mxu1  ;;  %4603 = vpow2.f32 %v2572_v24  ;;  %v6073_v51 = vpop.eup %4589  ;;  %v2622_v46 = vmul.f32 0.6931472, %v4588_v63  ;;  %v2535_v24 = vsub.f32 0.0, %v2503_v50  ;;  %v2659_v63 = vmul.f32 -0.5, %v6049_v10 }
 0x2a3   : > { %v2646_v1 = vsel %vm6051_vm10, %v2643_v59, %v2640_v16  ;;  %v2683_v56 = vadd.f32 1.0, %v6073_v51  ;;  %v2678_v50 = vadd.f32 1.0, %v2677_v48  ;;  %vm6105_vm14 = vcmp.lt.f32.partialorder %v2680_v21, 0.0004427343 }
 0x2a4   : > { %v4592_v60 = vpop.eup %4591  ;;  %v2910_v43 = vadd.f32 %v2646_v1, %v6988_v61  ;;  %v2628_v9 = vsel %vm6057_vm11, %v2625_v27, %v2622_v46  ;;  %vm6109_vm15 = vcmp.lt.f32.partialorder %v2662_v36, 0.0004427343  ;;  %v2686_v1 = vmul.f32 -0.5, %v6073_v51 }
 0x2a5   : > { %v6089_v16 = vpop.eup %4593  ;;  %v2649_v59 = vmul.f32 0.6931472, %v4592_v60  ;;  %4605 = vlog2.f32 %v2683_v56  ;;  %v6993_v56 = vmax.f32 %v5950_v2, 0.0  ;;  %v2578_v0 = vmul.f32 1.442695, %v2535_v24 }
 0x2a6   : > { %v2665_v11 = vadd.f32 1.0, %v6089_v16  ;;  %v6099_v40 = vpop.eup %4595  ;;  %v2660_v27 = vadd.f32 1.0, %v2659_v63  ;;  %v2942_v60 = vadd.f32 -0.6931472, %v2910_v43  ;;  %v2689_v2 = vand.u32 2147483647, %v6073_v51 }
 0x2a7   : > { %v6063_v22 = vpop.f32.mrb[60].mxu1  ;;  %v2655_v12 = vsel %vm6065_vm12, %v2652_v37, %v2649_v59  ;;  %v2668_v37 = vmul.f32 -0.5, %v6089_v16  ;;  %v2710_v35 = vadd.f32 1.0, %v6099_v40  ;;  %v6994_v59 = vmax.f32 %v5938_v34, 0.0 }
 0x2a8   : > { %v6071_v15 = vpop.f32.mrb[61].mxu1  ;;  %v4598_v41 = vpop.eup %4597  ;;  %v2911_v48 = vadd.f32 %v2655_v12, %v6993_v56  ;;  %4607 = vlog2.f32 %v2665_v11  ;;  %v2679_v63 = vmul.f32 %v6046_v8, %v2678_v50  ;;  %v6995_v34 = vmax.f32 %v5957_v47, 0.0 }
 0x2a9   : > { %v6079_v14 = vpop.f32.mrb[62].mxu1  ;;  %v2631_v46 = vmul.f32 0.6931472, %v4598_v41  ;;  %v2908_v61 = vadd.f32 %v2628_v9, %v6994_v59  ;;  %v2501_v41 = vand.u32 2147483647, %v6085_v4  ;;  %v2687_v59 = vadd.f32 1.0, %v2686_v1 }
 0x2aa   : > { %v6087_v54 = vpop.f32.mrb[63].mxu1  ;;  %v4600_v36 = vpop.eup %4599  ;;  %v2943_v38 = vadd.f32 -0.6931472, %v2911_v48  ;;  %v2661_v32 = vmul.f32 %v6049_v10, %v2660_v27  ;;  %4609 = vlog2.f32 %v2710_v35  ;;  %vm6141_vm1 = vcmp.lt.f32.partialorder %v2689_v2, 0.0004427343 }
 0x2ab   : > { %v4602_v12 = vpop.eup %4601  ;;  %v2637_v24 = vsel %vm6091_vm13, %v2634_v5, %v2631_v46  ;;  %v2676_v11 = vmul.f32 0.6931472, %v4600_v36  ;;  %v2669_v5 = vadd.f32 1.0, %v2668_v37  ;;  %v2940_v46 = vadd.f32 -0.6931472, %v2908_v61 }
 0x2ac   : > { %v6129_v30 = vpop.eup %4603  ;;  %v2973_v43 = vpack.c.bf16 %v2943_v38, %v2942_v60  ;;  %v2909_v9 = vadd.f32 %v2637_v24, %v6995_v34  ;;  %v2658_v48 = vmul.f32 0.6931472, %v4602_v12  ;;  %v2671_v10 = vand.u32 2147483647, %v6089_v16 }
 0x2ad   : > { %v2692_v8 = vadd.f32 1.0, %v6129_v30  ;;  %v2682_v38 = vsel %vm6105_vm14, %v2679_v63, %v2676_v11  ;;  %v2533_v27 = vsub.f32 0.0, %v2501_v41  ;;  %v2688_v60 = vmul.f32 %v6073_v51, %v2687_v59 }
 0x2ae   : > { %v2941_v36 = vadd.f32 -0.6931472, %v2909_v9  ;;  %v2664_v1 = vsel %vm6109_vm15, %v2661_v32, %v2658_v48  ;;  %v2713_v61 = vmul.f32 -0.5, %v6099_v40  ;;  %v2914_v2 = vadd.f32 %v2682_v38, %v6998_v18 }
 0x2af   : > { %v6118_v21 = vpop.f32.mrb[64].mxu1  ;;  %4611 = vlog2.f32 %v2692_v8  ;;  %v4606_v37 = vpop.eup %4605  ;;  %v2670_v24 = vmul.f32 %v6089_v16, %v2669_v5  ;;  %v2574_v11 = vmul.f32 1.442695, %v2533_v27  ;;  %v6999_v63 = vmax.f32 %v5976_v42, 0.0 }
 0x2b0   : > { %v6127_v56 = vpop.f32.mrb[65].mxu1  ;;  %v2972_v35 = vpack.c.bf16 %v2941_v36, %v2940_v46  ;;  %4613 = vpow2.f32 %v2578_v0  ;;  %v2685_v12 = vmul.f32 0.6931472, %v4606_v37  ;;  %v6157_v41 = vadd.f32 %v5994_v31, %v5923_v17 }
 0x2b1   : > { %v6133_v62 = vpop.f32.mrb[66].mxu1  ;;  %v2912_v34 = vadd.f32 %v2664_v1, %v6999_v63  ;;  %v6161_v51 = vadd.f32 %v5923_v17, %v6001_v33  ;;  %v6165_v7 = vadd.f32 %v6007_v20, %v5923_v17  ;;  %4615 = vpow2.f32 %v2574_v11 }
 0x2b2   : > { %v6137_v50 = vpop.f32.mrb[67].mxu1  ;;  %v4608_v55 = vpop.eup %4607  ;;  %4284 = vmatprep.mubr.msk.bf16.mxu0 %vm742_vm3, %v2972_v35  ;;  %v2691_v42 = vsel %vm6141_vm1, %v2688_v60, %v2685_v12  ;;  %v6174_v31 = vadd.f32 %v5923_v17, %v6016_v19  ;;  %v7000_v20 = vmax.f32 %v5984_v28, 0.0  ;;  %vm2672_vm2 = vcmp.lt.f32.partialorder %v2671_v10, 0.0004427343 }
 0x2b3   : > { %v2667_v0 = vmul.f32 0.6931472, %v4608_v55  ;;  %4285 = vmatmul.mubr.msk.bf16.vlgmr.msra.gmra.mrb[28].mxu0 %vm742_vm3, %v2973_v43  ;;  %v2714_v48 = vadd.f32 1.0, %v2713_v61  ;;  %v2506_v59 = vand.u32 2147483647, %v6157_v41  ;;  %v2695_v8 = vmul.f32 -0.5, %v6129_v30 }
 0x2b4   : > { %v2915_v9 = vadd.f32 %v2691_v42, %v7000_v20  ;;  %v2504_v46 = vand.u32 2147483647, %v6161_v51  ;;  %v2507_v19 = vand.u32 2147483647, %v6165_v7  ;;  %v2946_v43 = vadd.f32 -0.6931472, %v2914_v2  ;;  %v4610_v10 = vpop.eup %4609 }
 0x2b5   : > { %v2673_v5 = vsel %vm2672_vm2, %v2670_v24, %v2667_v0  ;;  %v7001_v28 = vmax.f32 %v5987_v23, 0.0  ;;  %v2538_v1 = vsub.f32 0.0, %v2506_v59  ;;  %v2944_v27 = vadd.f32 -0.6931472, %v2912_v34 }
 0x2b6   : > { %v2947_v38 = vadd.f32 -0.6931472, %v2915_v9  ;;  %v2536_v37 = vsub.f32 0.0, %v2504_v46  ;;  %v2539_v35 = vsub.f32 0.0, %v2507_v19  ;;  %v2505_v60 = vand.u32 2147483647, %v6174_v31 }
 0x2b7   : > { %v6168_v16 = vpop.f32.mrb[68].mxu1  ;;  %v2913_v47 = vadd.f32 %v2673_v5, %v7001_v28  ;;  %v2584_v12 = vmul.f32 1.442695, %v2538_v1  ;;  %v6194_v24 = vadd.f32 %v6028_v49, %v5923_v17  ;;  %v2716_v2 = vand.u32 2147483647, %v6099_v40 }
 0x2b8   : > { %v6177_v33 = vpop.f32.mrb[69].mxu1  ;;  %v2975_v61 = vpack.c.bf16 %v2947_v38, %v2946_v43  ;;  %v2696_v55 = vadd.f32 1.0, %v2695_v8  ;;  %v2580_v23 = vmul.f32 1.442695, %v2536_v37  ;;  %v2537_v63 = vsub.f32 0.0, %v2505_v60 }
 0x2b9   : > { %v6182_v32 = vpop.f32.mrb[70].mxu1  ;;  %v2945_v18 = vadd.f32 -0.6931472, %v2913_v47  ;;  %v4612_v11 = vpop.eup %4611  ;;  %v2712_v34 = vmul.f32 0.6931472, %v4610_v10  ;;  %4617 = vpow2.f32 %v2584_v12  ;;  %v7002_v9 = vrot.slane %v5998_v45, 2 }
 0x2ba   : > { %v6187_v36 = vpop.f32.mrb[71].mxu1  ;;  %v4614_v42 = vpop.eup %4613  ;;  %v2586_v20 = vmul.f32 1.442695, %v2539_v35  ;;  %v2715_v5 = vmul.f32 %v6099_v40, %v2714_v48  ;;  %v2698_v49 = vand.u32 2147483647, %v6129_v30  ;;  %4619 = vpow2.f32 %v2580_v23 }
 0x2bb   : > { %v2974_v0 = vpack.c.bf16 %v2945_v18, %v2944_v27  ;;  %v6200_v59 = vadd.f32 %v7002_v9, %v5998_v45  ;;  %v2719_v46 = vadd.f32 1.0, %v4614_v42  ;;  %v2694_v19 = vmul.f32 0.6931472, %v4612_v11  ;;  %v4616_v38 = vpop.eup %4615 }
 0x2bc   : > { %v2582_v8 = vmul.f32 1.442695, %v2537_v63  ;;  %v2510_v43 = vand.u32 2147483647, %v6194_v24  ;;  %v2470_v28 = vmax.f32 %v5990_v13, 0.0  ;;  %v2468_v45 = vmax.f32 %v6014_v25, 0.0 }
 0x2bd   : > { %4288 = vmatprep.mubr.msk.bf16.mxu0 %vm742_vm3, %v2974_v0  ;;  %vm6207_vm10 = vcmp.lt.f32.partialorder %v2716_v2, 0.0004427343  ;;  %4621 = vlog2.f32 %v2719_v46  ;;  %v2697_v48 = vmul.f32 %v6129_v30, %v2696_v55  ;;  %v2701_v1 = vadd.f32 1.0, %v4616_v38 }
 0x2be   : > { %4289 = vmatmul.mubr.msk.bf16.gmra.mrb[32].mxu0 %vm742_vm3, %v2975_v61  ;;  %v2718_v40 = vsel %vm6207_vm10, %v2715_v5, %v2712_v34  ;;  %4623 = vpow2.f32 %v2586_v20  ;;  %vm6216_vm11 = vcmp.lt.f32.partialorder %v2698_v49, 0.0004427343  ;;  %v2722_v13 = vmul.f32 -0.5, %v4614_v42 }
 0x2bf   : > { %4625 = vpow2.f32 %v2582_v8  ;;  %v2542_v27 = vsub.f32 0.0, %v2510_v43  ;;  %v2700_v25 = vsel %vm6216_vm11, %v2697_v48, %v2694_v19  ;;  %v2471_v37 = vmax.f32 %v6042_v58, 0.0 }
 0x2c0   : > { %4627 = vlog2.f32 %v2701_v1  ;;  %v6225_v35 = vadd.f32 %v5923_v17, %v6032_v26  ;;  %v2918_v30 = vadd.f32 %v2718_v40, %v2470_v28  ;;  %v2469_v60 = vmax.f32 %v6085_v4, 0.0 }
 0x2c1   : > { %v2704_v61 = vmul.f32 -0.5, %v4616_v38  ;;  %v2592_v18 = vmul.f32 1.442695, %v2542_v27  ;;  %v2725_v12 = vand.u32 2147483647, %v4614_v42  ;;  %v2474_v11 = vmax.f32 %v6157_v41, 0.0 }
 0x2c2   : > { %v2472_v2 = vmax.f32 %v6161_v51, 0.0  ;;  %v2508_v55 = vand.u32 2147483647, %v6225_v35  ;;  %v2916_v23 = vadd.f32 %v2700_v25, %v2468_v45  ;;  %v2723_v63 = vadd.f32 1.0, %v2722_v13 }
 0x2c3   : > { %v2475_v58 = vmax.f32 %v6165_v7, 0.0  ;;  %4629 = vpow2.f32 %v2592_v18  ;;  %v4618_v0 = vpop.eup %4617  ;;  %v2707_v26 = vand.u32 2147483647, %v4616_v38  ;;  %v2473_v34 = vmax.f32 %v6174_v31, 0.0 }
 0x2c4   : > { %v2540_v20 = vsub.f32 0.0, %v2508_v55  ;;  %v6235_v4 = vadd.f32 %v6036_v44, %v5923_v17  ;;  %v6237_v9 = vadd.f32 -0.6931472, %v2918_v30  ;;  %v2705_v5 = vadd.f32 1.0, %v2704_v61  ;;  %v6243_v19 = vpop.eup %4619 }
 0x2c5   : > { %v2746_v49 = vadd.f32 1.0, %v4618_v0  ;;  %v6241_v46 = vadd.f32 %v5923_v17, %v6044_v52  ;;  %vm6245_vm12 = vcmp.lt.f32.partialorder %v2725_v12, 0.0004427343  ;;  %v2749_v43 = vmul.f32 -0.5, %v4618_v0 }
 0x2c6   : > { %v2588_v28 = vmul.f32 1.442695, %v2540_v20  ;;  %v6251_v44 = vadd.f32 %v6063_v22, %v5923_v17  ;;  %v6253_v45 = vadd.f32 -0.6931472, %v2916_v23  ;;  %v2724_v40 = vmul.f32 %v4614_v42, %v2723_v63 }
 0x2c7   : > { %v4622_v47 = vpop.eup %4621  ;;  %4631 = vlog2.f32 %v2746_v49  ;;  %v2728_v52 = vadd.f32 1.0, %v6243_v19  ;;  %vm6258_vm13 = vcmp.lt.f32.partialorder %v2707_v26, 0.0004427343  ;;  %v2511_v13 = vand.u32 2147483647, %v6235_v4 }
 0x2c8   : > { %v6256_v48 = vpop.eup %4623  ;;  %v2721_v1 = vmul.f32 0.6931472, %v4622_v47  ;;  %4633 = vpow2.f32 %v2588_v28  ;;  %v2706_v22 = vmul.f32 %v4616_v38, %v2705_v5  ;;  %v2509_v42 = vand.u32 2147483647, %v6241_v46 }
 0x2c9   : > { %v6263_v27 = vpop.eup %4625  ;;  %4635 = vlog2.f32 %v2728_v52  ;;  %v2755_v25 = vadd.f32 1.0, %v6256_v48  ;;  %v2750_v18 = vadd.f32 1.0, %v2749_v43  ;;  %v2752_v12 = vand.u32 2147483647, %v4618_v0 }
 0x2ca   : > { %v4628_v30 = vpop.eup %4627  ;;  %v2727_v61 = vsel %vm6245_vm12, %v2724_v40, %v2721_v1  ;;  %v2514_v55 = vand.u32 2147483647, %v6251_v44  ;;  %v2731_v26 = vmul.f32 -0.5, %v6243_v19  ;;  %v2734_v38 = vand.u32 2147483647, %v6243_v19 }
 0x2cb   : > { %v2919_v23 = vadd.f32 %v2727_v61, %v2471_v37  ;;  %v2703_v63 = vmul.f32 0.6931472, %v4628_v30  ;;  %4637 = vlog2.f32 %v2755_v25  ;;  %v2737_v20 = vadd.f32 1.0, %v6263_v27 }
 0x2cc   : > { %v2543_v5 = vsub.f32 0.0, %v2511_v13  ;;  %v6275_v49 = vadd.f32 %v5923_v17, %v6071_v15  ;;  %v2758_v37 = vmul.f32 -0.5, %v6256_v48  ;;  %v2541_v47 = vsub.f32 0.0, %v2509_v42 }
 0x2cd   : > { %v6277_v8 = vpop.eup %4629  ;;  %v2951_v43 = vadd.f32 -0.6931472, %v2919_v23  ;;  %v2709_v28 = vsel %vm6258_vm13, %v2706_v22, %v2703_v63  ;;  %4639 = vlog2.f32 %v2737_v20  ;;  %v2546_v1 = vsub.f32 0.0, %v2514_v55 }
 0x2ce   : > { %v2917_v40 = vadd.f32 %v2709_v28, %v2469_v60  ;;  %v2782_v52 = vadd.f32 1.0, %v6277_v8  ;;  %v2751_v25 = vmul.f32 %v4618_v0, %v2750_v18  ;;  %vm6284_vm14 = vcmp.lt.f32.partialorder %v2752_v12, 0.0004427343 }
 0x2cf   : > { %v2977_v13 = vpack.c.bf16 %v2951_v43, %v6237_v9  ;;  %v2732_v30 = vadd.f32 1.0, %v2731_v26  ;;  %vm6288_vm15 = vcmp.lt.f32.partialorder %v2734_v38, 0.0004427343  ;;  %v2594_v22 = vmul.f32 1.442695, %v2543_v5 }
 0x2d0   : > { %v2949_v61 = vadd.f32 -0.6931472, %v2917_v40  ;;  %4641 = vlog2.f32 %v2782_v52  ;;  %v2759_v42 = vadd.f32 1.0, %v2758_v37  ;;  %v2761_v23 = vand.u32 2147483647, %v6256_v48 }
 0x2d1   : > { %v4632_v60 = vpop.eup %4631  ;;  %v2740_v55 = vmul.f32 -0.5, %v6263_v27  ;;  %v2590_v9 = vmul.f32 1.442695, %v2541_v47  ;;  %4643 = vpow2.f32 %v2594_v22  ;;  %v2600_v63 = vmul.f32 1.442695, %v2546_v1 }
 0x2d2   : > { %v6294_v0 = vpop.eup %4633  ;;  %v2976_v18 = vpack.c.bf16 %v2949_v61, %v6253_v45  ;;  %v2748_v12 = vmul.f32 0.6931472, %v4632_v60  ;;  %v2743_v38 = vand.u32 2147483647, %v6263_v27  ;;  %v2785_v20 = vmul.f32 -0.5, %v6277_v8 }
 0x2d3   : > { %v4636_v26 = vpop.eup %4635  ;;  %v2764_v5 = vadd.f32 1.0, %v6294_v0  ;;  %v6302_v43 = vadd.f32 %v6079_v14, %v5923_v17  ;;  %4645 = vpow2.f32 %v2590_v9  ;;  %v2512_v45 = vand.u32 2147483647, %v6275_v49 }
 0x2d4   : > { %v2754_v28 = vsel %vm6284_vm14, %v2751_v25, %v2748_v12  ;;  %v2730_v37 = vmul.f32 0.6931472, %v4636_v26  ;;  %4292 = vmatprep.mubr.msk.bf16.mxu0 %vm742_vm3, %v2976_v18  ;;  %v2733_v40 = vmul.f32 %v6243_v19, %v2732_v30  ;;  %v2760_v52 = vmul.f32 %v6256_v48, %v2759_v42 }
 0x2d5   : > { %v4638_v47 = vpop.eup %4637  ;;  %v2741_v1 = vadd.f32 1.0, %v2740_v55  ;;  %4647 = vlog2.f32 %v2764_v5  ;;  %4293 = vmatmul.mubr.msk.bf16.gmra.mrb[36].mxu0 %vm742_vm3, %v2977_v13  ;;  %v2922_v14 = vadd.f32 %v2754_v28, %v2474_v11  ;;  %v2544_v25 = vsub.f32 0.0, %v2512_v45 }
 0x2d6   : > { %v2757_v15 = vmul.f32 0.6931472, %v4638_v47  ;;  %4649 = vpow2.f32 %v2600_v63  ;;  %v2736_v61 = vsel %vm6288_vm15, %v2733_v40, %v2730_v37  ;;  %vm2762_vm1 = vcmp.lt.f32.partialorder %v2761_v23, 0.0004427343 }
 0x2d7   : > { %vm6315_vm2 = vcmp.lt.f32.partialorder %v2743_v38, 0.0004427343  ;;  %v2786_v19 = vadd.f32 1.0, %v2785_v20  ;;  %v4640_v48 = vpop.eup %4639  ;;  %v2596_v60 = vmul.f32 1.442695, %v2544_v25  ;;  %v6322_v41 = vadd.f32 %v5923_v17, %v6087_v54 }
 0x2d8   : > { %v2763_v30 = vsel %vm2762_vm1, %v2760_v52, %v2757_v15  ;;  %v2515_v13 = vand.u32 2147483647, %v6302_v43  ;;  %v2739_v10 = vmul.f32 0.6931472, %v4640_v48  ;;  %v2742_v42 = vmul.f32 %v6263_v27, %v2741_v1 }
 0x2d9   : > { %v2923_v11 = vadd.f32 %v2763_v30, %v2475_v58  ;;  %v2788_v23 = vand.u32 2147483647, %v6277_v8  ;;  %v2954_v9 = vadd.f32 -0.6931472, %v2922_v14  ;;  %v2920_v18 = vadd.f32 %v2736_v61, %v2472_v2 }
 0x2da   : > { %v4642_v55 = vpop.eup %4641  ;;  %4651 = vpow2.f32 %v2596_v60  ;;  %v2547_v12 = vsub.f32 0.0, %v2515_v13  ;;  %v2745_v54 = vsel %vm6315_vm2, %v2742_v42, %v2739_v10  ;;  %v2513_v7 = vand.u32 2147483647, %v6322_v41 }
 0x2db   : > { %v2955_v63 = vadd.f32 -0.6931472, %v2923_v11  ;;  %v2784_v26 = vmul.f32 0.6931472, %v4642_v55  ;;  %v4644_v58 = vpop.eup %4643  ;;  %v2921_v27 = vadd.f32 %v2745_v54, %v2473_v34  ;;  %v2787_v38 = vmul.f32 %v6277_v8, %v2786_v19 }
 0x2dc   : > { %v2602_v20 = vmul.f32 1.442695, %v2547_v12  ;;  %v6338_v51 = vadd.f32 %v6118_v21, %v5923_v17  ;;  %vm6340_vm10 = vcmp.lt.f32.partialorder %v2788_v23, 0.0004427343  ;;  %v2767_v28 = vmul.f32 -0.5, %v6294_v0 }
 0x2dd   : > { %v2979_v2 = vpack.c.bf16 %v2955_v63, %v2954_v9  ;;  %v2791_v37 = vadd.f32 1.0, %v4644_v58  ;;  %v4646_v45 = vpop.eup %4645  ;;  %v2952_v47 = vadd.f32 -0.6931472, %v2920_v18  ;;  %v2953_v40 = vadd.f32 -0.6931472, %v2921_v27 }
 0x2de   : > { %v2790_v31 = vsel %vm6340_vm10, %v2787_v38, %v2784_v26  ;;  %4653 = vpow2.f32 %v2602_v20  ;;  %v2478_v8 = vmax.f32 %v6194_v24, 0.0  ;;  %v2773_v21 = vadd.f32 1.0, %v4646_v45 }
 0x2df   : > { %v4648_v34 = vpop.eup %4647  ;;  %4655 = vlog2.f32 %v2791_v37  ;;  %v2545_v52 = vsub.f32 0.0, %v2513_v7  ;;  %v2102_v14 = vrot.slane %v6200_v59, 1  ;;  %v2978_v15 = vpack.c.bf16 %v2953_v40, %v2952_v47 }
 0x2e0   : > { %v6348_v1 = vpop.eup %4649  ;;  %v2794_v25 = vmul.f32 -0.5, %v4644_v58  ;;  %v2518_v61 = vand.u32 2147483647, %v6338_v51  ;;  %v2926_v22 = vadd.f32 %v2790_v31, %v2478_v8  ;;  %v2768_v19 = vadd.f32 1.0, %v2767_v28 }
 0x2e1   : > { %v2770_v48 = vand.u32 2147483647, %v6294_v0  ;;  %4657 = vlog2.f32 %v2773_v21  ;;  %v2476_v30 = vmax.f32 %v6225_v35, 0.0  ;;  %v2479_v24 = vmax.f32 %v6235_v4, 0.0  ;;  %4296 = vmatprep.mubr.msk.bf16.mxu0 %vm742_vm3, %v2978_v15 }
 0x2e2   : > { %v2776_v60 = vmul.f32 -0.5, %v4646_v45  ;;  %v2818_v13 = vadd.f32 1.0, %v6348_v1  ;;  %v2766_v11 = vmul.f32 0.6931472, %v4648_v34  ;;  %v2477_v10 = vmax.f32 %v6241_v46, 0.0  ;;  %4297 = vmatmul.mubr.msk.bf16.gmra.mrb[40].mxu0 %vm742_vm3, %v2979_v2 }
 0x2e3   : > { %v2482_v42 = vmax.f32 %v6251_v44, 0.0  ;;  %v2598_v23 = vmul.f32 1.442695, %v2545_v52  ;;  %v2795_v9 = vadd.f32 1.0, %v2794_v25  ;;  %v2797_v18 = vand.u32 2147483647, %v4644_v58 }
 0x2e4   : > { %v6360_v55 = vpop.eup %4651  ;;  %4659 = vlog2.f32 %v2818_v13  ;;  %v2550_v35 = vsub.f32 0.0, %v2518_v61  ;;  %v6362_v4 = vadd.f32 -0.6931472, %v2926_v22  ;;  %v2769_v12 = vmul.f32 %v6294_v0, %v2768_v19 }
 0x2e5   : > { %vm6365_vm11 = vcmp.lt.f32.partialorder %v2770_v48, 0.0004427343  ;;  %v2800_v46 = vadd.f32 1.0, %v6360_v55  ;;  %v2777_v54 = vadd.f32 1.0, %v2776_v60  ;;  %4661 = vpow2.f32 %v2598_v23  ;;  %v6409_v23 = vld [vmem:[%s6860_s11] ss:$0 sm:$0xff] }
 0x2e6   : > { %v2608_v26 = vmul.f32 1.442695, %v2550_v35  ;;  %v6372_v7 = vadd.f32 %v5923_v17, %v6127_v56  ;;  %v2772_v27 = vsel %vm6365_vm11, %v2769_v12, %v2766_v11  ;;  %v2779_v38 = vand.u32 2147483647, %v4646_v45 }
 0x2e7   : > { %4663 = vlog2.f32 %v2800_v46  ;;  %v6378_v0 = vadd.f32 %v6133_v62, %v5923_v17  ;;  %v2796_v2 = vmul.f32 %v4644_v58, %v2795_v9  ;;  %vm6382_vm12 = vcmp.lt.f32.partialorder %v2797_v18, 0.0004427343 }
 0x2e8   : > { %v6380_v20 = vpop.eup %4653  ;;  %4665 = vpow2.f32 %v2608_v26  ;;  %v2516_v56 = vand.u32 2147483647, %v6372_v7  ;;  %v2821_v37 = vmul.f32 -0.5, %v6348_v1  ;;  %v2824_v47 = vand.u32 2147483647, %v6348_v1 }
 0x2e9   : > { %v4656_v28 = vpop.eup %4655  ;;  %v2827_v40 = vadd.f32 1.0, %v6380_v20  ;;  %v6392_v62 = vadd.f32 %v5923_v17, %v6137_v50  ;;  %v2924_v31 = vadd.f32 %v2772_v27, %v2476_v30  ;;  %v2519_v8 = vand.u32 2147483647, %v6378_v0 }
 0x2ea   : > { %v2793_v58 = vmul.f32 0.6931472, %v4656_v28  ;;  %v2548_v34 = vsub.f32 0.0, %v2516_v56  ;;  %v2778_v52 = vmul.f32 %v4646_v45, %v2777_v54  ;;  %vm6395_vm13 = vcmp.lt.f32.partialorder %v2779_v38, 0.0004427343 }
 0x2eb   : > { %v4658_v21 = vpop.eup %4657  ;;  %v2803_v25 = vmul.f32 -0.5, %v6360_v55  ;;  %4667 = vlog2.f32 %v2827_v40  ;;  %v2551_v50 = vsub.f32 0.0, %v2519_v8  ;;  %v2822_v48 = vadd.f32 1.0, %v2821_v37 }
 0x2ec   : > { %v2799_v61 = vsel %vm6382_vm12, %v2796_v2, %v2793_v58  ;;  %v2775_v22 = vmul.f32 0.6931472, %v4658_v21  ;;  %v2604_v17 = vmul.f32 1.442695, %v2548_v34  ;;  %v2830_v30 = vmul.f32 -0.5, %v6380_v20 }
 0x2ed   : > { %v2927_v19 = vadd.f32 %v2799_v61, %v2479_v24  ;;  %v2517_v60 = vand.u32 2147483647, %v6392_v62  ;;  %v2610_v11 = vmul.f32 1.442695, %v2551_v50  ;;  %v6413_v9 = vadd.f32 %v6409_v23, %v6168_v16 }
 0x2ee   : > { %v4660_v45 = vpop.eup %4659  ;;  %v2781_v13 = vsel %vm6395_vm13, %v2778_v52, %v2775_v22  ;;  %4669 = vpow2.f32 %v2604_v17  ;;  %v2956_v24 = vadd.f32 -0.6931472, %v2924_v31  ;;  %vm6415_vm14 = vcmp.lt.f32.partialorder %v2824_v47, 0.0004427343 }
 0x2ef   : > { %v2959_v18 = vadd.f32 -0.6931472, %v2927_v19  ;;  %v2925_v35 = vadd.f32 %v2781_v13, %v2477_v10  ;;  %v6419_v63 = vpop.eup %4661  ;;  %v2820_v46 = vmul.f32 0.6931472, %v4660_v45  ;;  %v2804_v54 = vadd.f32 1.0, %v2803_v25 }
 0x2f0   : > { %v2806_v26 = vand.u32 2147483647, %v6360_v55  ;;  %4671 = vpow2.f32 %v2610_v11  ;;  %v2831_v16 = vadd.f32 1.0, %v2830_v30  ;;  %v2809_v5 = vadd.f32 1.0, %v6419_v63 }
 0x2f1   : > { %v4664_v27 = vpop.eup %4663  ;;  %v2981_v38 = vpack.c.bf16 %v2959_v18, %v6362_v4  ;;  %v2957_v2 = vadd.f32 -0.6931472, %v2925_v35  ;;  %v2823_v10 = vmul.f32 %v6348_v1, %v2822_v48  ;;  %v2833_v28 = vand.u32 2147483647, %v6380_v20 }
 0x2f2   : > { %v6424_v56 = vpop.eup %4665  ;;  %v2549_v37 = vsub.f32 0.0, %v2517_v60  ;;  %v2522_v47 = vand.u32 2147483647, %v6413_v9  ;;  %4673 = vlog2.f32 %v2809_v5  ;;  %v6432_v4 = vadd.f32 %v6409_v23, %v6177_v33 }
 0x2f3   : > { %v2980_v40 = vpack.c.bf16 %v2957_v2, %v2956_v24  ;;  %v2854_v31 = vadd.f32 1.0, %v6424_v56  ;;  %v2826_v58 = vsel %vm6415_vm14, %v2823_v10, %v2820_v46  ;;  %v2480_v34 = vmax.f32 %v6275_v49, 0.0 }
 0x2f4   : > { %vm6437_vm15 = vcmp.lt.f32.partialorder %v2806_v26, 0.0004427343  ;;  %v2483_v8 = vmax.f32 %v6302_v43, 0.0  ;;  %v2802_v52 = vmul.f32 0.6931472, %v4664_v27  ;;  %v2805_v15 = vmul.f32 %v6360_v55, %v2804_v54 }
 0x2f5   : > { %v4668_v21 = vpop.eup %4667  ;;  %v2832_v25 = vmul.f32 %v6380_v20, %v2831_v16  ;;  %4675 = vlog2.f32 %v2854_v31  ;;  %4300 = vmatprep.mubr.msk.bf16.mxu0 %vm742_vm3, %v2980_v40  ;;  %v2812_v61 = vmul.f32 -0.5, %v6419_v63  ;;  %v2606_v22 = vmul.f32 1.442695, %v2549_v37 }
 0x2f6   : > { %v2829_v33 = vmul.f32 0.6931472, %v4668_v21  ;;  %v2554_v49 = vsub.f32 0.0, %v2522_v47  ;;  %4301 = vmatmul.mubr.msk.bf16.gmra.mrb[44].mxu0 %vm742_vm3, %v2981_v38  ;;  %v2930_v17 = vadd.f32 %v2826_v58, %v2482_v42  ;;  %vm2834_vm1 = vcmp.lt.f32.partialorder %v2833_v28, 0.0004427343 }
 0x2f7   : > { %v2815_v43 = vand.u32 2147483647, %v6419_v63  ;;  %v2520_v55 = vand.u32 2147483647, %v6432_v4  ;;  %4677 = vpow2.f32 %v2606_v22  ;;  %v6455_v48 = vadd.f32 %v6409_v23, %v6182_v32 }
 0x2f8   : > { %v6451_v50 = vpop.eup %4669  ;;  %v2835_v20 = vsel %vm2834_vm1, %v2832_v25, %v2829_v33  ;;  %v2616_v19 = vmul.f32 1.442695, %v2554_v49  ;;  %v2808_v30 = vsel %vm6437_vm15, %v2805_v15, %v2802_v52  ;;  %v2857_v44 = vmul.f32 -0.5, %v6424_v56  ;;  %v7044_v33 = vld [vmem:[#allocation16_spill] sm:$0xff] }
 0x2f9   : > { %v2931_v60 = vadd.f32 %v2835_v20, %v2483_v8  ;;  %v2836_v42 = vadd.f32 1.0, %v6451_v50  ;;  %v2813_v13 = vadd.f32 1.0, %v2812_v61  ;;  %v2552_v11 = vsub.f32 0.0, %v2520_v55 }
 0x2fa   : > { %v6461_v45 = vpop.eup %4671  ;;  %4679 = vpow2.f32 %v2616_v19  ;;  %v2523_v24 = vand.u32 2147483647, %v6455_v48  ;;  %v6467_v32 = vadd.f32 %v2102_v14, %v6200_v59  ;;  %v6469_v18 = vadd.f32 -0.6931472, %v2930_v17 }
 0x2fb   : > { %v2963_v35 = vadd.f32 -0.6931472, %v2931_v60  ;;  %v2481_v12 = vmax.f32 %v6322_v41, 0.0  ;;  %v2928_v46 = vadd.f32 %v2808_v30, %v2480_v34  ;;  %vm6472_vm2 = vcmp.lt.f32.partialorder %v2815_v43, 0.0004427343 }
 0x2fc   : > { %v2863_v26 = vadd.f32 1.0, %v6461_v45  ;;  %v2612_v27 = vmul.f32 1.442695, %v2552_v11  ;;  %v4674_v38 = vpop.eup %4673  ;;  %4681 = vlog2.f32 %v2836_v42  ;;  %v2555_v16 = vsub.f32 0.0, %v2523_v24 }
 0x2fd   : > { %v2983_v2 = vpack.c.bf16 %v2963_v35, %v6469_v18  ;;  %v6480_v59 = vadd.f32 %v6409_v23, %v6187_v36  ;;  %v2811_v14 = vmul.f32 0.6931472, %v4674_v38  ;;  %v2814_v41 = vmul.f32 %v6419_v63, %v2813_v13 }
 0x2fe   : > { %v2858_v5 = vadd.f32 1.0, %v2857_v44  ;;  %4683 = vlog2.f32 %v2863_v26  ;;  %v2860_v28 = vand.u32 2147483647, %v6424_v56  ;;  %v2618_v37 = vmul.f32 1.442695, %v2555_v16 }
 0x2ff   : > { %v4676_v10 = vpop.eup %4675  ;;  %4685 = vpow2.f32 %v2612_v27  ;;  %v2521_v47 = vand.u32 2147483647, %v6480_v59  ;;  %v2817_v40 = vsel %vm6472_vm2, %v2814_v41, %v2811_v14  ;;  %v2866_v58 = vmul.f32 -0.5, %v6461_v45 }
 0x300   : > { %v2856_v31 = vmul.f32 0.6931472, %v4676_v10  ;;  %v3547_v36 = vsel %vm3538_vm8, %v5902_v57, %v5879_v6  ;;  %v2929_v23 = vadd.f32 %v2817_v40, %v2481_v12  ;;  %4687 = vpow2.f32 %v2618_v37  ;;  %v7038_v40 = vld [vmem:[#allocation17_spill] sm:$0xff] }
 0x301   : > { %v2553_v63 = vsub.f32 0.0, %v2521_v47  ;;  %v6493_v34 = vsel %vm3540_vm9, %v5915_v29, %v3547_v36  ;;  %v4678_v1 = vpop.eup %4677  ;;  %v2960_v8 = vadd.f32 -0.6931472, %v2928_v46  ;;  %v2486_v21 = vmax.f32 %v6338_v51, 0.0 }
 0x302   : > { %v2859_v52 = vmul.f32 %v6424_v56, %v2858_v5  ;;  %v3631_v15 = vpack.c.bf16 %v6493_v34, %v5824_v3  ;;  %v2961_v25 = vadd.f32 -0.6931472, %v2929_v23  ;;  %vm6499_vm10 = vcmp.lt.f32.partialorder %v2860_v28, 0.0004427343  ;;  %v7040_v23 = vld [vmem:[#allocation13_spill] sm:$0xff] }
 0x303   : > { %v2839_v6 = vmul.f32 -0.5, %v6451_v50  ;;  %v2845_v57 = vadd.f32 1.0, %v4678_v1  ;;  %v2842_v51 = vand.u32 2147483647, %v6451_v50  ;;  %v2848_v22 = vmul.f32 -0.5, %v4678_v1 }
 0x304   : > { %v6504_v61 = vpop.eup %4679  ;;  %v2862_v29 = vsel %vm6499_vm10, %v2859_v52, %v2856_v31  ;;  %v2614_v56 = vmul.f32 1.442695, %v2553_v63  ;;  %v2982_v49 = vpack.c.bf16 %v2961_v25, %v2960_v8  ;;  %v2867_v17 = vadd.f32 1.0, %v2866_v58 }
 0x305   : > { %4689 = vlog2.f32 %v2845_v57  ;;  %v7033_v43 = vrot.slane %v5909_v53, 2  ;;  %v2484_v20 = vmax.f32 %v6372_v7, 0.0  ;;  %v2487_v19 = vmax.f32 %v6378_v0, 0.0  ;;  %v7045_v57 = vld [vmem:[#allocation10_spill] sm:$0xff] }
 0x306   : > { %v2869_v30 = vand.u32 2147483647, %v6461_v45  ;;  %v2890_v60 = vadd.f32 1.0, %v6504_v61  ;;  %v4682_v44 = vpop.eup %4681  ;;  %v2934_v42 = vadd.f32 %v2862_v29, %v2486_v21  ;;  %v2840_v13 = vadd.f32 1.0, %v2839_v6  ;;  %4304 = vmatprep.mubr.msk.bf16.mxu0 %vm742_vm3, %v2982_v49  ;;  %v7042_v21 = vld [vmem:[#allocation15_spill] sm:$0xff] }
 0x307   : > { %v2041_v55 = vadd.f32 %v7033_v43, %v5909_v53  ;;  %4691 = vpow2.f32 %v2614_v56  ;;  %v2036_v11 = vrot.slane %v5929_v39, 1  ;;  %v2485_v18 = vmax.f32 %v6392_v62, 0.0  ;;  %4305 = vmatmul.mubr.msk.bf16.gmra.mrb[48].mxu0 %vm742_vm3, %v2983_v2 }
 0x308   : > { %v4684_v24 = vpop.eup %4683  ;;  %v2849_v53 = vadd.f32 1.0, %v2848_v22  ;;  %v2851_v35 = vand.u32 2147483647, %v4678_v1  ;;  %4693 = vlog2.f32 %v2890_v60  ;;  %vm6522_vm11 = vcmp.lt.f32.partialorder %v2842_v51, 0.0004427343  ;;  %v7048_v60 = vld [vmem:[#allocation12_spill] sm:$0xff] }
 0x309   : > { %v6520_v7 = vpop.eup %4685  ;;  %v2865_v12 = vmul.f32 0.6931472, %v4684_v24  ;;  %v2868_v46 = vmul.f32 %v6461_v45, %v2867_v17  ;;  %v2042_v54 = vrot.slane %v2041_v55, 1  ;;  %v2838_v26 = vmul.f32 0.6931472, %v4682_v44 }
 0x30a   : > { %vm2870_vm12 = vcmp.lt.f32.partialorder %v2869_v30, 0.0004427343  ;;  %v2893_v27 = vmul.f32 -0.5, %v6504_v61  ;;  %v2872_v62 = vadd.f32 1.0, %v6520_v7  ;;  %v6529_v38 = vpop.eup %4687  ;;  %v6531_v16 = vadd.f32 -0.6931472, %v2934_v42 }
 0x30b   : > { %v2841_v2 = vmul.f32 %v6451_v50, %v2840_v13  ;;  %v2871_v14 = vsel %vm2870_vm12, %v2868_v46, %v2865_v12  ;;  %v2037_v41 = vadd.f32 %v2036_v11, %v5929_v39  ;;  %v2850_v10 = vmul.f32 %v4678_v1, %v2849_v53  ;;  %v7051_v46 = vld [vmem:[#allocation14_spill] sm:$0xff] }
 0x30c   : > { %v2935_v5 = vadd.f32 %v2871_v14, %v2487_v19  ;;  %vm6535_vm13 = vcmp.lt.f32.partialorder %v2851_v35, 0.0004427343  ;;  %4695 = vlog2.f32 %v2872_v62  ;;  %v2896_v28 = vand.u32 2147483647, %v6504_v61  ;;  %v7052_v62 = vld [vmem:[#allocation9_spill] sm:$0xff] }
 0x30d   : > { %v2899_v37 = vadd.f32 1.0, %v6529_v38  ;;  %v2043_v47 = vadd.f32 %v2042_v54, %v2041_v55  ;;  %v7039_v31 = vrot.slane %v7038_v40, 1  ;;  %v2844_v50 = vsel %vm6522_vm11, %v2841_v2, %v2838_v26  ;;  %v7046_v55 = vld [vmem:[#allocation11_spill] sm:$0xff] }
 0x30e   : > { %v2967_v39 = vadd.f32 -0.6931472, %v2935_v5  ;;  %v2894_v36 = vadd.f32 1.0, %v2893_v27  ;;  %v7041_v63 = vrot.slane %v7040_v23, 2  ;;  %v7043_v52 = vrot.slane %v7042_v21, 1 }
 0x30f   : > { %v2079_v58 = vadd.f32 %v7039_v31, %v7038_v40  ;;  %v4690_v8 = vpop.eup %4689  ;;  %4697 = vlog2.f32 %v2899_v37  ;;  %v2084_v6 = vrot.slane %v7044_v33, 1  ;;  %v3550_v29 = vsel %vm3530_vm4, %v2037_v41, %v7045_v57 }
 0x310   : > { %v2089_v1 = vadd.f32 %v7041_v63, %v7040_v23  ;;  %v2073_v25 = vadd.f32 %v7043_v52, %v7042_v21  ;;  %v2985_v51 = vpack.c.bf16 %v2967_v39, %v6531_v16  ;;  %v2847_v22 = vmul.f32 0.6931472, %v4690_v8  ;;  %v7054_v63 = vld [vmem:[#allocation18_spill] sm:$0xff] }
 0x311   : > { %v3551_v49 = vsel %vm3532_vm5, %v2043_v47, %v3550_v29  ;;  %v6557_v17 = vpop.eup %4691  ;;  %v2932_v43 = vadd.f32 %v2844_v50, %v2484_v20  ;;  %v7047_v19 = vrot.slane %v7046_v55, 1  ;;  %v2875_v24 = vmul.f32 -0.5, %v6520_v7 }
 0x312   : > { %v2090_v56 = vrot.slane %v2089_v1, 1  ;;  %v3552_v44 = vsel %vm3534_vm6, %v7048_v60, %v3551_v49  ;;  %v3556_v42 = vsel %vm3528_vm0, %v2079_v58, %v2073_v25  ;;  %v4694_v13 = vpop.eup %4693  ;;  %v2853_v11 = vsel %vm6535_vm13, %v2850_v10, %v2847_v22  ;;  %v7053_v58 = vld [vmem:[#allocation20_spill] sm:$0xff] }
 0x313   : > { %v2067_v30 = vadd.f32 %v7047_v19, %v7046_v55  ;;  %v2902_v53 = vmul.f32 -0.5, %v6529_v38  ;;  %v2881_v35 = vadd.f32 1.0, %v6557_v17  ;;  %v2933_v20 = vadd.f32 %v2853_v11, %v2485_v18 }
 0x314   : > { %vm6570_vm14 = vcmp.lt.f32.partialorder %v2896_v28, 0.0004427343  ;;  %v2085_v12 = vadd.f32 %v2084_v6, %v7044_v33  ;;  %v3553_v54 = vsel %vm3536_vm7, %v7051_v46, %v3552_v44  ;;  %v2892_v26 = vmul.f32 0.6931472, %v4694_v13  ;;  %v7056_v33 = vld [vmem:[#allocation19_spill] sm:$0xff] }
 0x315   : > { %4699 = vlog2.f32 %v2881_v35  ;;  %v2091_v27 = vadd.f32 %v2090_v56, %v2089_v1  ;;  %v3554_v16 = vsel %vm3538_vm8, %v7052_v62, %v3553_v54  ;;  %v2964_v2 = vadd.f32 -0.6931472, %v2932_v43  ;;  %v4434_v35 = vld [vmem:[%s6863_s14 + $0x8] sm:$0xff]   ;;  %v4439_v62 = vld [vmem:[%s6863_s14 + $0x30] sm:$0xff]  }
 0x316   : > { %v2965_v14 = vadd.f32 -0.6931472, %v2933_v20  ;;  %v6580_v41 = vsel %vm3540_vm9, %v2067_v30, %v3554_v16  ;;  %v3557_v18 = vsel %vm3530_vm4, %v2085_v12, %v3556_v42  ;;  %v4696_v5 = vpop.eup %4695  ;;  %v2895_v10 = vmul.f32 %v6504_v61, %v2894_v36  ;;  %v4440_v16 = vld [vmem:[%s6863_s14 + $0x38] sm:$0xff]  }
 0x317   : > { %v2876_v45 = vadd.f32 1.0, %v2875_v24  ;;  %v2903_v28 = vadd.f32 1.0, %v2902_v53  ;;  %v3558_v37 = vsel %vm3532_vm5, %v2091_v27, %v3557_v18  ;;  %v2905_v40 = vand.u32 2147483647, %v6529_v38  ;;  %v4438_v27 = vld [vmem:[%s6863_s14 + $0x28] sm:$0xff]   ;;  %v4443_v18 = vld [vmem:[%s6863_s14 + $0x50] sm:$0xff]  }
 0x318   : > { %v2984_v47 = vpack.c.bf16 %v2965_v14, %v2964_v2  ;;  %v2884_v31 = vmul.f32 -0.5, %v6557_v17  ;;  %v3559_v50 = vsel %vm3534_vm6, %v7053_v58, %v3558_v37  ;;  %v2898_v39 = vsel %vm6570_vm14, %v2895_v10, %v2892_v26  ;;  %v4437_v26 = vld [vmem:[%s6863_s14 + $0x20] sm:$0xff]   ;;  %v4442_v14 = vld [vmem:[%s6863_s14 + $0x48] sm:$0xff]  }
 0x319   : > { %v2878_v23 = vand.u32 2147483647, %v6520_v7  ;;  %v7055_v61 = vrot.slane %v7054_v63, 1  ;;  %v3560_v1 = vsel %vm3536_vm7, %v6467_v32, %v3559_v50  ;;  %v4698_v8 = vpop.eup %4697  ;;  %v2490_v21 = vmax.f32 %v6413_v9, 0.0  ;;  %v4441_v2 = vld [vmem:[%s6863_s14 + $0x40] sm:$0xff]  }
 0x31a   : > { %v2874_v52 = vmul.f32 0.6931472, %v4696_v5  ;;  %v2491_v25 = vmax.f32 %v6455_v48, 0.0  ;;  %4308 = vmatprep.mubr.msk.bf16.mxu0 %vm742_vm3, %v2984_v47  ;;  %v3561_v6 = vsel %vm3538_vm8, %v7056_v33, %v3560_v1  ;;  %v2877_v57 = vmul.f32 %v6520_v7, %v2876_v45  ;;  %v4444_v5 = vld [vmem:[%s6863_s14 + $0x58] sm:$0xff]   ;;  %v6667_v10 = vld [vmem:[%s6862_s13] ss:$0 sm:$0xff] }
 0x31b   : > { %v2115_v36 = vadd.f32 %v7055_v61, %v7054_v63  ;;  %v2901_v29 = vmul.f32 0.6931472, %v4698_v8  ;;  %v2904_v22 = vmul.f32 %v6529_v38, %v2903_v28  ;;  %4309 = vmatmul.mubr.msk.bf16.gmra.mrb[52].mxu0 %vm742_vm3, %v2985_v51  ;;  %v2938_v56 = vadd.f32 %v2898_v39, %v2490_v21  ;;  %v4433_v38 = vld [vmem:[%s6863_s14] sm:$0xff]  }
 0x31c   : > { %vm2906_vm15 = vcmp.lt.f32.partialorder %v2905_v40, 0.0004427343  ;;  %v2885_v9 = vadd.f32 1.0, %v2884_v31  ;;  %vm6610_vm1 = vcmp.lt.f32.partialorder %v2878_v23, 0.0004427343  ;;  %v4768_v19 = vmov 0  }
 0x31d   : > { %v6606_v32 = vsel %vm3540_vm9, %v2115_v36, %v3561_v6  ;;  %v2907_v43 = vsel %vm2906_vm15, %v2904_v22, %v2901_v29  ;;  %v2887_v7 = vand.u32 2147483647, %v6557_v17  ;;  %v2880_v51 = vsel %vm6610_vm1, %v2877_v57, %v2874_v52  ;;  %3737 = vmatprep.subr.bf16.mxu1 %v4768_v19  ;;  %v3236_v45 = vld [vmem:[%s6662_s18] sm:$0xff] }
 0x31e   : > { %v3633_v48 = vpack.c.bf16 %v6606_v32, %v6580_v41  ;;  %v2939_v55 = vadd.f32 %v2907_v43, %v2491_v25  ;;  %v2488_v60 = vmax.f32 %v6432_v4, 0.0  ;;  %3738 = vmatpush1.bf16.msra.mxu1 %v4433_v38  ;;  %v2970_v44 = vadd.f32 -0.6931472, %v2938_v56 }
 0x31f   : > { %v4700_v30 = vpop.eup %4699  ;;  %v2886_v11 = vmul.f32 %v6557_v17, %v2885_v9  ;;  %3739 = vmatprep.subr.bf16.mxu1 %v4768_v19  ;;  %v2489_v53 = vmax.f32 %v6480_v59, 0.0  ;;  %vm2888_vm2 = vcmp.lt.f32.partialorder %v2887_v7, 0.0004427343  ;;  %v4435_v17 = vld [vmem:[%s6863_s14 + $0x10] sm:$0xff]   ;;  %v4436_v59 = vld [vmem:[%s6863_s14 + $0x18] sm:$0xff]  }
 0x320   : > { %v2971_v42 = vadd.f32 -0.6931472, %v2939_v55  ;;  %v2883_v13 = vmul.f32 0.6931472, %v4700_v30  ;;  %v2936_v24 = vadd.f32 %v2880_v51, %v2488_v60 }
 0x322   : > { %v2987_v20 = vpack.c.bf16 %v2971_v42, %v2970_v44  ;;  %v2889_v0 = vsel %vm2888_vm2, %v2886_v11, %v2883_v13  ;;  %3740 = vmatpush1.bf16.msra.mxu1 %v4434_v35  ;;  %v2968_v4 = vadd.f32 -0.6931472, %v2936_v24 }
 0x323   : > { %v2937_v12 = vadd.f32 %v2889_v0, %v2489_v53  ;;  %3741 = vmatprep.subr.bf16.mxu1 %v4768_v19 }
 0x325   : > { %v2969_v46 = vadd.f32 -0.6931472, %v2937_v12 }
 0x326   : > { %3742 = vmatpush1.bf16.msra.mxu1 %v4435_v17 }
 0x327   : > { %v2986_v54 = vpack.c.bf16 %v2969_v46, %v2968_v4  ;;  %3743 = vmatprep.subr.bf16.mxu1 %v4768_v19 }
 0x329   : > { %4312 = vmatprep.mubr.msk.bf16.mxu0 %vm742_vm3, %v2986_v54 }
 0x32a   : > { %4313 = vmatmul.mubr.msk.bf16.gmra.mrb[56].mxu0 %vm742_vm3, %v2987_v20  ;;  %3744 = vmatpush1.bf16.msra.mxu1 %v4436_v59 }
 0x32b   : > { %3745 = vmatprep.subr.bf16.mxu1 %v4768_v19 }
 0x32e   : > { %3746 = vmatpush1.bf16.msra.mxu1 %v4437_v26 }
 0x32f   : > { %3747 = vmatprep.subr.bf16.mxu1 %v4768_v19 }
 0x332   : > { %3748 = vmatpush1.bf16.msra.mxu1 %v4438_v27 }
 0x333   : > { %3749 = vmatprep.subr.bf16.mxu1 %v4768_v19 }
 0x336   : > { %3750 = vmatpush1.bf16.msra.mxu1 %v4439_v62 }
 0x337   : > { %3751 = vmatprep.subr.bf16.mxu1 %v4768_v19 }
 0x33a   : > { %3752 = vmatpush1.bf16.msra.mxu1 %v4440_v16 }
 0x33b   : > { %3753 = vmatprep.subr.bf16.mxu1 %v4768_v19 }
 0x33e   : > { %3754 = vmatpush1.bf16.msra.mxu1 %v4441_v2 }
 0x33f   : > { %3755 = vmatprep.subr.bf16.mxu1 %v4768_v19 }
 0x342   : > { %3756 = vmatpush1.bf16.msra.mxu1 %v4442_v14 }
 0x343   : > { %3757 = vmatprep.subr.bf16.mxu1 %v4768_v19 }
 0x346   : > { %3758 = vmatpush1.bf16.msra.mxu1 %v4443_v18 }
 0x347   : > { %3759 = vmatprep.subr.bf16.mxu1 %v4768_v19 }
 0x34a   : > { %3760 = vmatpush1.bf16.msra.mxu1 %v4444_v5 }
 0x386   : > { %v4286_v28 = vpop.f32.mrb[28].mxu0 }
 0x387   : > { %v3118_v37 = vadd.f32 %v4286_v28, %v6667_v10  ;;  %v3109_v47 = vpop.f32.mrb[29].mxu0 }
 0x388   : > { %v3110_v40 = vadd.f32 %v6667_v10, %v3109_v47  ;;  %v4287_v31 = vpop.f32.mrb[30].mxu0 }
 0x389   : > { %v3242_v58 = vmul.f32 %v3236_v45, %v3118_v37  ;;  %v3121_v50 = vadd.f32 %v4287_v31, %v6667_v10  ;;  %v3112_v39 = vpop.f32.mrb[31].mxu0 }
 0x38a   : > { %v3240_v23 = vmul.f32 %v3236_v45, %v3110_v40  ;;  %v3113_v63 = vadd.f32 %v6667_v10, %v3112_v39 }
 0x38b   : > { %v3286_v61 = vsel %vm742_vm3, %v3242_v58, 0.0  ;;  %v3243_v36 = vmul.f32 %v3236_v45, %v3121_v50 }
 0x38c   : > { %v3287_v1 = vrot.slane %v3286_v61, 4  ;;  %v3272_v8 = vsel %vm742_vm3, %v3240_v23, 0.0  ;;  %v3241_v21 = vmul.f32 %v3236_v45, %v3113_v63 }
 0x38d   : > { %v3273_v52 = vrot.slane %v3272_v8, 4  ;;  %v3293_v25 = vsel %vm742_vm3, %v3243_v36, 0.0 }
 0x38e   : > { %v3288_v33 = vadd.f32 %v3287_v1, %v3286_v61  ;;  %v3294_v6 = vrot.slane %v3293_v25, 4  ;;  %v3279_v57 = vsel %vm742_vm3, %v3241_v21, 0.0 }
 0x38f   : > { %v3274_v29 = vadd.f32 %v3273_v52, %v3272_v8  ;;  %v3280_v22 = vrot.slane %v3279_v57, 4 }
 0x390   : > { %v3289_v56 = vrot.slane %v3288_v33, 2  ;;  %v3295_v9 = vadd.f32 %v3294_v6, %v3293_v25 }
 0x391   : > { %v4290_v49 = vpop.f32.mrb[32].mxu0  ;;  %v3275_v43 = vrot.slane %v3274_v29, 2  ;;  %v3281_v7 = vadd.f32 %v3280_v22, %v3279_v57 }
 0x392   : > { %v3134_v38 = vadd.f32 %v4290_v49, %v6667_v10  ;;  %v3125_v51 = vpop.f32.mrb[33].mxu0  ;;  %v3290_v55 = vadd.f32 %v3289_v56, %v3288_v33  ;;  %v3296_v19 = vrot.slane %v3295_v9, 2 }
 0x393   : > { %v3126_v30 = vadd.f32 %v6667_v10, %v3125_v51  ;;  %v4291_v60 = vpop.f32.mrb[34].mxu0  ;;  %v3276_v44 = vadd.f32 %v3275_v43, %v3274_v29  ;;  %v3282_v42 = vrot.slane %v3281_v7, 2  ;;  %v3237_v51 = vld [vmem:[%s6662_s18 + $0x8] sm:$0xff] }
 0x394   : > { %v3246_v13 = vmul.f32 %v3236_v45, %v3134_v38  ;;  %v3137_v11 = vadd.f32 %v4291_v60, %v6667_v10  ;;  %v3128_v24 = vpop.f32.mrb[35].mxu0  ;;  %v3297_v53 = vadd.f32 %v3296_v19, %v3295_v9  ;;  %v3291_v17 = vrot.slane %v3290_v55, 1 }
 0x395   : > { %v3244_v35 = vmul.f32 %v3236_v45, %v3126_v30  ;;  %v3129_v20 = vadd.f32 %v6667_v10, %v3128_v24  ;;  %v3277_v0 = vrot.slane %v3276_v44, 1  ;;  %v3283_v12 = vadd.f32 %v3282_v42, %v3281_v7 }
 0x396   : > { %v3314_v4 = vsel %vm742_vm3, %v3246_v13, 0.0  ;;  %v3247_v46 = vmul.f32 %v3236_v45, %v3137_v11  ;;  %v3298_v26 = vrot.slane %v3297_v53, 1  ;;  %v3292_v47 = vadd.f32 %v3291_v17, %v3290_v55 }
 0x397   : > { %v3315_v54 = vrot.slane %v3314_v4, 4  ;;  %v3300_v59 = vsel %vm742_vm3, %v3244_v35, 0.0  ;;  %v3284_v27 = vrot.slane %v3283_v12, 1  ;;  %v3245_v18 = vmul.f32 %v3236_v45, %v3129_v20 }
 0x398   : > { %v3301_v62 = vrot.slane %v3300_v59, 4  ;;  %v3321_v16 = vsel %vm742_vm3, %v3247_v46, 0.0  ;;  %v3278_v5 = vadd.f32 %v3277_v0, %v3276_v44  ;;  %v3299_v50 = vadd.f32 %v3298_v26, %v3297_v53 }
 0x399   : > { %v3316_v2 = vadd.f32 %v3315_v54, %v3314_v4  ;;  %v3322_v14 = vrot.slane %v3321_v16, 4  ;;  %v3285_v28 = vadd.f32 %v3284_v27, %v3283_v12  ;;  %v3307_v58 = vsel %vm742_vm3, %v3245_v18, 0.0 }
 0x39a   : > { %v3302_v37 = vadd.f32 %v3301_v62, %v3300_v59  ;;  %v3308_v63 = vrot.slane %v3307_v58, 4 }
 0x39b   : > { %v3317_v40 = vrot.slane %v3316_v2, 2  ;;  %v3323_v31 = vadd.f32 %v3322_v14, %v3321_v16  ;;  %v3599_v39 = vsel %vm3528_vm0, %v3285_v28, %v3278_v5 }
 0x39c   : > { %v3303_v23 = vrot.slane %v3302_v37, 2  ;;  %v3600_v61 = vsel %vm3530_vm4, %v3292_v47, %v3599_v39  ;;  %v3309_v45 = vadd.f32 %v3308_v63, %v3307_v58 }
 0x39d   : > { %v3324_v36 = vrot.slane %v3323_v31, 2  ;;  %v3601_v8 = vsel %vm3532_vm5, %v3299_v50, %v3600_v61  ;;  %v3318_v21 = vadd.f32 %v3317_v40, %v3316_v2 }
 0x39e   : > { %v3304_v1 = vadd.f32 %v3303_v23, %v3302_v37  ;;  %v3310_v33 = vrot.slane %v3309_v45, 2 }
 0x39f   : > { %v3325_v25 = vadd.f32 %v3324_v36, %v3323_v31  ;;  %v3319_v29 = vrot.slane %v3318_v21, 1 }
 0x3a0   : > { %v3305_v52 = vrot.slane %v3304_v1, 1  ;;  %v3311_v57 = vadd.f32 %v3310_v33, %v3309_v45 }
 0x3a1   : > { %v3326_v56 = vrot.slane %v3325_v25, 1  ;;  %v3320_v43 = vadd.f32 %v3319_v29, %v3318_v21 }
 0x3a2   : > { %v3306_v6 = vadd.f32 %v3305_v52, %v3304_v1  ;;  %v3312_v9 = vrot.slane %v3311_v57, 1 }
 0x3a3   : > { %v3327_v7 = vadd.f32 %v3326_v56, %v3325_v25 }
 0x3a4   : > { %v3602_v22 = vsel %vm3534_vm6, %v3306_v6, %v3601_v8  ;;  %v3313_v49 = vadd.f32 %v3312_v9, %v3311_v57 }
 0x3a6   : > { %v3603_v38 = vsel %vm3536_vm7, %v3313_v49, %v3602_v22 }
 0x3a7   : > { %v3604_v19 = vsel %vm3538_vm8, %v3320_v43, %v3603_v38 }
 0x3a8   : > { %v4294_v55 = vpop.f32.mrb[36].mxu0  ;;  %v6695_v44 = vsel %vm3540_vm9, %v3327_v7, %v3604_v19 }
 0x3a9   : > { %v3150_v30 = vadd.f32 %v4294_v55, %v6667_v10  ;;  %v3141_v60 = vpop.f32.mrb[37].mxu0 }
 0x3aa   : > { %v3142_v42 = vadd.f32 %v6667_v10, %v3141_v60  ;;  %v4295_v13 = vpop.f32.mrb[38].mxu0 }
 0x3ab   : > { %v3250_v11 = vmul.f32 %v3237_v51, %v3150_v30  ;;  %v3153_v24 = vadd.f32 %v4295_v13, %v6667_v10  ;;  %v3144_v53 = vpop.f32.mrb[39].mxu0 }
 0x3ac   : > { %v3248_v35 = vmul.f32 %v3237_v51, %v3142_v42  ;;  %v3145_v20 = vadd.f32 %v6667_v10, %v3144_v53 }
 0x3ad   : > { %v3342_v0 = vsel %vm742_vm3, %v3250_v11, 0.0  ;;  %v3251_v12 = vmul.f32 %v3237_v51, %v3153_v24 }
 0x3ae   : > { %v3343_v4 = vrot.slane %v3342_v0, 4  ;;  %v3328_v46 = vsel %vm742_vm3, %v3248_v35, 0.0  ;;  %v3249_v17 = vmul.f32 %v3237_v51, %v3145_v20 }
 0x3af   : > { %v3329_v54 = vrot.slane %v3328_v46, 4  ;;  %v3349_v59 = vsel %vm742_vm3, %v3251_v12, 0.0 }
 0x3b0   : > { %v3344_v26 = vadd.f32 %v3343_v4, %v3342_v0  ;;  %v3350_v27 = vrot.slane %v3349_v59, 4  ;;  %v3335_v62 = vsel %vm742_vm3, %v3249_v17, 0.0 }
 0x3b1   : > { %v3330_v16 = vadd.f32 %v3329_v54, %v3328_v46  ;;  %v3336_v2 = vrot.slane %v3335_v62, 4 }
 0x3b2   : > { %v3345_v14 = vrot.slane %v3344_v26, 2  ;;  %v3351_v18 = vadd.f32 %v3350_v27, %v3349_v59 }
 0x3b3   : > { %v3331_v5 = vrot.slane %v3330_v16, 2  ;;  %v3337_v28 = vadd.f32 %v3336_v2, %v3335_v62 }
 0x3b4   : > { %v3346_v37 = vadd.f32 %v3345_v14, %v3344_v26  ;;  %v3352_v47 = vrot.slane %v3351_v18, 2 }
 0x3b5   : > { %v3332_v40 = vadd.f32 %v3331_v5, %v3330_v16  ;;  %v3338_v31 = vrot.slane %v3337_v28, 2  ;;  %v4298_v50 = vpop.f32.mrb[40].mxu0  ;;  %v6716_v5 = vld [vmem:[%s6662_s18 + $0x10] sm:$0xff] }
 0x3b6   : > { %v3353_v58 = vadd.f32 %v3352_v47, %v3351_v18  ;;  %v3166_v63 = vadd.f32 %v4298_v50, %v6667_v10  ;;  %v3157_v61 = vpop.f32.mrb[41].mxu0  ;;  %v3347_v36 = vrot.slane %v3346_v37, 1 }
 0x3b7   : > { %v3333_v39 = vrot.slane %v3332_v40, 1  ;;  %v3339_v23 = vadd.f32 %v3338_v31, %v3337_v28  ;;  %v3158_v1 = vadd.f32 %v6667_v10, %v3157_v61  ;;  %v4299_v8 = vpop.f32.mrb[42].mxu0 }
 0x3b8   : > { %v3354_v45 = vrot.slane %v3353_v58, 1  ;;  %v3254_v52 = vmul.f32 %v3237_v51, %v3166_v63  ;;  %v3169_v25 = vadd.f32 %v4299_v8, %v6667_v10  ;;  %v3160_v33 = vpop.f32.mrb[43].mxu0  ;;  %v3348_v49 = vadd.f32 %v3347_v36, %v3346_v37 }
 0x3b9   : > { %v3340_v21 = vrot.slane %v3339_v23, 1  ;;  %v3252_v6 = vmul.f32 %v3237_v51, %v3158_v1  ;;  %v3161_v57 = vadd.f32 %v6667_v10, %v3160_v33  ;;  %v3334_v29 = vadd.f32 %v3333_v39, %v3332_v40 }
 0x3ba   : > { %v3370_v56 = vsel %vm742_vm3, %v3254_v52, 0.0  ;;  %v3255_v9 = vmul.f32 %v3237_v51, %v3169_v25  ;;  %v3355_v55 = vadd.f32 %v3354_v45, %v3353_v58 }
 0x3bb   : > { %v3341_v22 = vadd.f32 %v3340_v21, %v3339_v23  ;;  %v3371_v43 = vrot.slane %v3370_v56, 4  ;;  %v3356_v7 = vsel %vm742_vm3, %v3252_v6, 0.0  ;;  %v3253_v38 = vmul.f32 %v3237_v51, %v3161_v57 }
 0x3bc   : > { %v3357_v30 = vrot.slane %v3356_v7, 4  ;;  %v3377_v60 = vsel %vm742_vm3, %v3255_v9, 0.0 }
 0x3bd   : > { %v3606_v19 = vsel %vm3528_vm0, %v3341_v22, %v3334_v29  ;;  %v3372_v13 = vadd.f32 %v3371_v43, %v3370_v56  ;;  %v3378_v11 = vrot.slane %v3377_v60, 4  ;;  %v3363_v24 = vsel %vm742_vm3, %v3253_v38, 0.0 }
 0x3be   : > { %v3607_v42 = vsel %vm3530_vm4, %v3348_v49, %v3606_v19  ;;  %v3358_v53 = vadd.f32 %v3357_v30, %v3356_v7  ;;  %v3364_v20 = vrot.slane %v3363_v24, 4 }
 0x3bf   : > { %v3608_v35 = vsel %vm3532_vm5, %v3355_v55, %v3607_v42  ;;  %v3373_v0 = vrot.slane %v3372_v13, 2  ;;  %v3379_v12 = vadd.f32 %v3378_v11, %v3377_v60 }
 0x3c0   : > { %v3359_v51 = vrot.slane %v3358_v53, 2  ;;  %v3365_v4 = vadd.f32 %v3364_v20, %v3363_v24 }
 0x3c1   : > { %v3374_v46 = vadd.f32 %v3373_v0, %v3372_v13  ;;  %v3380_v17 = vrot.slane %v3379_v12, 2 }
 0x3c2   : > { %v3360_v54 = vadd.f32 %v3359_v51, %v3358_v53  ;;  %v3366_v59 = vrot.slane %v3365_v4, 2 }
 0x3c3   : > { %v3381_v26 = vadd.f32 %v3380_v17, %v3379_v12  ;;  %v3375_v16 = vrot.slane %v3374_v46, 1 }
 0x3c4   : > { %v3361_v27 = vrot.slane %v3360_v54, 1  ;;  %v3367_v62 = vadd.f32 %v3366_v59, %v3365_v4 }
 0x3c5   : > { %v3382_v14 = vrot.slane %v3381_v26, 1  ;;  %v3376_v40 = vadd.f32 %v3375_v16, %v3374_v46 }
 0x3c6   : > { %v3362_v2 = vadd.f32 %v3361_v27, %v3360_v54  ;;  %v3368_v18 = vrot.slane %v3367_v62, 1 }
 0x3c7   : > { %v3383_v50 = vadd.f32 %v3382_v14, %v3381_v26 }
 0x3c8   : > { %v3609_v28 = vsel %vm3534_vm6, %v3362_v2, %v3608_v35  ;;  %v3369_v37 = vadd.f32 %v3368_v18, %v3367_v62 }
 0x3c9   : > { %v4302_v47 = vpop.f32.mrb[44].mxu0 }
 0x3ca   : > { %v3182_v31 = vadd.f32 %v4302_v47, %v6667_v10  ;;  %v3173_v58 = vpop.f32.mrb[45].mxu0  ;;  %v3610_v63 = vsel %vm3536_vm7, %v3369_v37, %v3609_v28 }
 0x3cb   : > { %v3174_v39 = vadd.f32 %v6667_v10, %v3173_v58  ;;  %v4303_v23 = vpop.f32.mrb[46].mxu0  ;;  %v3611_v8 = vsel %vm3538_vm8, %v3376_v40, %v3610_v63 }
 0x3cc   : > { %v3258_v61 = vmul.f32 %v6716_v5, %v3182_v31  ;;  %v3185_v36 = vadd.f32 %v4303_v23, %v6667_v10  ;;  %v3176_v1 = vpop.f32.mrb[47].mxu0  ;;  %v3612_v52 = vsel %vm3540_vm9, %v3383_v50, %v3611_v8 }
 0x3cd   : > { %v3256_v45 = vmul.f32 %v6716_v5, %v3174_v39  ;;  %v3177_v21 = vadd.f32 %v6667_v10, %v3176_v1  ;;  %v3632_v6 = vpack.c.bf16 %v3612_v52, %v6695_v44 }
 0x3ce   : > { %v3398_v25 = vsel %vm742_vm3, %v3258_v61, 0.0  ;;  %v3259_v33 = vmul.f32 %v6716_v5, %v3185_v36 }
 0x3cf   : > { %v3399_v57 = vrot.slane %v3398_v25, 4  ;;  %v3384_v29 = vsel %vm742_vm3, %v3256_v45, 0.0  ;;  %v3257_v22 = vmul.f32 %v6716_v5, %v3177_v21  ;;  %4038 = vmatprep.mubr.msk.bf16.mxu1 %vm742_vm3, %v3632_v6 }
 0x3d0   : > { %v3385_v56 = vrot.slane %v3384_v29, 4  ;;  %v3405_v9 = vsel %vm742_vm3, %v3259_v33, 0.0  ;;  %3770 = vmatmul.mubr.bf16.vlgmr.msra.gmra.mrb[72].mxu1 %v3631_v15 }
 0x3d1   : > { %v3400_v49 = vadd.f32 %v3399_v57, %v3398_v25  ;;  %v3406_v43 = vrot.slane %v3405_v9, 4  ;;  %v3391_v7 = vsel %vm742_vm3, %v3257_v22, 0.0 }
 0x3d2   : > { %v3386_v38 = vadd.f32 %v3385_v56, %v3384_v29  ;;  %v3392_v44 = vrot.slane %v3391_v7, 4 }
 0x3d3   : > { %v3401_v55 = vrot.slane %v3400_v49, 2  ;;  %v3407_v19 = vadd.f32 %v3406_v43, %v3405_v9 }
 0x3d4   : > { %v3387_v30 = vrot.slane %v3386_v38, 2  ;;  %v3393_v60 = vadd.f32 %v3392_v44, %v3391_v7 }
 0x3d5   : > { %v3402_v42 = vadd.f32 %v3401_v55, %v3400_v49  ;;  %v3408_v13 = vrot.slane %v3407_v19, 2 }
 0x3d6   : > { %v3388_v11 = vadd.f32 %v3387_v30, %v3386_v38  ;;  %v3394_v24 = vrot.slane %v3393_v60, 2  ;;  %v6755_v38 = vld [vmem:[%s6662_s18 + $0x18] sm:$0xff]  ;;  %s4703_s18 = scalar_lea.vmem %s6801_s23, 512 }
 0x3d7   : > { %v3409_v53 = vadd.f32 %v3408_v13, %v3407_v19  ;;  %v3403_v0 = vrot.slane %v3402_v42, 1  ;;  %p4704_p12 = scmp.ne.s32.totalorder %s6801_s23, %s4703_s18  ;;  %p4711_p2 = scmp.lt.s32.totalorder %s4709_s20, %s4703_s18 }
 0x3d8   : > { %v3389_v35 = vrot.slane %v3388_v11, 1  ;;  %v3395_v20 = vadd.f32 %v3394_v24, %v3393_v60 }
 0x3d9   : > { %v3410_v12 = vrot.slane %v3409_v53, 1  ;;  %v3404_v17 = vadd.f32 %v3403_v0, %v3402_v42  ;;  %p4705_p13 = pnand %p4704_p12, %p4895_p5  ;;  %p4712_p3 = por %p4711_p2, %p4710_p1 }
 0x3da   : > { %v3396_v51 = vrot.slane %v3395_v20, 1  ;;  %v4306_v4 = vpop.f32.mrb[48].mxu0  ;;  %v3390_v46 = vadd.f32 %v3389_v35, %v3388_v11 }
 0x3db   : > { %v3198_v34 = vadd.f32 %v4306_v4, %v6667_v10  ;;  %v3189_v15 = vpop.f32.mrb[49].mxu0  ;;  %v3411_v26 = vadd.f32 %v3410_v12, %v3409_v53  ;;  %p4706_p0 = pneg %p4705_p13 }
 0x3dc   : > { %v3397_v3 = vadd.f32 %v3396_v51, %v3395_v20  ;;  %v3190_v54 = vadd.f32 %v6667_v10, %v3189_v15  ;;  %v4307_v59 = vpop.f32.mrb[50].mxu0 }
 0x3dd   : > { %v3262_v62 = vmul.f32 %v6716_v5, %v3198_v34  ;;  %v3201_v16 = vadd.f32 %v4307_v59, %v6667_v10  ;;  %v3192_v2 = vpop.f32.mrb[51].mxu0  ;;  %p4713_p4 = pnand %p4712_p3, %p4706_p0 }
 0x3de   : > { %v3613_v27 = vsel %vm3528_vm0, %v3397_v3, %v3390_v46  ;;  %v3260_v18 = vmul.f32 %v6716_v5, %v3190_v54  ;;  %v3193_v28 = vadd.f32 %v6667_v10, %v3192_v2 }
 0x3df   : > { %v3614_v14 = vsel %vm3530_vm4, %v3404_v17, %v3613_v27  ;;  %v3426_v37 = vsel %vm742_vm3, %v3262_v62, 0.0  ;;  %v3263_v40 = vmul.f32 %v6716_v5, %v3201_v16 }
 0x3e0   : > { %v3615_v47 = vsel %vm3532_vm5, %v3411_v26, %v3614_v14  ;;  %v3427_v31 = vrot.slane %v3426_v37, 4  ;;  %v3412_v58 = vsel %vm742_vm3, %v3260_v18, 0.0  ;;  %v3261_v50 = vmul.f32 %v6716_v5, %v3193_v28 }
 0x3e1   : > { %v3413_v39 = vrot.slane %v3412_v58, 4  ;;  %v3433_v23 = vsel %vm742_vm3, %v3263_v40, 0.0 }
 0x3e2   : > { %v3428_v63 = vadd.f32 %v3427_v31, %v3426_v37  ;;  %v3434_v61 = vrot.slane %v3433_v23, 4  ;;  %v3419_v36 = vsel %vm742_vm3, %v3261_v50, 0.0 }
 0x3e3   : > { %v3414_v1 = vadd.f32 %v3413_v39, %v3412_v58  ;;  %v3420_v8 = vrot.slane %v3419_v36, 4 }
 0x3e4   : > { %v3429_v45 = vrot.slane %v3428_v63, 2  ;;  %v3435_v21 = vadd.f32 %v3434_v61, %v3433_v23 }
 0x3e5   : > { %v3415_v52 = vrot.slane %v3414_v1, 2  ;;  %v3421_v25 = vadd.f32 %v3420_v8, %v3419_v36 }
 0x3e6   : > { %v3430_v33 = vadd.f32 %v3429_v45, %v3428_v63  ;;  %v3436_v6 = vrot.slane %v3435_v21, 2 }
 0x3e7   : > { %v3416_v57 = vadd.f32 %v3415_v52, %v3414_v1  ;;  %v3422_v29 = vrot.slane %v3421_v25, 2 }
 0x3e8   : > { %v3437_v22 = vadd.f32 %v3436_v6, %v3435_v21  ;;  %v3431_v9 = vrot.slane %v3430_v33, 1 }
 0x3e9   : > { %v3417_v5 = vrot.slane %v3416_v57, 1  ;;  %v3423_v56 = vadd.f32 %v3422_v29, %v3421_v25 }
 0x3ea   : > { %v3438_v43 = vrot.slane %v3437_v22, 1  ;;  %v3432_v42 = vadd.f32 %v3431_v9, %v3430_v33 }
 0x3eb   : > { %v3418_v49 = vadd.f32 %v3417_v5, %v3416_v57  ;;  %v3424_v7 = vrot.slane %v3423_v56, 1 }
 0x3ec   : > { %v3439_v24 = vadd.f32 %v3438_v43, %v3437_v22 }
 0x3ed   : > { %v3616_v55 = vsel %vm3534_vm6, %v3418_v49, %v3615_v47  ;;  %v3425_v19 = vadd.f32 %v3424_v7, %v3423_v56 }
 0x3ee   : > { %v4310_v44 = vpop.f32.mrb[52].mxu0 }
 0x3ef   : > { %v3214_v30 = vadd.f32 %v4310_v44, %v6667_v10  ;;  %v3205_v60 = vpop.f32.mrb[53].mxu0  ;;  %v3617_v0 = vsel %vm3536_vm7, %v3425_v19, %v3616_v55 }
 0x3f0   : > { %v3206_v13 = vadd.f32 %v6667_v10, %v3205_v60  ;;  %v4311_v11 = vpop.f32.mrb[54].mxu0  ;;  %v3618_v4 = vsel %vm3538_vm8, %v3432_v42, %v3617_v0 }
 0x3f1   : > { %v3266_v53 = vmul.f32 %v6755_v38, %v3214_v30  ;;  %v3217_v35 = vadd.f32 %v4311_v11, %v6667_v10  ;;  %v3208_v20 = vpop.f32.mrb[55].mxu0  ;;  %v6769_v34 = vsel %vm3540_vm9, %v3439_v24, %v3618_v4 }
 0x3f2   : > { %v3264_v12 = vmul.f32 %v6755_v38, %v3206_v13  ;;  %v3209_v51 = vadd.f32 %v6667_v10, %v3208_v20 }
 0x3f3   : > { %v3454_v46 = vsel %vm742_vm3, %v3266_v53, 0.0  ;;  %v3267_v3 = vmul.f32 %v6755_v38, %v3217_v35 }
 0x3f4   : > { %v3455_v15 = vrot.slane %v3454_v46, 4  ;;  %v3440_v17 = vsel %vm742_vm3, %v3264_v12, 0.0  ;;  %v3265_v54 = vmul.f32 %v6755_v38, %v3209_v51 }
 0x3f5   : > { %v3441_v59 = vrot.slane %v3440_v17, 4  ;;  %v3461_v26 = vsel %vm742_vm3, %v3267_v3, 0.0 }
 0x3f6   : > { %v3456_v27 = vadd.f32 %v3455_v15, %v3454_v46  ;;  %v3462_v62 = vrot.slane %v3461_v26, 4  ;;  %v3447_v16 = vsel %vm742_vm3, %v3265_v54, 0.0 }
 0x3f7   : > { %v3442_v2 = vadd.f32 %v3441_v59, %v3440_v17  ;;  %v3448_v14 = vrot.slane %v3447_v16, 4 }
 0x3f8   : > { %v3457_v18 = vrot.slane %v3456_v27, 2  ;;  %v3463_v28 = vadd.f32 %v3462_v62, %v3461_v26 }
 0x3f9   : > { %v3443_v37 = vrot.slane %v3442_v2, 2  ;;  %v3449_v47 = vadd.f32 %v3448_v14, %v3447_v16 }
 0x3fa   : > { %v3458_v40 = vadd.f32 %v3457_v18, %v3456_v27  ;;  %v3464_v31 = vrot.slane %v3463_v28, 2 }
 0x3fb   : > { %v3444_v58 = vadd.f32 %v3443_v37, %v3442_v2  ;;  %v3450_v50 = vrot.slane %v3449_v47, 2 }
 0x3fc   : > { %v3465_v39 = vadd.f32 %v3464_v31, %v3463_v28  ;;  %v3459_v36 = vrot.slane %v3458_v40, 1 }
 0x3fd   : > { %v3445_v23 = vrot.slane %v3444_v58, 1  ;;  %v3451_v63 = vadd.f32 %v3450_v50, %v3449_v47  ;;  %v4314_v61 = vpop.f32.mrb[56].mxu0 }
 0x3fe   : > { %v3466_v1 = vrot.slane %v3465_v39, 1  ;;  %v3230_v8 = vadd.f32 %v4314_v61, %v6667_v10  ;;  %v3221_v45 = vpop.f32.mrb[57].mxu0  ;;  %v3460_v9 = vadd.f32 %v3459_v36, %v3458_v40 }
 0x3ff   : > { %v3452_v21 = vrot.slane %v3451_v63, 1  ;;  %v3222_v52 = vadd.f32 %v6667_v10, %v3221_v45  ;;  %v4315_v25 = vpop.f32.mrb[58].mxu0  ;;  %v3446_v29 = vadd.f32 %v3445_v23, %v3444_v58 }
 0x400   : > { %v3270_v33 = vmul.f32 %v6755_v38, %v3230_v8  ;;  %v3233_v6 = vadd.f32 %v4315_v25, %v6667_v10  ;;  %v3224_v57 = vpop.f32.mrb[59].mxu0  ;;  %v3467_v49 = vadd.f32 %v3466_v1, %v3465_v39 }
 0x401   : > { %v3453_v22 = vadd.f32 %v3452_v21, %v3451_v63  ;;  %v3268_v5 = vmul.f32 %v6755_v38, %v3222_v52  ;;  %v3225_v56 = vadd.f32 %v6667_v10, %v3224_v57 }
 0x402   : > { %v3482_v43 = vsel %vm742_vm3, %v3270_v33, 0.0  ;;  %v3271_v7 = vmul.f32 %v6755_v38, %v3233_v6 }
 0x403   : > { %v3620_v44 = vsel %vm3528_vm0, %v3453_v22, %v3446_v29  ;;  %v3483_v55 = vrot.slane %v3482_v43, 4  ;;  %v3468_v19 = vsel %vm742_vm3, %v3268_v5, 0.0  ;;  %v3269_v30 = vmul.f32 %v6755_v38, %v3225_v56 }
 0x404   : > { %v3621_v60 = vsel %vm3530_vm4, %v3460_v9, %v3620_v44  ;;  %v3469_v42 = vrot.slane %v3468_v19, 4  ;;  %v3489_v13 = vsel %vm742_vm3, %v3271_v7, 0.0 }
 0x405   : > { %v3484_v11 = vadd.f32 %v3483_v55, %v3482_v43  ;;  %v3622_v10 = vsel %vm3532_vm5, %v3467_v49, %v3621_v60  ;;  %v3490_v24 = vrot.slane %v3489_v13, 4  ;;  %v3475_v53 = vsel %vm742_vm3, %v3269_v30, 0.0 }
 0x406   : > { %v3470_v35 = vadd.f32 %v3469_v42, %v3468_v19  ;;  %v3476_v20 = vrot.slane %v3475_v53, 4 }
 0x407   : > { %v3485_v0 = vrot.slane %v3484_v11, 2  ;;  %v3491_v12 = vadd.f32 %v3490_v24, %v3489_v13 }
 0x408   : > { %v3471_v51 = vrot.slane %v3470_v35, 2  ;;  %v3477_v4 = vadd.f32 %v3476_v20, %v3475_v53 }
 0x409   : > { %v3486_v46 = vadd.f32 %v3485_v0, %v3484_v11  ;;  %v3492_v3 = vrot.slane %v3491_v12, 2 }
 0x40a   : > { %v3472_v38 = vadd.f32 %v3471_v51, %v3470_v35  ;;  %v3478_v15 = vrot.slane %v3477_v4, 2 }
 0x40b   : > { %v3493_v17 = vadd.f32 %v3492_v3, %v3491_v12  ;;  %v3487_v26 = vrot.slane %v3486_v46, 1 }
 0x40c   : > { %v3473_v54 = vrot.slane %v3472_v38, 1  ;;  %v3479_v59 = vadd.f32 %v3478_v15, %v3477_v4 }
 0x40d   : > { %v3494_v62 = vrot.slane %v3493_v17, 1  ;;  %v3488_v18 = vadd.f32 %v3487_v26, %v3486_v46 }
 0x40e   : > { %v3474_v27 = vadd.f32 %v3473_v54, %v3472_v38  ;;  %v3480_v16 = vrot.slane %v3479_v59, 1 }
 0x40f   : > { %v3495_v28 = vadd.f32 %v3494_v62, %v3493_v17 }
 0x410   : > { %v3623_v2 = vsel %vm3534_vm6, %v3474_v27, %v3622_v10  ;;  %v3481_v14 = vadd.f32 %v3480_v16, %v3479_v59 }
 0x412   : > { %v3624_v37 = vsel %vm3536_vm7, %v3481_v14, %v3623_v2 }
 0x413   : > { %v3625_v47 = vsel %vm3538_vm8, %v3488_v18, %v3624_v37 }
 0x414   : > { %v3626_v40 = vsel %vm3540_vm9, %v3495_v28, %v3625_v47 }
 0x415   : > { %v3634_v31 = vpack.c.bf16 %v3626_v40, %v6769_v34 }
 0x417   : > { %4039 = vmatprep.mubr.msk.bf16.mxu1 %vm742_vm3, %v3634_v31 }
 0x418   : > { %3778 = vmatmul.mubr.bf16.gmra.mrb[76].mxu1 %v3633_v48 }
 0x4a3   : > { %v3771_v58 = vpop.f32.mrb[72].mxu1 }
 0x4a4   : > { %3786 = vst [vmem:[%s563_s27] sm:$0xff] %v3771_v58  ;;  %v3773_v50 = vpop.f32.mrb[73].mxu1 }
 0x4a5   : > { %v3774_v39 = vpop.f32.mrb[74].mxu1 }
 0x4a6   : > { %3787 = vst [vmem:[%s563_s27 + $0x8] sm:$0xff] %v3774_v39  ;;  %v3776_v23 = vpop.f32.mrb[75].mxu1 }
 0x4eb   : > { %v3779_v34 = vpop.f32.mrb[76].mxu1 }
 0x4ec   : > { %3788 = vst [vmem:[%s563_s27 + $0x10] sm:$0xff] %v3779_v34  ;;  %v3781_v41 = vpop.f32.mrb[77].mxu1 }
 0x4ed   : > { %v3782_v32 = vpop.f32.mrb[78].mxu1 }
 0x4ee   : > { %3789 = vst [vmem:[%s563_s27 + $0x18] sm:$0xff] %v3782_v32  ;;  %v3784_v48 = vpop.f32.mrb[79].mxu1 }
 0x4ef   : > { %4716 = shalt.err (!%p4713_p4)
}
 0x4f0   : > { %s4717_s28 = scalar_lea.hbm %s6806_s6, 512  ;;  %s4721_s29 = scalar_lea.hbm %s6865_s16, 1024 }
 0x4f1   : > { %p4718_p7 = scmp.ne.s32.totalorder %s6806_s6, %s4717_s28  ;;  %p4722_p10 = scmp.lt.u32.totalorder %s6806_s6, %s6865_s16 }
 0x4f2   : > { %p4723_p11 = scmp.lt.u32.totalorder %s4721_s29, %s4717_s28  ;;  %p4725_p13 = scmp.lt.u32.totalorder %s4717_s28, %s6806_s6 }
 0x4f3   : > { %p4719_p8 = pnand %p4718_p7, %p4895_p5 }
 0x4f4   : > { %p4724_p12 = por %p4723_p11, %p4722_p10 }
 0x4f5   : > { %p4720_p9 = pneg %p4719_p8 }
 0x4f6   : > { %p4726_p0 = por %p4725_p13, %p4724_p12 }
 0x4f8   : > { %p4727_p1 = pnand %p4726_p0, %p4720_p9 }
 0x4fa   : > { %4730 = shalt.err (!%p4727_p1)
}
 0x4fb   : > { %s4770_s18 = smov 128   ;;  %s4771_s25 = smov 8  }
 0x4fc   : > { %4332 = dma.vmem_to_hbm [thread:$0]  (%p4895_p5), %s6801_s23, 512, %s6806_s6, %s6808_s17, %s4770_s18, %s4770_s18, %s4771_s25  }
 0x4fd PF: > { %p4338_p2 = scmp.ge.s32.totalorder %s4765_s24, 2  ;;  %s3819_s20 = sand.u32 1, %s4753_s21  }
 0x4fe   : > { %s3820_s28 = scalar_lea.sflag [#allocation3], %s3819_s20 }
 0x4ff   : > { %p4335_p3 = pnand %p4338_p2, %p4899_p6 }
 0x501   : > { %4748 = dma.done.wait (!%p4335_p3), %s3820_s28, 512  }
 0x502   : > { %4750 = vsyncadd (!%p4335_p3), %s3820_s28, 4294966784  ;;  %s7060_s24 = sld [smem:[#allocation6_spill]]  ;;  %s7061_s26 = sld [smem:[#allocation5_spill]] }
 0x503   : > { %s7062_s23 = sld [smem:[#allocation7_spill]]  ;;  %s7063_s21 = smov %s4757_s22 }
 0x508   : > { %p26_p4 = scmp.ge.s32.totalorder %s7060_s24, 4   ;;  %s7064_s22 = smov %s7061_s26 }
 0x50a   :  { %28 = sbr.rel (!%p26_p4) target bundleno = 7 (0x7), region = 128 }
 0x511   :  { %3825 = vsyncpa [#allocation3], 1 }
 0x512   :  { %3827 = vsyncpa [#allocation3 + $0x1], 1 }

</bundles_post_ra>
